<compile_context>
chip_gen: v7x
topology: tpu7x:2x2x1
jax: 0.10.0
libtpu: 0.0.40
codegen_flags: <defaults>
</compile_context>

<pallas_src>
import jax
import jax.numpy as jnp
from jax.experimental import pallas as pl
from jax.experimental.pallas import tpu as pltpu

N_EMBD = 84
N_HEAD = 14
HEAD_SIZE = N_EMBD // N_HEAD        # 6
BLOCK_SIZE = 64
LN_EPS = 1e-5                       # PyTorch nn.LayerNorm default

# padded (lane-dense) sizes
C_PAD = 128                         # embedding 84 -> 128
D_PAD = 8                           # head size 6 -> 8
H_PAD = 16                          # heads 14 -> 16
FF_PAD = 384                        # FFN hidden 336 -> 384


def block_kernel(x_ref, wq_ref, wk_ref, wv_ref, wp_ref, bp_ref,
                 g1_ref, b1_ref, g2_ref, b2_ref,
                 w1_ref, bf1_ref, w2_ref, bf2_ref,
                 o_ref):
    Bb, T, Cp = x_ref.shape
    M = Bb * T
    f32 = jnp.float32
    bf16 = jnp.bfloat16

    x = x_ref[...].reshape(M, Cp)                      # (M,128) f32, pad lanes 0

    inv_c = 1.0 / float(N_EMBD)

    def layernorm(h, g, b):
        # stats over the 84 valid lanes only (pad lanes of h are zero)
        mu = jnp.sum(h, axis=-1, keepdims=True) * inv_c
        ex2 = jnp.sum(h * h, axis=-1, keepdims=True) * inv_c
        var = ex2 - mu * mu
        return (h - mu) * jax.lax.rsqrt(var + LN_EPS) * g + b

    # ---- ln1 ----
    h1 = layernorm(x, g1_ref[...], b1_ref[...])        # pad lanes 0 (gamma/beta pads 0)
    h1b = h1.astype(bf16)

    # ---- head-batched QKV projections (bf16 operands, f32 accumulate) ----
    hb = jnp.broadcast_to(h1b[None], (H_PAD, M, Cp))   # (16, M, 128)
    dn_std = (((2,), (1,)), ((0,), (0,)))              # batched (.., m, k) x (.., k, n)
    q = jax.lax.dot_general(hb, wq_ref[...], dn_std, preferred_element_type=f32)
    k = jax.lax.dot_general(hb, wk_ref[...], dn_std, preferred_element_type=f32)
    v = jax.lax.dot_general(hb, wv_ref[...], dn_std, preferred_element_type=f32)
    qb, kb, vb = q.astype(bf16), k.astype(bf16), v.astype(bf16)   # (16, M, 8)

    # additive causal mask, built once (shared by all heads)
    row = jax.lax.broadcasted_iota(jnp.int32, (T, T), 0)
    col = jax.lax.broadcasted_iota(jnp.int32, (T, T), 1)
    amask = jnp.where(col <= row, 0.0, -1e30).astype(f32)         # (T, T)
    # NOTE: reference scales by n_embd**-0.5 (not head_size**-0.5) on purpose.
    scale = 1.0 / (float(N_EMBD) ** 0.5)

    wp = wp_ref[...]                                              # (16, 8, 128) bf16
    sa_parts = []
    for b in range(Bb):            # static, small; attention core is per-sequence
        lo = b * T
        qs = qb[:, lo:lo + T, :]
        ks = kb[:, lo:lo + T, :]
        vs = vb[:, lo:lo + T, :]
        # scores: contract minor dims (q @ k^T folded into the MXU feed)
        s = jax.lax.dot_general(qs, ks, (((2,), (2,)), ((0,), (0,))),
                                preferred_element_type=f32)       # (16, T, T)
        s = s * scale + amask[None]
        m = jnp.max(s, axis=-1, keepdims=True)
        p = jnp.exp(s - m)
        l = jnp.sum(p, axis=-1, keepdims=True)                    # (16, T, 1)
        ctx = jax.lax.dot_general(p.astype(bf16), vs, dn_std,
                                  preferred_element_type=f32)     # (16, T, 8)
        ctx = ctx * pl.reciprocal(l, approx=True)                 # fold softmax denom
        proj = jax.lax.dot_general(ctx.astype(bf16), wp, dn_std,
                                   preferred_element_type=f32)    # (16, T, 128)
        sa_parts.append(jnp.sum(proj, axis=0))                    # (T, 128)
    sa = sa_parts[0] if Bb == 1 else jnp.concatenate(sa_parts, axis=0)
    sa = sa + bp_ref[...]                                         # (M, 128)

    x1 = x + sa

    # ---- ln2 + feed-forward (lane-dense 128 / 384) ----
    h2 = layernorm(x1, g2_ref[...], b2_ref[...]).astype(bf16)
    f = jnp.dot(h2, w1_ref[...], preferred_element_type=f32) + bf1_ref[...]
    f = jnp.maximum(f, 0.0)
    y = jnp.dot(f.astype(bf16), w2_ref[...], preferred_element_type=f32) + bf2_ref[...]

    o_ref[...] = (x1 + y).reshape(Bb, T, Cp).astype(o_ref.dtype)


def _pick_chunk(B, T):
    """Sequences per grid step: keep >=2 parallel steps when possible (v7x)
    while folding several sequences into each step's M dimension."""
    if T % 8 != 0 or B < 2:
        return 1
    bb = 1
    for cand in range(1, min(8, B // 2) + 1):
        if B % cand == 0:
            bb = cand
    return bb


def _pack_params(p):
    f32, bf16 = jnp.float32, jnp.bfloat16

    def pad_to(a, shape):
        return jnp.pad(a, [(0, s - d) for d, s in zip(a.shape, shape)])

    def head_major_in(w):   # (C, C) cols grouped per head -> (H_PAD, C_PAD, D_PAD)
        w = w.reshape(N_EMBD, N_HEAD, HEAD_SIZE).transpose(1, 0, 2)   # (14, 84, 6)
        return pad_to(w, (H_PAD, C_PAD, D_PAD)).astype(bf16)

    def head_major_out(w):  # (C, C) rows grouped per head -> (H_PAD, D_PAD, C_PAD)
        w = w.reshape(N_HEAD, HEAD_SIZE, N_EMBD)                      # (14, 6, 84)
        return pad_to(w, (H_PAD, D_PAD, C_PAD)).astype(bf16)

    def row_pad(v, width):
        return pad_to(v.astype(f32), (1, width))

    return dict(
        wq=head_major_in(p["wq"]), wk=head_major_in(p["wk"]), wv=head_major_in(p["wv"]),
        wproj=head_major_out(p["wproj"]),
        bproj=row_pad(p["bproj"], C_PAD),
        g1=row_pad(p["g1"], C_PAD), b1=row_pad(p["bln1"], C_PAD),
        g2=row_pad(p["g2"], C_PAD), b2=row_pad(p["bln2"], C_PAD),
        w1=pad_to(p["w_fc1"], (C_PAD, FF_PAD)).astype(bf16),
        bf1=row_pad(p["b_fc1"], FF_PAD),
        w2=pad_to(p["w_fc2"], (FF_PAD, C_PAD)).astype(bf16),
        bf2=row_pad(p["b_fc2"], C_PAD),
    )


def transformer_block(x, params):
    B, T, C = x.shape
    assert C == N_EMBD and T <= BLOCK_SIZE

    pk = _pack_params(params)
    xp = jnp.pad(x.astype(jnp.float32), ((0, 0), (0, 0), (0, C_PAD - C)))

    Bb = _pick_chunk(B, T)
    n_chunks = B // Bb

    weight_order = ("wq", "wk", "wv", "wproj", "bproj",
                    "g1", "b1", "g2", "b2", "w1", "bf1", "w2", "bf2")
    weights = [pk[k] for k in weight_order]

    def full_spec(a):
        nd = a.ndim
        return pl.BlockSpec(a.shape, lambda i: (0,) * nd)

    in_specs = [pl.BlockSpec((Bb, T, C_PAD), lambda i: (i, 0, 0))]
    in_specs += [full_spec(w) for w in weights]

    out_padded = pl.pallas_call(
        block_kernel,
        out_shape=jax.ShapeDtypeStruct((B, T, C_PAD), jnp.float32),
        grid_spec=pltpu.PrefetchScalarGridSpec(
            num_scalar_prefetch=0,
            grid=(n_chunks,),
            in_specs=in_specs,
            out_specs=pl.BlockSpec((Bb, T, C_PAD), lambda i: (i, 0, 0)),
        ),
        compiler_params=pltpu.CompilerParams(
            dimension_semantics=("parallel",)),
    )(xp, *weights)
    return out_padded[:, :, :C]


def init_params(key):
    ks = jax.random.split(key, 10)
    s = 0.05
    f32 = jnp.float32
    return {
        "wq":    s * jax.random.normal(ks[0], (N_EMBD, N_EMBD), f32),
        "wk":    s * jax.random.normal(ks[1], (N_EMBD, N_EMBD), f32),
        "wv":    s * jax.random.normal(ks[2], (N_EMBD, N_EMBD), f32),
        "wproj": s * jax.random.normal(ks[3], (N_EMBD, N_EMBD), f32),
        "bproj": s * jax.random.normal(ks[4], (1, N_EMBD), f32),
        "g1":    jnp.ones((1, N_EMBD), f32),
        "bln1":  jnp.zeros((1, N_EMBD), f32),
        "g2":    jnp.ones((1, N_EMBD), f32),
        "bln2":  jnp.zeros((1, N_EMBD), f32),
        "w_fc1": s * jax.random.normal(ks[5], (N_EMBD, 4 * N_EMBD), f32),
        "b_fc1": s * jax.random.normal(ks[6], (1, 4 * N_EMBD), f32),
        "w_fc2": s * jax.random.normal(ks[7], (4 * N_EMBD, N_EMBD), f32),
        "b_fc2": s * jax.random.normal(ks[8], (1, N_EMBD), f32),
    }


def reference_block(x, p):
    """Pure-JAX f32 reference mirroring the PyTorch module."""
    def ln(h, g, b):
        mu = jnp.mean(h, axis=-1, keepdims=True)
        var = jnp.mean((h - mu) ** 2, axis=-1, keepdims=True)
        return (h - mu) / jnp.sqrt(var + LN_EPS) * g + b

    B, T, C = x.shape
    h = ln(x, p["g1"], p["bln1"])
    mask = jnp.tril(jnp.ones((T, T), bool))
    outs = []
    for hd in range(N_HEAD):
        lo, hi = hd * HEAD_SIZE, (hd + 1) * HEAD_SIZE
        q = h @ p["wq"][:, lo:hi]
        k = h @ p["wk"][:, lo:hi]
        v = h @ p["wv"][:, lo:hi]
        wei = jnp.einsum("btd,bsd->bts", q, k) * C ** (-0.5)
        wei = jnp.where(mask, wei, -jnp.inf)
        wei = jax.nn.softmax(wei, axis=-1)
        outs.append(jnp.einsum("bts,bsd->btd", wei, v))
    sa = jnp.concatenate(outs, axis=-1) @ p["wproj"] + p["bproj"]
    x1 = x + sa
    h2 = ln(x1, p["g2"], p["bln2"])
    f = jnp.maximum(h2 @ p["w_fc1"] + p["b_fc1"], 0.0) @ p["w_fc2"] + p["b_fc2"]
    return x1 + f


if __name__ == "__main__":
    B, T = 2, 16
    key = jax.random.PRNGKey(0)
    kx, kp = jax.random.split(key)
    x = jax.random.normal(kx, (B, T, N_EMBD), jnp.float32)
    params = init_params(kp)

    out = transformer_block(x, params)
    out = jax.block_until_ready(out)

    ref = reference_block(x, params)
    assert out.shape == (B, T, N_EMBD)
    # bf16 matmul operands (f32 accumulation) -> slightly relaxed tolerance
    assert jnp.allclose(out, ref, atol=2e-2, rtol=2e-2)
    print("KERNEL_OK")
</pallas_src>

<mosaic_0001>
module attributes {stable_mosaic.version = 11 : i64} {
  func.func @block_kernel(%arg0: i32, %arg1: memref<1x16x128xf32, #tpu.memory_space<vmem>>, %arg2: memref<16x128x8xbf16, #tpu.memory_space<vmem>>, %arg3: memref<16x128x8xbf16, #tpu.memory_space<vmem>>, %arg4: memref<16x128x8xbf16, #tpu.memory_space<vmem>>, %arg5: memref<16x8x128xbf16, #tpu.memory_space<vmem>>, %arg6: memref<1x128xf32, #tpu.memory_space<vmem>>, %arg7: memref<1x128xf32, #tpu.memory_space<vmem>>, %arg8: memref<1x128xf32, #tpu.memory_space<vmem>>, %arg9: memref<1x128xf32, #tpu.memory_space<vmem>>, %arg10: memref<1x128xf32, #tpu.memory_space<vmem>>, %arg11: memref<128x384xbf16, #tpu.memory_space<vmem>>, %arg12: memref<1x384xf32, #tpu.memory_space<vmem>>, %arg13: memref<384x128xbf16, #tpu.memory_space<vmem>>, %arg14: memref<1x128xf32, #tpu.memory_space<vmem>>, %arg15: memref<1x16x128xf32, #tpu.memory_space<vmem>>) attributes {dimension_semantics = [#tpu.dimension_semantics<parallel>], iteration_bounds = array<i64: 2>, scalar_prefetch = 0 : i64, scratch_operands = 0 : i64, tpu.core_type = #tpu.core_type<tc>, window_params = [{transform_indices = @transform_0, window_bounds = array<i64: 1, 16, 128>}, {pipeline_mode = #tpu.pipeline_mode<synchronous>, transform_indices = @transform_1, window_bounds = array<i64: 16, 128, 8>}, {pipeline_mode = #tpu.pipeline_mode<synchronous>, transform_indices = @transform_2, window_bounds = array<i64: 16, 128, 8>}, {pipeline_mode = #tpu.pipeline_mode<synchronous>, transform_indices = @transform_3, window_bounds = array<i64: 16, 128, 8>}, {pipeline_mode = #tpu.pipeline_mode<synchronous>, transform_indices = @transform_4, window_bounds = array<i64: 16, 8, 128>}, {pipeline_mode = #tpu.pipeline_mode<synchronous>, transform_indices = @transform_5, window_bounds = array<i64: 1, 128>}, {pipeline_mode = #tpu.pipeline_mode<synchronous>, transform_indices = @transform_6, window_bounds = array<i64: 1, 128>}, {pipeline_mode = #tpu.pipeline_mode<synchronous>, transform_indices = @transform_7, window_bounds = array<i64: 1, 128>}, {pipeline_mode = #tpu.pipeline_mode<synchronous>, transform_indices = @transform_8, window_bounds = array<i64: 1, 128>}, {pipeline_mode = #tpu.pipeline_mode<synchronous>, transform_indices = @transform_9, window_bounds = array<i64: 1, 128>}, {pipeline_mode = #tpu.pipeline_mode<synchronous>, transform_indices = @transform_10, window_bounds = array<i64: 128, 384>}, {pipeline_mode = #tpu.pipeline_mode<synchronous>, transform_indices = @transform_11, window_bounds = array<i64: 1, 384>}, {pipeline_mode = #tpu.pipeline_mode<synchronous>, transform_indices = @transform_12, window_bounds = array<i64: 384, 128>}, {pipeline_mode = #tpu.pipeline_mode<synchronous>, transform_indices = @transform_13, window_bounds = array<i64: 1, 128>}, {transform_indices = @transform_14, window_bounds = array<i64: 1, 16, 128>}]} {
    %c0 = arith.constant 0 : index
    %c0_0 = arith.constant 0 : index
    %c0_1 = arith.constant 0 : index
    %0 = vector.load %arg1[%c0, %c0_0, %c0_1] : memref<1x16x128xf32, #tpu.memory_space<vmem>>, vector<1x16x128xf32>
    %1 = vector.shape_cast %0 : vector<1x16x128xf32> to vector<16x128xf32>
    %c0_2 = arith.constant 0 : index
    %c0_3 = arith.constant 0 : index
    %2 = vector.load %arg7[%c0_2, %c0_3] : memref<1x128xf32, #tpu.memory_space<vmem>>, vector<1x128xf32>
    %c0_4 = arith.constant 0 : index
    %c0_5 = arith.constant 0 : index
    %3 = vector.load %arg8[%c0_4, %c0_5] : memref<1x128xf32, #tpu.memory_space<vmem>>, vector<1x128xf32>
    %cst = arith.constant dense<0.000000e+00> : vector<16xf32>
    %4 = vector.multi_reduction <add>, %1, %cst [1] : vector<16x128xf32> to vector<16xf32>
    %5 = vector.shape_cast %4 : vector<16xf32> to vector<16x1xf32>
    %cst_6 = arith.constant 0.0119047621 : f32
    %6 = vector.broadcast %cst_6 : f32 to vector<16x1xf32>
    %7 = arith.mulf %5, %6 : vector<16x1xf32>
    %8 = arith.mulf %1, %1 : vector<16x128xf32>
    %cst_7 = arith.constant dense<0.000000e+00> : vector<16xf32>
    %9 = vector.multi_reduction <add>, %8, %cst_7 [1] : vector<16x128xf32> to vector<16xf32>
    %10 = vector.shape_cast %9 : vector<16xf32> to vector<16x1xf32>
    %cst_8 = arith.constant 0.0119047621 : f32
    %11 = vector.broadcast %cst_8 : f32 to vector<16x1xf32>
    %12 = arith.mulf %10, %11 : vector<16x1xf32>
    %13 = arith.mulf %7, %7 : vector<16x1xf32>
    %14 = arith.subf %12, %13 : vector<16x1xf32>
    %15 = vector.broadcast %7 : vector<16x1xf32> to vector<16x128xf32>
    %16 = arith.subf %1, %15 : vector<16x128xf32>
    %cst_9 = arith.constant 9.99999974E-6 : f32
    %17 = vector.broadcast %cst_9 : f32 to vector<16x1xf32>
    %18 = arith.addf %14, %17 : vector<16x1xf32>
    %19 = math.rsqrt %18 : vector<16x1xf32>
    %20 = vector.broadcast %19 : vector<16x1xf32> to vector<16x128xf32>
    %21 = arith.mulf %16, %20 : vector<16x128xf32>
    %22 = vector.broadcast %2 : vector<1x128xf32> to vector<16x128xf32>
    %23 = arith.mulf %21, %22 : vector<16x128xf32>
    %24 = vector.broadcast %3 : vector<1x128xf32> to vector<16x128xf32>
    %25 = arith.addf %23, %24 : vector<16x128xf32>
    %26 = arith.truncf %25 : vector<16x128xf32> to vector<16x128xbf16>
    %27 = vector.shape_cast %26 : vector<16x128xbf16> to vector<1x16x128xbf16>
    %28 = vector.shape_cast %27 : vector<1x16x128xbf16> to vector<1x16x128xbf16>
    %29 = vector.broadcast %28 : vector<1x16x128xbf16> to vector<16x16x128xbf16>
    %c0_10 = arith.constant 0 : index
    %c0_11 = arith.constant 0 : index
    %c0_12 = arith.constant 0 : index
    %30 = vector.load %arg2[%c0_10, %c0_11, %c0_12] : memref<16x128x8xbf16, #tpu.memory_space<vmem>>, vector<16x128x8xbf16>
    %cst_13 = arith.constant dense<0.000000e+00> : vector<16x16x8xf32>
    %31 = tpu.matmul %29, %30, %cst_13 {dimension_numbers = #tpu.dot_dimension_numbers<[2], [1], [1], [2], [0, 0, 0, 1, 1, 2], [0], [0]>} : vector<16x16x128xbf16>, vector<16x128x8xbf16>, vector<16x16x8xf32> -> vector<16x16x8xf32>
    %c0_14 = arith.constant 0 : index
    %c0_15 = arith.constant 0 : index
    %c0_16 = arith.constant 0 : index
    %32 = vector.load %arg3[%c0_14, %c0_15, %c0_16] : memref<16x128x8xbf16, #tpu.memory_space<vmem>>, vector<16x128x8xbf16>
    %cst_17 = arith.constant dense<0.000000e+00> : vector<16x16x8xf32>
    %33 = tpu.matmul %29, %32, %cst_17 {dimension_numbers = #tpu.dot_dimension_numbers<[2], [1], [1], [2], [0, 0, 0, 1, 1, 2], [0], [0]>} : vector<16x16x128xbf16>, vector<16x128x8xbf16>, vector<16x16x8xf32> -> vector<16x16x8xf32>
    %c0_18 = arith.constant 0 : index
    %c0_19 = arith.constant 0 : index
    %c0_20 = arith.constant 0 : index
    %34 = vector.load %arg4[%c0_18, %c0_19, %c0_20] : memref<16x128x8xbf16, #tpu.memory_space<vmem>>, vector<16x128x8xbf16>
    %cst_21 = arith.constant dense<0.000000e+00> : vector<16x16x8xf32>
    %35 = tpu.matmul %29, %34, %cst_21 {dimension_numbers = #tpu.dot_dimension_numbers<[2], [1], [1], [2], [0, 0, 0, 1, 1, 2], [0], [0]>} : vector<16x16x128xbf16>, vector<16x128x8xbf16>, vector<16x16x8xf32> -> vector<16x16x8xf32>
    %36 = arith.truncf %31 : vector<16x16x8xf32> to vector<16x16x8xbf16>
    %37 = arith.truncf %33 : vector<16x16x8xf32> to vector<16x16x8xbf16>
    %38 = arith.truncf %35 : vector<16x16x8xf32> to vector<16x16x8xbf16>
    %39 = tpu.iota {dimensions = array<i32: 0>} : vector<16x16xi32>
    %40 = tpu.iota {dimensions = array<i32: 1>} : vector<16x16xi32>
    %41 = arith.cmpi sle, %40, %39 : vector<16x16xi32>
    %cst_22 = arith.constant 0.000000e+00 : f32
    %cst_23 = arith.constant -1.000000e+30 : f32
    %42 = vector.broadcast %cst_22 : f32 to vector<16x16xf32>
    %43 = vector.broadcast %cst_23 : f32 to vector<16x16xf32>
    %44 = arith.select %41, %42, %43 : vector<16x16xi1>, vector<16x16xf32>
    %c0_24 = arith.constant 0 : index
    %c0_25 = arith.constant 0 : index
    %c0_26 = arith.constant 0 : index
    %45 = vector.load %arg5[%c0_24, %c0_25, %c0_26] : memref<16x8x128xbf16, #tpu.memory_space<vmem>>, vector<16x8x128xbf16>
    %cst_27 = arith.constant dense<0.000000e+00> : vector<16x16x16xf32>
    %46 = tpu.matmul %36, %37, %cst_27 {dimension_numbers = #tpu.dot_dimension_numbers<[2], [2], [1], [1], [0, 0, 0, 1, 1, 1], [0], [0]>} : vector<16x16x8xbf16>, vector<16x16x8xbf16>, vector<16x16x16xf32> -> vector<16x16x16xf32>
    %cst_28 = arith.constant 0.109108947 : f32
    %47 = vector.broadcast %cst_28 : f32 to vector<16x16x16xf32>
    %48 = arith.mulf %46, %47 : vector<16x16x16xf32>
    %49 = vector.shape_cast %44 : vector<16x16xf32> to vector<1x16x16xf32>
    %50 = vector.broadcast %49 : vector<1x16x16xf32> to vector<16x16x16xf32>
    %51 = arith.addf %48, %50 : vector<16x16x16xf32>
    %cst_29 = arith.constant dense<0xFF800000> : vector<16x16xf32>
    %52 = vector.multi_reduction <maximumf>, %51, %cst_29 [2] : vector<16x16x16xf32> to vector<16x16xf32>
    %53 = vector.shape_cast %52 : vector<16x16xf32> to vector<16x16x1xf32>
    %54 = vector.broadcast %53 : vector<16x16x1xf32> to vector<16x16x16xf32>
    %55 = arith.subf %51, %54 : vector<16x16x16xf32>
    %56 = math.exp %55 : vector<16x16x16xf32>
    %cst_30 = arith.constant dense<0.000000e+00> : vector<16x16xf32>
    %57 = vector.multi_reduction <add>, %56, %cst_30 [2] : vector<16x16x16xf32> to vector<16x16xf32>
    %58 = vector.shape_cast %57 : vector<16x16xf32> to vector<16x16x1xf32>
    %59 = arith.truncf %56 : vector<16x16x16xf32> to vector<16x16x16xbf16>
    %cst_31 = arith.constant dense<0.000000e+00> : vector<16x16x8xf32>
    %60 = tpu.matmul %59, %38, %cst_31 {dimension_numbers = #tpu.dot_dimension_numbers<[2], [1], [1], [2], [0, 0, 0, 1, 1, 2], [0], [0]>} : vector<16x16x16xbf16>, vector<16x16x8xbf16>, vector<16x16x8xf32> -> vector<16x16x8xf32>
    %61 = tpu.reciprocal %58 {approx = true} : vector<16x16x1xf32> -> vector<16x16x1xf32>
    %62 = vector.broadcast %61 : vector<16x16x1xf32> to vector<16x16x8xf32>
    %63 = arith.mulf %60, %62 : vector<16x16x8xf32>
    %64 = arith.truncf %63 : vector<16x16x8xf32> to vector<16x16x8xbf16>
    %cst_32 = arith.constant dense<0.000000e+00> : vector<16x16x128xf32>
    %65 = tpu.matmul %64, %45, %cst_32 {dimension_numbers = #tpu.dot_dimension_numbers<[2], [1], [1], [2], [0, 0, 0, 1, 1, 2], [0], [0]>} : vector<16x16x8xbf16>, vector<16x8x128xbf16>, vector<16x16x128xf32> -> vector<16x16x128xf32>
    %cst_33 = arith.constant dense<0.000000e+00> : vector<16x128xf32>
    %66 = vector.multi_reduction <add>, %65, %cst_33 [0] : vector<16x16x128xf32> to vector<16x128xf32>
    %c0_34 = arith.constant 0 : index
    %c0_35 = arith.constant 0 : index
    %67 = vector.load %arg6[%c0_34, %c0_35] : memref<1x128xf32, #tpu.memory_space<vmem>>, vector<1x128xf32>
    %68 = vector.broadcast %67 : vector<1x128xf32> to vector<16x128xf32>
    %69 = arith.addf %66, %68 : vector<16x128xf32>
    %70 = arith.addf %1, %69 : vector<16x128xf32>
    %c0_36 = arith.constant 0 : index
    %c0_37 = arith.constant 0 : index
    %71 = vector.load %arg9[%c0_36, %c0_37] : memref<1x128xf32, #tpu.memory_space<vmem>>, vector<1x128xf32>
    %c0_38 = arith.constant 0 : index
    %c0_39 = arith.constant 0 : index
    %72 = vector.load %arg10[%c0_38, %c0_39] : memref<1x128xf32, #tpu.memory_space<vmem>>, vector<1x128xf32>
    %cst_40 = arith.constant dense<0.000000e+00> : vector<16xf32>
    %73 = vector.multi_reduction <add>, %70, %cst_40 [1] : vector<16x128xf32> to vector<16xf32>
    %74 = vector.shape_cast %73 : vector<16xf32> to vector<16x1xf32>
    %cst_41 = arith.constant 0.0119047621 : f32
    %75 = vector.broadcast %cst_41 : f32 to vector<16x1xf32>
    %76 = arith.mulf %74, %75 : vector<16x1xf32>
    %77 = arith.mulf %70, %70 : vector<16x128xf32>
    %cst_42 = arith.constant dense<0.000000e+00> : vector<16xf32>
    %78 = vector.multi_reduction <add>, %77, %cst_42 [1] : vector<16x128xf32> to vector<16xf32>
    %79 = vector.shape_cast %78 : vector<16xf32> to vector<16x1xf32>
    %cst_43 = arith.constant 0.0119047621 : f32
    %80 = vector.broadcast %cst_43 : f32 to vector<16x1xf32>
    %81 = arith.mulf %79, %80 : vector<16x1xf32>
    %82 = arith.mulf %76, %76 : vector<16x1xf32>
    %83 = arith.subf %81, %82 : vector<16x1xf32>
    %84 = vector.broadcast %76 : vector<16x1xf32> to vector<16x128xf32>
    %85 = arith.subf %70, %84 : vector<16x128xf32>
    %cst_44 = arith.constant 9.99999974E-6 : f32
    %86 = vector.broadcast %cst_44 : f32 to vector<16x1xf32>
    %87 = arith.addf %83, %86 : vector<16x1xf32>
    %88 = math.rsqrt %87 : vector<16x1xf32>
    %89 = vector.broadcast %88 : vector<16x1xf32> to vector<16x128xf32>
    %90 = arith.mulf %85, %89 : vector<16x128xf32>
    %91 = vector.broadcast %71 : vector<1x128xf32> to vector<16x128xf32>
    %92 = arith.mulf %90, %91 : vector<16x128xf32>
    %93 = vector.broadcast %72 : vector<1x128xf32> to vector<16x128xf32>
    %94 = arith.addf %92, %93 : vector<16x128xf32>
    %95 = arith.truncf %94 : vector<16x128xf32> to vector<16x128xbf16>
    %c0_45 = arith.constant 0 : index
    %c0_46 = arith.constant 0 : index
    %96 = vector.load %arg11[%c0_45, %c0_46] : memref<128x384xbf16, #tpu.memory_space<vmem>>, vector<128x384xbf16>
    %cst_47 = arith.constant dense<0.000000e+00> : vector<16x384xf32>
    %97 = tpu.matmul %95, %96, %cst_47 {dimension_numbers = #tpu.dot_dimension_numbers<[1], [0], [0], [1], [0, 0, 1, 1], [], []>} : vector<16x128xbf16>, vector<128x384xbf16>, vector<16x384xf32> -> vector<16x384xf32>
    %c0_48 = arith.constant 0 : index
    %c0_49 = arith.constant 0 : index
    %98 = vector.load %arg12[%c0_48, %c0_49] : memref<1x384xf32, #tpu.memory_space<vmem>>, vector<1x384xf32>
    %99 = vector.broadcast %98 : vector<1x384xf32> to vector<16x384xf32>
    %100 = arith.addf %97, %99 : vector<16x384xf32>
    %cst_50 = arith.constant 0.000000e+00 : f32
    %101 = vector.broadcast %cst_50 : f32 to vector<16x384xf32>
    %102 = arith.maximumf %100, %101 : vector<16x384xf32>
    %103 = arith.truncf %102 : vector<16x384xf32> to vector<16x384xbf16>
    %c0_51 = arith.constant 0 : index
    %c0_52 = arith.constant 0 : index
    %104 = vector.load %arg13[%c0_51, %c0_52] : memref<384x128xbf16, #tpu.memory_space<vmem>>, vector<384x128xbf16>
    %cst_53 = arith.constant dense<0.000000e+00> : vector<16x128xf32>
    %105 = tpu.matmul %103, %104, %cst_53 {dimension_numbers = #tpu.dot_dimension_numbers<[1], [0], [0], [1], [0, 0, 1, 1], [], []>} : vector<16x384xbf16>, vector<384x128xbf16>, vector<16x128xf32> -> vector<16x128xf32>
    %c0_54 = arith.constant 0 : index
    %c0_55 = arith.constant 0 : index
    %106 = vector.load %arg14[%c0_54, %c0_55] : memref<1x128xf32, #tpu.memory_space<vmem>>, vector<1x128xf32>
    %107 = vector.broadcast %106 : vector<1x128xf32> to vector<16x128xf32>
    %108 = arith.addf %105, %107 : vector<16x128xf32>
    %109 = arith.addf %70, %108 : vector<16x128xf32>
    %110 = vector.shape_cast %109 : vector<16x128xf32> to vector<1x16x128xf32>
    %c0_56 = arith.constant 0 : index
    %c0_57 = arith.constant 0 : index
    %c0_58 = arith.constant 0 : index
    %111 = vector.load %arg15[%c0_56, %c0_57, %c0_58] : memref<1x16x128xf32, #tpu.memory_space<vmem>>, vector<1x16x128xf32>
    tpu.vector_store %arg15[%c0_56, %c0_57, %c0_58], %110 {strides = array<i32>} : memref<1x16x128xf32, #tpu.memory_space<vmem>>, vector<1x16x128xf32>,
    return
  }
  func.func @transform_0(%arg0: i32) -> (i32, i32, i32) {
    %c0_i32 = arith.constant 0 : i32
    %c0_i32_0 = arith.constant 0 : i32
    %c0_i32_1 = arith.constant 0 : i32
    return %arg0, %c0_i32, %c0_i32_0 : i32, i32, i32
  }
  func.func @transform_1(%arg0: i32) -> (i32, i32, i32) {
    %c0_i32 = arith.constant 0 : i32
    %c0_i32_0 = arith.constant 0 : i32
    %c0_i32_1 = arith.constant 0 : i32
    %c0_i32_2 = arith.constant 0 : i32
    return %c0_i32, %c0_i32_0, %c0_i32_1 : i32, i32, i32
  }
  func.func @transform_2(%arg0: i32) -> (i32, i32, i32) {
    %c0_i32 = arith.constant 0 : i32
    %c0_i32_0 = arith.constant 0 : i32
    %c0_i32_1 = arith.constant 0 : i32
    %c0_i32_2 = arith.constant 0 : i32
    return %c0_i32, %c0_i32_0, %c0_i32_1 : i32, i32, i32
  }
  func.func @transform_3(%arg0: i32) -> (i32, i32, i32) {
    %c0_i32 = arith.constant 0 : i32
    %c0_i32_0 = arith.constant 0 : i32
    %c0_i32_1 = arith.constant 0 : i32
    %c0_i32_2 = arith.constant 0 : i32
    return %c0_i32, %c0_i32_0, %c0_i32_1 : i32, i32, i32
  }
  func.func @transform_4(%arg0: i32) -> (i32, i32, i32) {
    %c0_i32 = arith.constant 0 : i32
    %c0_i32_0 = arith.constant 0 : i32
    %c0_i32_1 = arith.constant 0 : i32
    %c0_i32_2 = arith.constant 0 : i32
    return %c0_i32, %c0_i32_0, %c0_i32_1 : i32, i32, i32
  }
  func.func @transform_5(%arg0: i32) -> (i32, i32) {
    %c0_i32 = arith.constant 0 : i32
    %c0_i32_0 = arith.constant 0 : i32
    %c0_i32_1 = arith.constant 0 : i32
    return %c0_i32, %c0_i32_0 : i32, i32
  }
  func.func @transform_6(%arg0: i32) -> (i32, i32) {
    %c0_i32 = arith.constant 0 : i32
    %c0_i32_0 = arith.constant 0 : i32
    %c0_i32_1 = arith.constant 0 : i32
    return %c0_i32, %c0_i32_0 : i32, i32
  }
  func.func @transform_7(%arg0: i32) -> (i32, i32) {
    %c0_i32 = arith.constant 0 : i32
    %c0_i32_0 = arith.constant 0 : i32
    %c0_i32_1 = arith.constant 0 : i32
    return %c0_i32, %c0_i32_0 : i32, i32
  }
  func.func @transform_8(%arg0: i32) -> (i32, i32) {
    %c0_i32 = arith.constant 0 : i32
    %c0_i32_0 = arith.constant 0 : i32
    %c0_i32_1 = arith.constant 0 : i32
    return %c0_i32, %c0_i32_0 : i32, i32
  }
  func.func @transform_9(%arg0: i32) -> (i32, i32) {
    %c0_i32 = arith.constant 0 : i32
    %c0_i32_0 = arith.constant 0 : i32
    %c0_i32_1 = arith.constant 0 : i32
    return %c0_i32, %c0_i32_0 : i32, i32
  }
  func.func @transform_10(%arg0: i32) -> (i32, i32) {
    %c0_i32 = arith.constant 0 : i32
    %c0_i32_0 = arith.constant 0 : i32
    %c0_i32_1 = arith.constant 0 : i32
    return %c0_i32, %c0_i32_0 : i32, i32
  }
  func.func @transform_11(%arg0: i32) -> (i32, i32) {
    %c0_i32 = arith.constant 0 : i32
    %c0_i32_0 = arith.constant 0 : i32
    %c0_i32_1 = arith.constant 0 : i32
    return %c0_i32, %c0_i32_0 : i32, i32
  }
  func.func @transform_12(%arg0: i32) -> (i32, i32) {
    %c0_i32 = arith.constant 0 : i32
    %c0_i32_0 = arith.constant 0 : i32
    %c0_i32_1 = arith.constant 0 : i32
    return %c0_i32, %c0_i32_0 : i32, i32
  }
  func.func @transform_13(%arg0: i32) -> (i32, i32) {
    %c0_i32 = arith.constant 0 : i32
    %c0_i32_0 = arith.constant 0 : i32
    %c0_i32_1 = arith.constant 0 : i32
    return %c0_i32, %c0_i32_0 : i32, i32
  }
  func.func @transform_14(%arg0: i32) -> (i32, i32, i32) {
    %c0_i32 = arith.constant 0 : i32
    %c0_i32_0 = arith.constant 0 : i32
    %c0_i32_1 = arith.constant 0 : i32
    return %arg0, %c0_i32, %c0_i32_0 : i32, i32, i32
  }
}

</mosaic_0001>

<bundles_post_ra>
// kernel: tpu_custom_call.1
= control target key start
LH: loop header
LB: loop body
LE: loop exit
PB: predicated region body
PF: predicated region fallthrough
CT: control target
= control target key end

     0   :  { %s15093_s0 = inlined_call_operand.vmem [shape: f32[2,16,128], index: 0, kind: input, shape index: {}]   ;;  %s15094_s1 = inlined_call_operand.vmem [shape: bf16[16,128,8], index: 1, kind: input, shape index: {}]   ;;  %s15095_s2 = inlined_call_operand.vmem [shape: bf16[16,128,8], index: 2, kind: input, shape index: {}]   ;;  %s15096_s3 = inlined_call_operand.vmem [shape: bf16[16,128,8], index: 3, kind: input, shape index: {}]   ;;  %s15097_s4 = inlined_call_operand.vmem [shape: bf16[16,8,128], index: 4, kind: input, shape index: {}]   ;;  %s15098_s5 = inlined_call_operand.vmem [shape: f32[1,128], index: 5, kind: input, shape index: {}]   ;;  %s15099_s6 = inlined_call_operand.vmem [shape: f32[1,128], index: 6, kind: input, shape index: {}]   ;;  %s15100_s7 = inlined_call_operand.vmem [shape: f32[1,128], index: 7, kind: input, shape index: {}]   ;;  %s15101_s8 = inlined_call_operand.vmem [shape: f32[1,128], index: 8, kind: input, shape index: {}]   ;;  %s15102_s9 = inlined_call_operand.vmem [shape: f32[1,128], index: 9, kind: input, shape index: {}]   ;;  %s15103_s10 = inlined_call_operand.vmem [shape: bf16[128,384], index: 10, kind: input, shape index: {}]   ;;  %s15104_s11 = inlined_call_operand.vmem [shape: f32[1,384], index: 11, kind: input, shape index: {}]   ;;  %s15105_s12 = inlined_call_operand.vmem [shape: bf16[384,128], index: 12, kind: input, shape index: {}]   ;;  %s15106_s13 = inlined_call_operand.vmem [shape: f32[1,128], index: 13, kind: input, shape index: {}]   ;;  %s15107_s14 = inlined_call_operand.hbm [shape: f32[2,16,128], index: 14, kind: output, shape index: {}]  }
   0x1   :  { %15138 = sst [smem:[#allocation21_spill]] %s15093_s0 }
   0x2   :  { %19 = vsyncpa [#allocation3], 0 }
   0x3   :  { %21 = vsyncpa [#allocation3 + $0x1], 0  ;;  %s12128_s29 = smov 0   ;;  %s12130_s30 = smov 0  }
   0x4   :  { %s12132_s15 = smov 0   ;;  %s12134_s16 = smov 0  }
   0x5 LB: > { %15139 = sst [smem:[#allocation5_spill]] %s12040_s15  ;;  %s12149_s17 = sadd.s32 4294967295, %s12044_s16   ;;  %s12044_s16 = sphi %s12134_s16, %s15247_s16   ;;  %s12040_s15 = sphi %s12132_s15, %s15244_s15   ;;  %s12036_s30 = sphi %s12130_s30, %s15246_s30   ;;  %s12032_s29 = sphi %s12128_s29, %s15245_s29  }
   0x6   : > { %s9003_s18 = sadd.s32 4294967294, %s12044_s16   ;;  %s12153_s19 = sadd.s32 1, %s12044_s16  }
   0x7   : > { %s333_s20 = sadd.s32 1, %s12040_s15  ;;  %s330_s21 = ssub.s32 %s12044_s16, %s12153_s19 }
   0x8   : > { %p343_p0 = scmp.ne.s32.totalorder %s12040_s15, %s12036_s30  ;;  %p331_p1 = scmp.eq.s32.totalorder %s330_s21, 0 }
   0x9   : > { %p344_p2 = scmp.eq.s32.totalorder %s12149_s17, 1  ;;  %p349_p3 = scmp.ne.s32.totalorder %s12036_s30, %s12032_s29 }
   0xa   : > { %p350_p4 = scmp.eq.s32.totalorder %s9003_s18, 1  ;;  %p9006_p7 = scmp.ge.s32.totalorder %s12044_s16, 1 }
   0xb   : > { %s12164_s22 = scalar_select %p331_p1, %s12040_s15, %s333_s20  }
   0xc   : > { %p12166_p5 = por %p344_p2, %p343_p0  ;;  %p12170_p6 = por %p350_p4, %p349_p3 }
   0xd   : > { %15140 = sst [smem:[#allocation6_spill]] %s12164_s22  ;;  %p415_p8 = scmp.lt.s32.totalorder %s12044_s16, 3 }
   0xf   : > { %p416_p9 = pnand %p9006_p7, %p415_p8 }
  0x11   : > { %419 = sbr.rel (%p416_p9) target bundleno = 2461 (0x99d), region = 76 }
  0x18   : > { %p461_p10 = scmp.lt.s32.totalorder %s12149_s17, 1  ;;  %v15109_v0 = vmov 0.0   ;;  %v11404_v1 = vld [vmem:[%s15094_s1] sm:$0xff]   ;;  %s15143_s0 = sld [smem:[#allocation21_spill]]  ;;  %v11406_v7 = vld [vmem:[%s15094_s1 + $0x8] sm:$0xff]   ;;  %v11408_v9 = vld [vmem:[%s15094_s1 + $0x10] sm:$0xff]  }
  0x19   : > { %10071 = vmatprep.subr.bf16.mxu0 %v15109_v0  ;;  %10091 = vmatprep.subr.bf16.mxu1 %v15109_v0  ;;  %v11405_v2 = vld [vmem:[%s15094_s1 + $0x40] sm:$0xff]   ;;  %v11407_v8 = vld [vmem:[%s15094_s1 + $0x48] sm:$0xff]   ;;  %v11409_v10 = vld [vmem:[%s15094_s1 + $0x50] sm:$0xff]   ;;  %vm12047_vm0 = vmmov 0   ;;  %vm5627_vm1 = vcmask 64512   ;;  %vm6444_vm4 = vcmask 130048  }
  0x1a   : > { %s462_s27 = scalar_select %p461_p10, %s12149_s17, 1  ;;  %10072 = vmatpush3.bf16.msra.mxu0 %v11404_v1  ;;  %10092 = vmatpush3.bf16.msra.mxu1 %v11405_v2  ;;  %v11410_v11 = vld [vmem:[%s15094_s1 + $0x18] sm:$0xff]   ;;  %v11412_v13 = vld [vmem:[%s15094_s1 + $0x20] sm:$0xff]   ;;  %v11414_v15 = vld [vmem:[%s15094_s1 + $0x28] sm:$0xff]   ;;  %vm7536_vm5 = vcmask 1043456  }
  0x1b   : > { %10073 = vmatprep.subr.bf16.mxu0 %v15109_v0  ;;  %10093 = vmatprep.subr.bf16.mxu1 %v15109_v0  ;;  %v11411_v12 = vld [vmem:[%s15094_s1 + $0x58] sm:$0xff]   ;;  %v11413_v14 = vld [vmem:[%s15094_s1 + $0x60] sm:$0xff]   ;;  %v11415_v16 = vld [vmem:[%s15094_s1 + $0x68] sm:$0xff]  }
  0x1c   : > { %s9501_s20 = sshll.u32 %s462_s27, 4  ;;  %v11416_v17 = vld [vmem:[%s15094_s1 + $0x30] sm:$0xff]   ;;  %v11418_v19 = vld [vmem:[%s15094_s1 + $0x38] sm:$0xff]   ;;  %10087 = vmatprep.mubr.msk.bf16.mxu0 %vm12047_vm0, %v15109_v0  ;;  %10107 = vmatprep.mubr.msk.bf16.mxu1 %vm12047_vm0, %v15109_v0  ;;  %v9010_v37 = vld [vmem:[%s15099_s6] ss:$0 sm:$0xff] }
  0x1d   : > { %v11417_v18 = vld [vmem:[%s15094_s1 + $0x70] sm:$0xff]   ;;  %v11419_v20 = vld [vmem:[%s15094_s1 + $0x78] sm:$0xff]   ;;  %v9011_v41 = vld [vmem:[%s15100_s7] ss:$0 sm:$0xff] }
  0x1e   : > { %s12190_s15 = scalar_lea.vmem %s15143_s0, %s9501_s20  ;;  %10074 = vmatpush3.bf16.msra.mxu0 %v11406_v7  ;;  %10094 = vmatpush3.bf16.msra.mxu1 %v11407_v8  ;;  %v11420_v45 = vld [vmem:[%s15094_s1 + $0x80] sm:$0xff]   ;;  %v11422_v50 = vld [vmem:[%s15094_s1 + $0x88] sm:$0xff]   ;;  %v11424_v52 = vld [vmem:[%s15094_s1 + $0x90] sm:$0xff]   ;;  %s458_s20 = sand.u32 1, %s12036_s30  }
  0x1f   : > { %v12194_v3 = vld [vmem:[%s12190_s15] sm:$0xff]  ;;  %v12197_v4 = vld [vmem:[%s12190_s15 + $0x8] sm:$0xff]  ;;  %10075 = vmatprep.subr.bf16.mxu0 %v15109_v0  ;;  %10095 = vmatprep.subr.bf16.mxu1 %v15109_v0  ;;  %v11425_v53 = vld [vmem:[%s15094_s1 + $0xd0] sm:$0xff]   ;;  %s9007_s21 = sshll.u32 %s458_s20, 4  ;;  %s9502_s0 = sshll.u32 %s12149_s17, 8 }
  0x20   : > { %471 = vadd.xlane.f32.xlu0 %v12194_v3  ;;  %v477_v5 = vmul.f32 %v12194_v3, %v12194_v3  ;;  %v478_v6 = vmul.f32 %v12197_v4, %v12197_v4  ;;  %v11421_v46 = vld [vmem:[%s15094_s1 + $0xc0] sm:$0xff]   ;;  %v11423_v51 = vld [vmem:[%s15094_s1 + $0xc8] sm:$0xff]   ;;  %v11426_v54 = vld [vmem:[%s15094_s1 + $0x98] sm:$0xff]   ;;  %s460_s25 = scalar_lea.vmem [#allocation2], %s9007_s21  ;;  %s15047_s18 = scalar_lea.hbm %s15107_s14, %s9502_s0 }
  0x21   : > { %v11427_v55 = vld [vmem:[%s15094_s1 + $0xd8] sm:$0xff]   ;;  %v11428_v56 = vld [vmem:[%s15094_s1 + $0xa0] sm:$0xff]   ;;  %v11430_v58 = vld [vmem:[%s15094_s1 + $0xa8] sm:$0xff]   ;;  %s8941_s26 = sshll.u32 %s460_s25, 4  ;;  %s15052_s17 = scalar_lea.sflag [#allocation3], %s458_s20  ;;  %s15049_s26 = int_to_ptr.vmem [resolvable:$true] %s8941_s26 }
  0x22   : > { %479 = vadd.xlane.f32.xlu1 %v477_v5  ;;  %10076 = vmatpush3.bf16.msra.mxu0 %v11408_v9  ;;  %v11429_v57 = vld [vmem:[%s15094_s1 + $0xe0] sm:$0xff]   ;;  %v11431_v59 = vld [vmem:[%s15094_s1 + $0xe8] sm:$0xff]   ;;  %v11432_v60 = vld [vmem:[%s15094_s1 + $0xb0] sm:$0xff]   ;;  %s11982_s21 = scalar_lea.vmem %s15049_s26, 256 }
  0x23   : > { %10096 = vmatpush3.bf16.msra.mxu1 %v11409_v10  ;;  %10077 = vmatprep.subr.bf16.mxu0 %v15109_v0  ;;  %v11433_v61 = vld [vmem:[%s15094_s1 + $0xf0] sm:$0xff]   ;;  %v11434_v62 = vld [vmem:[%s15094_s1 + $0xb8] sm:$0xff]   ;;  %v11436_v1 = vld [vmem:[%s15094_s1 + $0x100] sm:$0xff]   ;;  %p11983_p11 = scmp.ne.s32.totalorder %s15049_s26, %s11982_s21 }
  0x24   : > { %473 = vadd.xlane.f32.xlu0 %v12197_v4  ;;  %10097 = vmatprep.subr.bf16.mxu1 %v15109_v0  ;;  %v11435_v63 = vld [vmem:[%s15094_s1 + $0xf8] sm:$0xff]   ;;  %v11437_v2 = vld [vmem:[%s15094_s1 + $0x140] sm:$0xff]   ;;  %v11440_v5 = vld [vmem:[%s15094_s1 + $0x110] sm:$0xff]  }
  0x25   : > { %v11442_v7 = vld [vmem:[%s15094_s1 + $0x118] sm:$0xff]   ;;  %v11444_v9 = vld [vmem:[%s15094_s1 + $0x120] sm:$0xff]   ;;  %p11984_p12 = pnand %p11983_p11, %p12166_p5 }
  0x26   : > { %481 = vadd.xlane.f32.xlu1 %v478_v6  ;;  %10078 = vmatpush3.bf16.msra.mxu0 %v11410_v11  ;;  %v11441_v6 = vld [vmem:[%s15094_s1 + $0x150] sm:$0xff]   ;;  %v11443_v8 = vld [vmem:[%s15094_s1 + $0x158] sm:$0xff]   ;;  %v11445_v10 = vld [vmem:[%s15094_s1 + $0x160] sm:$0xff]  }
  0x27   : > { %10098 = vmatpush3.bf16.msra.mxu1 %v11411_v12  ;;  %10079 = vmatprep.subr.bf16.mxu0 %v15109_v0  ;;  %v11446_v11 = vld [vmem:[%s15094_s1 + $0x128] sm:$0xff]   ;;  %p11985_p13 = pneg %p11984_p12 }
  0x28   : > { %10099 = vmatprep.subr.bf16.mxu1 %v15109_v0  ;;  %v11447_v12 = vld [vmem:[%s15094_s1 + $0x168] sm:$0xff]  }
  0x2a   : > { %10080 = vmatpush3.bf16.msra.mxu0 %v11412_v13  ;;  %v11448_v13 = vld [vmem:[%s15094_s1 + $0x130] sm:$0xff]  }
  0x2b   : > { %10100 = vmatpush3.bf16.msra.mxu1 %v11413_v14  ;;  %10081 = vmatprep.subr.bf16.mxu0 %v15109_v0  ;;  %v11449_v14 = vld [vmem:[%s15094_s1 + $0x170] sm:$0xff]  }
  0x2c   : > { %10101 = vmatprep.subr.bf16.mxu1 %v15109_v0 }
  0x2e   : > { %10082 = vmatpush3.bf16.msra.mxu0 %v11414_v15  ;;  %v11450_v15 = vld [vmem:[%s15094_s1 + $0x138] sm:$0xff]  }
  0x2f   : > { %10102 = vmatpush3.bf16.msra.mxu1 %v11415_v16  ;;  %10083 = vmatprep.subr.bf16.mxu0 %v15109_v0  ;;  %v11451_v16 = vld [vmem:[%s15094_s1 + $0x178] sm:$0xff]  }
  0x30   : > { %10103 = vmatprep.subr.bf16.mxu1 %v15109_v0 }
  0x32   : > { %10084 = vmatpush3.bf16.msra.mxu0 %v11416_v17  ;;  %v11452_v17 = vld [vmem:[%s15094_s1 + $0x180] sm:$0xff]  }
  0x33   : > { %10104 = vmatpush3.bf16.msra.mxu1 %v11417_v18  ;;  %10085 = vmatprep.subr.bf16.mxu0 %v15109_v0  ;;  %v11453_v18 = vld [vmem:[%s15094_s1 + $0x1c0] sm:$0xff]  }
  0x34   : > { %10105 = vmatprep.subr.bf16.mxu1 %v15109_v0 }
  0x36   : > { %10086 = vmatpush3.bf16.msra.mxu0 %v11418_v19  ;;  %v11454_v19 = vld [vmem:[%s15094_s1 + $0x188] sm:$0xff]  }
  0x37   : > { %10106 = vmatpush3.bf16.msra.mxu1 %v11419_v20  ;;  %10111 = vmatprep.subr.bf16.mxu0 %v15109_v0  ;;  %v11455_v20 = vld [vmem:[%s15094_s1 + $0x1c8] sm:$0xff]  }
  0x38   : > { %10131 = vmatprep.subr.bf16.mxu1 %v15109_v0 }
  0xad   : > { %v472_v21 = vpop.xlane.xlu0 %471 }
  0xae   : > { %v475_v22 = vmul.f32 0.011904762, %v472_v21  ;;  %v11456_v21 = vld [vmem:[%s15094_s1 + $0x190] sm:$0xff]  }
  0xaf   : > { %v480_v23 = vpop.xlane.xlu1 %479 }
  0xb0   : > { %v485_v24 = vmul.f32 %v475_v22, %v475_v22  ;;  %v483_v25 = vmul.f32 0.011904762, %v480_v23  ;;  %v489_v35 = vsub.f32 %v12194_v3, %v475_v22  ;;  %v11438_v3 = vld [vmem:[%s15094_s1 + $0x108] sm:$0xff]   ;;  %v11457_v22 = vld [vmem:[%s15094_s1 + $0x1d0] sm:$0xff]   ;;  %v11458_v23 = vld [vmem:[%s15094_s1 + $0x198] sm:$0xff]  }
  0xb1   : > { %v474_v26 = vpop.xlane.xlu0 %473 }
  0xb2   : > { %v487_v27 = vsub.f32 %v483_v25, %v485_v24  ;;  %v476_v28 = vmul.f32 0.011904762, %v474_v26  ;;  %v11459_v24 = vld [vmem:[%s15094_s1 + $0x1d8] sm:$0xff]   ;;  %v11460_v25 = vld [vmem:[%s15094_s1 + $0x1a0] sm:$0xff]  }
  0xb3   : > { %v482_v29 = vpop.xlane.xlu1 %481  ;;  %v11461_v26 = vld [vmem:[%s15094_s1 + $0x1e0] sm:$0xff]  }
  0xb4   : > { %v491_v30 = vadd.f32 1e-05, %v487_v27  ;;  %v486_v31 = vmul.f32 %v476_v28, %v476_v28  ;;  %v484_v32 = vmul.f32 0.011904762, %v482_v29  ;;  %v490_v39 = vsub.f32 %v12197_v4, %v476_v28  ;;  %v11439_v4 = vld [vmem:[%s15094_s1 + $0x148] sm:$0xff]   ;;  %v11464_v29 = vld [vmem:[%s15094_s1 + $0x1b0] sm:$0xff]  }
  0xb5   : > { %v11462_v27 = vld [vmem:[%s15094_s1 + $0x1a8] sm:$0xff]  }
  0xb6   : > { %11844 = vrsqrt.f32 %v491_v30  ;;  %v488_v33 = vsub.f32 %v484_v32, %v486_v31  ;;  %v11463_v28 = vld [vmem:[%s15094_s1 + $0x1e8] sm:$0xff]   ;;  %v11465_v30 = vld [vmem:[%s15094_s1 + $0x1f0] sm:$0xff]   ;;  %v11466_v31 = vld [vmem:[%s15094_s1 + $0x1b8] sm:$0xff]  }
  0xb7   : > { %v11467_v32 = vld [vmem:[%s15094_s1 + $0x1f8] sm:$0xff]  }
  0xb8   : > { %v492_v34 = vadd.f32 1e-05, %v488_v33  ;;  %v11468_v33 = vld [vmem:[%s15094_s1 + $0x200] sm:$0xff]  }
  0xba   : > { %11846 = vrsqrt.f32 %v492_v34  ;;  %v11469_v34 = vld [vmem:[%s15094_s1 + $0x240] sm:$0xff]  }
  0xc0   : > { %v11845_v36 = vpop.eup %11844 }
  0xc1   : > { %v495_v38 = vmul.f32 %v11845_v36, %v489_v35  ;;  %v11470_v35 = vld [vmem:[%s15094_s1 + $0x208] sm:$0xff]  }
  0xc2   : > { %v11471_v36 = vld [vmem:[%s15094_s1 + $0x248] sm:$0xff]  }
  0xc3   : > { %v503_v42 = vmul.f32 %v9010_v37, %v495_v38  ;;  %v11473_v38 = vld [vmem:[%s15094_s1 + $0x250] sm:$0xff]  }
  0xc4   : > { %v11847_v40 = vpop.eup %11846 }
  0xc5   : > { %v496_v43 = vmul.f32 %v11847_v40, %v490_v39  ;;  %v511_v47 = vadd.f32 %v9011_v41, %v503_v42  ;;  %v11474_v39 = vld [vmem:[%s15094_s1 + $0x218] sm:$0xff]   ;;  %v11477_v42 = vld [vmem:[%s15094_s1 + $0x260] sm:$0xff]  }
  0xc6   : > { %v11475_v40 = vld [vmem:[%s15094_s1 + $0x258] sm:$0xff]  }
  0xc7   : > { %v504_v44 = vmul.f32 %v9010_v37, %v496_v43  ;;  %v11472_v37 = vld [vmem:[%s15094_s1 + $0x210] sm:$0xff]   ;;  %v11478_v43 = vld [vmem:[%s15094_s1 + $0x228] sm:$0xff]  }
  0xc9   : > { %v512_v48 = vadd.f32 %v9011_v41, %v504_v44  ;;  %v11476_v41 = vld [vmem:[%s15094_s1 + $0x220] sm:$0xff]   ;;  %v11479_v44 = vld [vmem:[%s15094_s1 + $0x268] sm:$0xff]  }
  0xcb   : > { %v12279_v49 = vpack.c.bf16 %v512_v48, %v511_v47  ;;  %v11482_v47 = vld [vmem:[%s15094_s1 + $0x238] sm:$0xff]  }
  0xcc   : > { %v11483_v48 = vld [vmem:[%s15094_s1 + $0x278] sm:$0xff]  }
  0xcd   : > { %10088 = vmatmul.mubr.bf16.vlgmr.msra.gmra.mrb[0].mxu0 %v12279_v49  ;;  %10108 = vmatmul.mubr.bf16.vlgmr.msra.gmra.mrb[0].mxu1 %v12279_v49 }
  0xce   : > { %10112 = vmatpush3.bf16.msra.mxu0 %v11420_v45  ;;  %10132 = vmatpush3.bf16.msra.mxu1 %v11421_v46  ;;  %v11480_v45 = vld [vmem:[%s15094_s1 + $0x230] sm:$0xff]  }
  0xcf   : > { %10113 = vmatprep.subr.bf16.mxu0 %v15109_v0  ;;  %10133 = vmatprep.subr.bf16.mxu1 %v15109_v0  ;;  %v11481_v46 = vld [vmem:[%s15094_s1 + $0x270] sm:$0xff]  }
  0xd0   : > { %10127 = vmatprep.mubr.msk.bf16.mxu0 %vm12047_vm0, %v15109_v0  ;;  %10147 = vmatprep.mubr.msk.bf16.mxu1 %vm12047_vm0, %v15109_v0 }
  0xd2   : > { %10114 = vmatpush3.bf16.msra.mxu0 %v11422_v50  ;;  %10134 = vmatpush3.bf16.msra.mxu1 %v11423_v51  ;;  %v11484_v50 = vld [vmem:[%s15094_s1 + $0x280] sm:$0xff]  }
  0xd3   : > { %10115 = vmatprep.subr.bf16.mxu0 %v15109_v0  ;;  %10135 = vmatprep.subr.bf16.mxu1 %v15109_v0  ;;  %v11485_v51 = vld [vmem:[%s15094_s1 + $0x2c0] sm:$0xff]  }
  0xd6   : > { %10116 = vmatpush3.bf16.msra.mxu0 %v11424_v52  ;;  %10136 = vmatpush3.bf16.msra.mxu1 %v11425_v53  ;;  %v11486_v52 = vld [vmem:[%s15094_s1 + $0x288] sm:$0xff]  }
  0xd7   : > { %10117 = vmatprep.subr.bf16.mxu0 %v15109_v0  ;;  %10137 = vmatprep.subr.bf16.mxu1 %v15109_v0  ;;  %v11487_v53 = vld [vmem:[%s15094_s1 + $0x2c8] sm:$0xff]  }
  0xda   : > { %10118 = vmatpush3.bf16.msra.mxu0 %v11426_v54  ;;  %10138 = vmatpush3.bf16.msra.mxu1 %v11427_v55  ;;  %v11488_v54 = vld [vmem:[%s15094_s1 + $0x290] sm:$0xff]  }
  0xdb   : > { %10119 = vmatprep.subr.bf16.mxu0 %v15109_v0  ;;  %10139 = vmatprep.subr.bf16.mxu1 %v15109_v0  ;;  %v11489_v55 = vld [vmem:[%s15094_s1 + $0x2d0] sm:$0xff]  }
  0xde   : > { %10120 = vmatpush3.bf16.msra.mxu0 %v11428_v56  ;;  %10140 = vmatpush3.bf16.msra.mxu1 %v11429_v57  ;;  %v11490_v56 = vld [vmem:[%s15094_s1 + $0x298] sm:$0xff]  }
  0xdf   : > { %10121 = vmatprep.subr.bf16.mxu0 %v15109_v0  ;;  %10141 = vmatprep.subr.bf16.mxu1 %v15109_v0  ;;  %v11491_v57 = vld [vmem:[%s15094_s1 + $0x2d8] sm:$0xff]  }
  0xe2   : > { %10122 = vmatpush3.bf16.msra.mxu0 %v11430_v58  ;;  %10142 = vmatpush3.bf16.msra.mxu1 %v11431_v59  ;;  %v11492_v58 = vld [vmem:[%s15094_s1 + $0x2a0] sm:$0xff]  }
  0xe3   : > { %10123 = vmatprep.subr.bf16.mxu0 %v15109_v0  ;;  %10143 = vmatprep.subr.bf16.mxu1 %v15109_v0  ;;  %v11493_v59 = vld [vmem:[%s15094_s1 + $0x2e0] sm:$0xff]  }
  0xe6   : > { %10124 = vmatpush3.bf16.msra.mxu0 %v11432_v60  ;;  %10144 = vmatpush3.bf16.msra.mxu1 %v11433_v61  ;;  %v11494_v60 = vld [vmem:[%s15094_s1 + $0x2a8] sm:$0xff]  }
  0xe7   : > { %10125 = vmatprep.subr.bf16.mxu0 %v15109_v0  ;;  %10145 = vmatprep.subr.bf16.mxu1 %v15109_v0  ;;  %v11495_v61 = vld [vmem:[%s15094_s1 + $0x2e8] sm:$0xff]  }
  0xea   : > { %10126 = vmatpush3.bf16.msra.mxu0 %v11434_v62  ;;  %10146 = vmatpush3.bf16.msra.mxu1 %v11435_v63  ;;  %v11496_v62 = vld [vmem:[%s15094_s1 + $0x2b0] sm:$0xff]  }
  0xeb   : > { %10151 = vmatprep.subr.bf16.mxu0 %v15109_v0  ;;  %10171 = vmatprep.subr.bf16.mxu1 %v15109_v0  ;;  %v11497_v63 = vld [vmem:[%s15094_s1 + $0x2f0] sm:$0xff]  }
  0xed   : > { %10128 = vmatmul.mubr.bf16.vlgmr.msra.gmra.mrb[4].mxu0 %v12279_v49  ;;  %10148 = vmatmul.mubr.bf16.vlgmr.msra.gmra.mrb[4].mxu1 %v12279_v49 }
  0xee   : > { %10152 = vmatpush3.bf16.msra.mxu0 %v11436_v1  ;;  %10172 = vmatpush3.bf16.msra.mxu1 %v11437_v2  ;;  %v11498_v1 = vld [vmem:[%s15094_s1 + $0x2b8] sm:$0xff]  }
  0xef   : > { %10153 = vmatprep.subr.bf16.mxu0 %v15109_v0  ;;  %10173 = vmatprep.subr.bf16.mxu1 %v15109_v0  ;;  %v11499_v2 = vld [vmem:[%s15094_s1 + $0x2f8] sm:$0xff]  }
  0xf0   : > { %10167 = vmatprep.mubr.msk.bf16.mxu0 %vm12047_vm0, %v15109_v0  ;;  %10187 = vmatprep.mubr.msk.bf16.mxu1 %vm12047_vm0, %v15109_v0 }
  0xf2   : > { %10154 = vmatpush3.bf16.msra.mxu0 %v11438_v3  ;;  %10174 = vmatpush3.bf16.msra.mxu1 %v11439_v4  ;;  %v11500_v3 = vld [vmem:[%s15094_s1 + $0x300] sm:$0xff]  }
  0xf3   : > { %10155 = vmatprep.subr.bf16.mxu0 %v15109_v0  ;;  %10175 = vmatprep.subr.bf16.mxu1 %v15109_v0  ;;  %v11501_v4 = vld [vmem:[%s15094_s1 + $0x340] sm:$0xff]  }
  0xf6   : > { %10156 = vmatpush3.bf16.msra.mxu0 %v11440_v5  ;;  %10176 = vmatpush3.bf16.msra.mxu1 %v11441_v6  ;;  %v11502_v5 = vld [vmem:[%s15094_s1 + $0x308] sm:$0xff]  }
  0xf7   : > { %10157 = vmatprep.subr.bf16.mxu0 %v15109_v0  ;;  %10177 = vmatprep.subr.bf16.mxu1 %v15109_v0  ;;  %v11503_v6 = vld [vmem:[%s15094_s1 + $0x348] sm:$0xff]  }
  0xfa   : > { %10158 = vmatpush3.bf16.msra.mxu0 %v11442_v7  ;;  %10178 = vmatpush3.bf16.msra.mxu1 %v11443_v8  ;;  %v11504_v7 = vld [vmem:[%s15094_s1 + $0x310] sm:$0xff]  }
  0xfb   : > { %10159 = vmatprep.subr.bf16.mxu0 %v15109_v0  ;;  %10179 = vmatprep.subr.bf16.mxu1 %v15109_v0  ;;  %v11505_v8 = vld [vmem:[%s15094_s1 + $0x350] sm:$0xff]  }
  0xfe   : > { %10160 = vmatpush3.bf16.msra.mxu0 %v11444_v9  ;;  %10180 = vmatpush3.bf16.msra.mxu1 %v11445_v10  ;;  %v11506_v9 = vld [vmem:[%s15094_s1 + $0x318] sm:$0xff]  }
  0xff   : > { %10161 = vmatprep.subr.bf16.mxu0 %v15109_v0  ;;  %10181 = vmatprep.subr.bf16.mxu1 %v15109_v0  ;;  %v11507_v10 = vld [vmem:[%s15094_s1 + $0x358] sm:$0xff]  }
 0x102   : > { %10162 = vmatpush3.bf16.msra.mxu0 %v11446_v11  ;;  %10182 = vmatpush3.bf16.msra.mxu1 %v11447_v12  ;;  %v11508_v11 = vld [vmem:[%s15094_s1 + $0x320] sm:$0xff]  }
 0x103   : > { %10163 = vmatprep.subr.bf16.mxu0 %v15109_v0  ;;  %10183 = vmatprep.subr.bf16.mxu1 %v15109_v0  ;;  %v11509_v12 = vld [vmem:[%s15094_s1 + $0x360] sm:$0xff]  }
 0x106   : > { %10164 = vmatpush3.bf16.msra.mxu0 %v11448_v13  ;;  %10184 = vmatpush3.bf16.msra.mxu1 %v11449_v14  ;;  %v11510_v13 = vld [vmem:[%s15094_s1 + $0x328] sm:$0xff]  }
 0x107   : > { %10165 = vmatprep.subr.bf16.mxu0 %v15109_v0  ;;  %10185 = vmatprep.subr.bf16.mxu1 %v15109_v0  ;;  %v11511_v14 = vld [vmem:[%s15094_s1 + $0x368] sm:$0xff]  }
 0x10a   : > { %10166 = vmatpush3.bf16.msra.mxu0 %v11450_v15  ;;  %10186 = vmatpush3.bf16.msra.mxu1 %v11451_v16  ;;  %v11512_v15 = vld [vmem:[%s15094_s1 + $0x330] sm:$0xff]  }
 0x10b   : > { %10191 = vmatprep.subr.bf16.mxu0 %v15109_v0  ;;  %10211 = vmatprep.subr.bf16.mxu1 %v15109_v0  ;;  %v11513_v16 = vld [vmem:[%s15094_s1 + $0x370] sm:$0xff]  }
 0x10d   : > { %10168 = vmatmul.mubr.bf16.vlgmr.msra.gmra.mrb[8].mxu0 %v12279_v49  ;;  %10188 = vmatmul.mubr.bf16.vlgmr.msra.gmra.mrb[8].mxu1 %v12279_v49 }
 0x10e   : > { %10192 = vmatpush3.bf16.msra.mxu0 %v11452_v17  ;;  %10212 = vmatpush3.bf16.msra.mxu1 %v11453_v18  ;;  %v11514_v17 = vld [vmem:[%s15094_s1 + $0x338] sm:$0xff]  }
 0x10f   : > { %10193 = vmatprep.subr.bf16.mxu0 %v15109_v0  ;;  %10213 = vmatprep.subr.bf16.mxu1 %v15109_v0  ;;  %v11515_v18 = vld [vmem:[%s15094_s1 + $0x378] sm:$0xff]  }
 0x110   : > { %10207 = vmatprep.mubr.msk.bf16.mxu0 %vm12047_vm0, %v15109_v0  ;;  %10227 = vmatprep.mubr.msk.bf16.mxu1 %vm12047_vm0, %v15109_v0 }
 0x112   : > { %10194 = vmatpush3.bf16.msra.mxu0 %v11454_v19  ;;  %10214 = vmatpush3.bf16.msra.mxu1 %v11455_v20  ;;  %v11516_v19 = vld [vmem:[%s15094_s1 + $0x380] sm:$0xff]  }
 0x113   : > { %10195 = vmatprep.subr.bf16.mxu0 %v15109_v0  ;;  %10215 = vmatprep.subr.bf16.mxu1 %v15109_v0  ;;  %v11517_v20 = vld [vmem:[%s15094_s1 + $0x3c0] sm:$0xff]  }
 0x116   : > { %10196 = vmatpush3.bf16.msra.mxu0 %v11456_v21  ;;  %10216 = vmatpush3.bf16.msra.mxu1 %v11457_v22  ;;  %v11518_v21 = vld [vmem:[%s15094_s1 + $0x388] sm:$0xff]  }
 0x117   : > { %10197 = vmatprep.subr.bf16.mxu0 %v15109_v0  ;;  %10217 = vmatprep.subr.bf16.mxu1 %v15109_v0  ;;  %v11519_v22 = vld [vmem:[%s15094_s1 + $0x3c8] sm:$0xff]  }
 0x11a   : > { %10198 = vmatpush3.bf16.msra.mxu0 %v11458_v23  ;;  %10218 = vmatpush3.bf16.msra.mxu1 %v11459_v24  ;;  %v11520_v23 = vld [vmem:[%s15094_s1 + $0x390] sm:$0xff]  }
 0x11b   : > { %10199 = vmatprep.subr.bf16.mxu0 %v15109_v0  ;;  %10219 = vmatprep.subr.bf16.mxu1 %v15109_v0  ;;  %v11521_v24 = vld [vmem:[%s15094_s1 + $0x3d0] sm:$0xff]  }
 0x11e   : > { %10200 = vmatpush3.bf16.msra.mxu0 %v11460_v25  ;;  %10220 = vmatpush3.bf16.msra.mxu1 %v11461_v26  ;;  %v11522_v25 = vld [vmem:[%s15094_s1 + $0x398] sm:$0xff]  }
 0x11f   : > { %10201 = vmatprep.subr.bf16.mxu0 %v15109_v0  ;;  %10221 = vmatprep.subr.bf16.mxu1 %v15109_v0  ;;  %v11523_v26 = vld [vmem:[%s15094_s1 + $0x3d8] sm:$0xff]  }
 0x122   : > { %10202 = vmatpush3.bf16.msra.mxu0 %v11462_v27  ;;  %10222 = vmatpush3.bf16.msra.mxu1 %v11463_v28  ;;  %v11524_v27 = vld [vmem:[%s15094_s1 + $0x3a0] sm:$0xff]  }
 0x123   : > { %10203 = vmatprep.subr.bf16.mxu0 %v15109_v0  ;;  %10223 = vmatprep.subr.bf16.mxu1 %v15109_v0  ;;  %v11525_v28 = vld [vmem:[%s15094_s1 + $0x3e0] sm:$0xff]  }
 0x126   : > { %10204 = vmatpush3.bf16.msra.mxu0 %v11464_v29  ;;  %10224 = vmatpush3.bf16.msra.mxu1 %v11465_v30  ;;  %v11526_v29 = vld [vmem:[%s15094_s1 + $0x3a8] sm:$0xff]  }
 0x127   : > { %10205 = vmatprep.subr.bf16.mxu0 %v15109_v0  ;;  %10225 = vmatprep.subr.bf16.mxu1 %v15109_v0  ;;  %v11527_v30 = vld [vmem:[%s15094_s1 + $0x3e8] sm:$0xff]  }
 0x12a   : > { %10206 = vmatpush3.bf16.msra.mxu0 %v11466_v31  ;;  %10226 = vmatpush3.bf16.msra.mxu1 %v11467_v32 }
 0x12b   : > { %10231 = vmatprep.subr.bf16.mxu0 %v15109_v0  ;;  %10251 = vmatprep.subr.bf16.mxu1 %v15109_v0 }
 0x12d   : > { %10208 = vmatmul.mubr.bf16.vlgmr.msra.gmra.mrb[12].mxu0 %v12279_v49  ;;  %10228 = vmatmul.mubr.bf16.vlgmr.msra.gmra.mrb[12].mxu1 %v12279_v49 }
 0x12e   : > { %10232 = vmatpush3.bf16.msra.mxu0 %v11468_v33  ;;  %10252 = vmatpush3.bf16.msra.mxu1 %v11469_v34 }
 0x12f   : > { %10233 = vmatprep.subr.bf16.mxu0 %v15109_v0  ;;  %10253 = vmatprep.subr.bf16.mxu1 %v15109_v0 }
 0x130   : > { %10247 = vmatprep.mubr.msk.bf16.mxu0 %vm12047_vm0, %v15109_v0  ;;  %10267 = vmatprep.mubr.msk.bf16.mxu1 %vm12047_vm0, %v15109_v0 }
 0x132   : > { %10234 = vmatpush3.bf16.msra.mxu0 %v11470_v35  ;;  %10254 = vmatpush3.bf16.msra.mxu1 %v11471_v36 }
 0x133   : > { %10235 = vmatprep.subr.bf16.mxu0 %v15109_v0  ;;  %10255 = vmatprep.subr.bf16.mxu1 %v15109_v0 }
 0x136   : > { %10236 = vmatpush3.bf16.msra.mxu0 %v11472_v37  ;;  %10256 = vmatpush3.bf16.msra.mxu1 %v11473_v38  ;;  %v11528_v37 = vld [vmem:[%s15094_s1 + $0x3b0] sm:$0xff]  }
 0x137   : > { %10237 = vmatprep.subr.bf16.mxu0 %v15109_v0  ;;  %10257 = vmatprep.subr.bf16.mxu1 %v15109_v0  ;;  %v11529_v38 = vld [vmem:[%s15094_s1 + $0x3f0] sm:$0xff]  }
 0x13a   : > { %10238 = vmatpush3.bf16.msra.mxu0 %v11474_v39  ;;  %10258 = vmatpush3.bf16.msra.mxu1 %v11475_v40  ;;  %v11720_v40 = vld [vmem:[%s15096_s3 + $0x1b0] sm:$0xff]  }
 0x13b   : > { %10239 = vmatprep.subr.bf16.mxu0 %v15109_v0  ;;  %10259 = vmatprep.subr.bf16.mxu1 %v15109_v0  ;;  %v11721_v39 = vld [vmem:[%s15096_s3 + $0x1f0] sm:$0xff]  }
 0x13e   : > { %10240 = vmatpush3.bf16.msra.mxu0 %v11476_v41  ;;  %10260 = vmatpush3.bf16.msra.mxu1 %v11477_v42 }
 0x13f   : > { %10241 = vmatprep.subr.bf16.mxu0 %v15109_v0  ;;  %10261 = vmatprep.subr.bf16.mxu1 %v15109_v0 }
 0x142   : > { %10242 = vmatpush3.bf16.msra.mxu0 %v11478_v43  ;;  %10262 = vmatpush3.bf16.msra.mxu1 %v11479_v44  ;;  %v11530_v43 = vld [vmem:[%s15094_s1 + $0x3b8] sm:$0xff]  }
 0x143   : > { %10243 = vmatprep.subr.bf16.mxu0 %v15109_v0  ;;  %10263 = vmatprep.subr.bf16.mxu1 %v15109_v0  ;;  %v11531_v44 = vld [vmem:[%s15094_s1 + $0x3f8] sm:$0xff]  }
 0x146   : > { %10244 = vmatpush3.bf16.msra.mxu0 %v11480_v45  ;;  %10264 = vmatpush3.bf16.msra.mxu1 %v11481_v46  ;;  %v11532_v45 = vld [vmem:[%s15095_s2] sm:$0xff]  }
 0x147   : > { %10245 = vmatprep.subr.bf16.mxu0 %v15109_v0  ;;  %10265 = vmatprep.subr.bf16.mxu1 %v15109_v0  ;;  %v11533_v46 = vld [vmem:[%s15095_s2 + $0x40] sm:$0xff]  }
 0x14a   : > { %10246 = vmatpush3.bf16.msra.mxu0 %v11482_v47  ;;  %10266 = vmatpush3.bf16.msra.mxu1 %v11483_v48  ;;  %v11534_v47 = vld [vmem:[%s15095_s2 + $0x8] sm:$0xff]  }
 0x14b   : > { %10271 = vmatprep.subr.bf16.mxu0 %v15109_v0  ;;  %10291 = vmatprep.subr.bf16.mxu1 %v15109_v0  ;;  %v11535_v48 = vld [vmem:[%s15095_s2 + $0x48] sm:$0xff]  }
 0x14d   : > { %10248 = vmatmul.mubr.bf16.vlgmr.msra.gmra.mrb[16].mxu0 %v12279_v49  ;;  %10268 = vmatmul.mubr.bf16.vlgmr.msra.gmra.mrb[16].mxu1 %v12279_v49 }
 0x14e   : > { %10272 = vmatpush3.bf16.msra.mxu0 %v11484_v50  ;;  %10292 = vmatpush3.bf16.msra.mxu1 %v11485_v51  ;;  %v11536_v50 = vld [vmem:[%s15095_s2 + $0x10] sm:$0xff]  }
 0x14f   : > { %10273 = vmatprep.subr.bf16.mxu0 %v15109_v0  ;;  %10293 = vmatprep.subr.bf16.mxu1 %v15109_v0  ;;  %v11537_v51 = vld [vmem:[%s15095_s2 + $0x50] sm:$0xff]  }
 0x150   : > { %10287 = vmatprep.mubr.msk.bf16.mxu0 %vm12047_vm0, %v15109_v0  ;;  %10307 = vmatprep.mubr.msk.bf16.mxu1 %vm12047_vm0, %v15109_v0 }
 0x152   : > { %10274 = vmatpush3.bf16.msra.mxu0 %v11486_v52  ;;  %10294 = vmatpush3.bf16.msra.mxu1 %v11487_v53  ;;  %v11538_v52 = vld [vmem:[%s15095_s2 + $0x18] sm:$0xff]  }
 0x153   : > { %10275 = vmatprep.subr.bf16.mxu0 %v15109_v0  ;;  %10295 = vmatprep.subr.bf16.mxu1 %v15109_v0  ;;  %v11539_v53 = vld [vmem:[%s15095_s2 + $0x58] sm:$0xff]  }
 0x156   : > { %10276 = vmatpush3.bf16.msra.mxu0 %v11488_v54  ;;  %10296 = vmatpush3.bf16.msra.mxu1 %v11489_v55  ;;  %v11540_v54 = vld [vmem:[%s15095_s2 + $0x20] sm:$0xff]  }
 0x157   : > { %10277 = vmatprep.subr.bf16.mxu0 %v15109_v0  ;;  %10297 = vmatprep.subr.bf16.mxu1 %v15109_v0  ;;  %v11541_v55 = vld [vmem:[%s15095_s2 + $0x60] sm:$0xff]  }
 0x15a   : > { %10278 = vmatpush3.bf16.msra.mxu0 %v11490_v56  ;;  %10298 = vmatpush3.bf16.msra.mxu1 %v11491_v57  ;;  %v11542_v56 = vld [vmem:[%s15095_s2 + $0x28] sm:$0xff]  }
 0x15b   : > { %10279 = vmatprep.subr.bf16.mxu0 %v15109_v0  ;;  %10299 = vmatprep.subr.bf16.mxu1 %v15109_v0  ;;  %v11543_v57 = vld [vmem:[%s15095_s2 + $0x68] sm:$0xff]  }
 0x15e   : > { %10280 = vmatpush3.bf16.msra.mxu0 %v11492_v58  ;;  %10300 = vmatpush3.bf16.msra.mxu1 %v11493_v59 }
 0x15f   : > { %10281 = vmatprep.subr.bf16.mxu0 %v15109_v0  ;;  %10301 = vmatprep.subr.bf16.mxu1 %v15109_v0 }
 0x162   : > { %10282 = vmatpush3.bf16.msra.mxu0 %v11494_v60  ;;  %10302 = vmatpush3.bf16.msra.mxu1 %v11495_v61 }
 0x163   : > { %10283 = vmatprep.subr.bf16.mxu0 %v15109_v0  ;;  %10303 = vmatprep.subr.bf16.mxu1 %v15109_v0 }
 0x166   : > { %10284 = vmatpush3.bf16.msra.mxu0 %v11496_v62  ;;  %10304 = vmatpush3.bf16.msra.mxu1 %v11497_v63 }
 0x167   : > { %10285 = vmatprep.subr.bf16.mxu0 %v15109_v0  ;;  %10305 = vmatprep.subr.bf16.mxu1 %v15109_v0 }
 0x16a   : > { %10286 = vmatpush3.bf16.msra.mxu0 %v11498_v1  ;;  %10306 = vmatpush3.bf16.msra.mxu1 %v11499_v2  ;;  %v11544_v1 = vld [vmem:[%s15095_s2 + $0x30] sm:$0xff]  }
 0x16b   : > { %10311 = vmatprep.subr.bf16.mxu0 %v15109_v0  ;;  %10331 = vmatprep.subr.bf16.mxu1 %v15109_v0  ;;  %v11545_v2 = vld [vmem:[%s15095_s2 + $0x70] sm:$0xff]  }
 0x16d   : > { %10288 = vmatmul.mubr.bf16.vlgmr.msra.gmra.mrb[20].mxu0 %v12279_v49  ;;  %10308 = vmatmul.mubr.bf16.vlgmr.msra.gmra.mrb[20].mxu1 %v12279_v49 }
 0x16e   : > { %10312 = vmatpush3.bf16.msra.mxu0 %v11500_v3  ;;  %10332 = vmatpush3.bf16.msra.mxu1 %v11501_v4  ;;  %v11704_v4 = vld [vmem:[%s15096_s3 + $0x130] sm:$0xff]  }
 0x16f   : > { %10313 = vmatprep.subr.bf16.mxu0 %v15109_v0  ;;  %10333 = vmatprep.subr.bf16.mxu1 %v15109_v0  ;;  %v11705_v3 = vld [vmem:[%s15096_s3 + $0x170] sm:$0xff]  }
 0x170   : > { %10327 = vmatprep.mubr.msk.bf16.mxu0 %vm12047_vm0, %v15109_v0  ;;  %10347 = vmatprep.mubr.msk.bf16.mxu1 %vm12047_vm0, %v15109_v0 }
 0x172   : > { %10314 = vmatpush3.bf16.msra.mxu0 %v11502_v5  ;;  %10334 = vmatpush3.bf16.msra.mxu1 %v11503_v6 }
 0x173   : > { %10315 = vmatprep.subr.bf16.mxu0 %v15109_v0  ;;  %10335 = vmatprep.subr.bf16.mxu1 %v15109_v0 }
 0x176   : > { %10316 = vmatpush3.bf16.msra.mxu0 %v11504_v7  ;;  %10336 = vmatpush3.bf16.msra.mxu1 %v11505_v8  ;;  %v11546_v7 = vld [vmem:[%s15095_s2 + $0x38] sm:$0xff]  }
 0x177   : > { %10317 = vmatprep.subr.bf16.mxu0 %v15109_v0  ;;  %10337 = vmatprep.subr.bf16.mxu1 %v15109_v0  ;;  %v11547_v8 = vld [vmem:[%s15095_s2 + $0x78] sm:$0xff]  }
 0x17a   : > { %10318 = vmatpush3.bf16.msra.mxu0 %v11506_v9  ;;  %10338 = vmatpush3.bf16.msra.mxu1 %v11507_v10  ;;  %v11548_v9 = vld [vmem:[%s15095_s2 + $0x80] sm:$0xff]  }
 0x17b   : > { %10319 = vmatprep.subr.bf16.mxu0 %v15109_v0  ;;  %10339 = vmatprep.subr.bf16.mxu1 %v15109_v0  ;;  %v11549_v10 = vld [vmem:[%s15095_s2 + $0xc0] sm:$0xff]  }
 0x17e   : > { %10320 = vmatpush3.bf16.msra.mxu0 %v11508_v11  ;;  %10340 = vmatpush3.bf16.msra.mxu1 %v11509_v12  ;;  %v11550_v11 = vld [vmem:[%s15095_s2 + $0x88] sm:$0xff]  }
 0x17f   : > { %10321 = vmatprep.subr.bf16.mxu0 %v15109_v0  ;;  %10341 = vmatprep.subr.bf16.mxu1 %v15109_v0  ;;  %v11551_v12 = vld [vmem:[%s15095_s2 + $0xc8] sm:$0xff]  }
 0x182   : > { %10322 = vmatpush3.bf16.msra.mxu0 %v11510_v13  ;;  %10342 = vmatpush3.bf16.msra.mxu1 %v11511_v14  ;;  %v11552_v13 = vld [vmem:[%s15095_s2 + $0x90] sm:$0xff]  }
 0x183   : > { %10323 = vmatprep.subr.bf16.mxu0 %v15109_v0  ;;  %10343 = vmatprep.subr.bf16.mxu1 %v15109_v0  ;;  %v11553_v14 = vld [vmem:[%s15095_s2 + $0xd0] sm:$0xff]  }
 0x186   : > { %10324 = vmatpush3.bf16.msra.mxu0 %v11512_v15  ;;  %10344 = vmatpush3.bf16.msra.mxu1 %v11513_v16  ;;  %v11554_v15 = vld [vmem:[%s15095_s2 + $0x98] sm:$0xff]  }
 0x187   : > { %10325 = vmatprep.subr.bf16.mxu0 %v15109_v0  ;;  %10345 = vmatprep.subr.bf16.mxu1 %v15109_v0  ;;  %v11555_v16 = vld [vmem:[%s15095_s2 + $0xd8] sm:$0xff]  }
 0x18a   : > { %10326 = vmatpush3.bf16.msra.mxu0 %v11514_v17  ;;  %10346 = vmatpush3.bf16.msra.mxu1 %v11515_v18  ;;  %v11556_v17 = vld [vmem:[%s15095_s2 + $0xa0] sm:$0xff]  }
 0x18b   : > { %10351 = vmatprep.subr.bf16.mxu0 %v15109_v0  ;;  %10371 = vmatprep.subr.bf16.mxu1 %v15109_v0  ;;  %v11557_v18 = vld [vmem:[%s15095_s2 + $0xe0] sm:$0xff]  }
 0x18d   : > { %10328 = vmatmul.mubr.bf16.vlgmr.msra.gmra.mrb[24].mxu0 %v12279_v49  ;;  %10348 = vmatmul.mubr.bf16.vlgmr.msra.gmra.mrb[24].mxu1 %v12279_v49 }
 0x18e   : > { %10352 = vmatpush3.bf16.msra.mxu0 %v11516_v19  ;;  %10372 = vmatpush3.bf16.msra.mxu1 %v11517_v20  ;;  %v11558_v19 = vld [vmem:[%s15095_s2 + $0xa8] sm:$0xff]  }
 0x18f   : > { %10353 = vmatprep.subr.bf16.mxu0 %v15109_v0  ;;  %10373 = vmatprep.subr.bf16.mxu1 %v15109_v0  ;;  %v11559_v20 = vld [vmem:[%s15095_s2 + $0xe8] sm:$0xff]  }
 0x190   : > { %10367 = vmatprep.mubr.msk.bf16.mxu0 %vm12047_vm0, %v15109_v0  ;;  %10387 = vmatprep.mubr.msk.bf16.mxu1 %vm12047_vm0, %v15109_v0 }
 0x192   : > { %10354 = vmatpush3.bf16.msra.mxu0 %v11518_v21  ;;  %10374 = vmatpush3.bf16.msra.mxu1 %v11519_v22 }
 0x193   : > { %10355 = vmatprep.subr.bf16.mxu0 %v15109_v0  ;;  %10375 = vmatprep.subr.bf16.mxu1 %v15109_v0 }
 0x196   : > { %10356 = vmatpush3.bf16.msra.mxu0 %v11520_v23  ;;  %10376 = vmatpush3.bf16.msra.mxu1 %v11521_v24 }
 0x197   : > { %10357 = vmatprep.subr.bf16.mxu0 %v15109_v0  ;;  %10377 = vmatprep.subr.bf16.mxu1 %v15109_v0 }
 0x19a   : > { %10358 = vmatpush3.bf16.msra.mxu0 %v11522_v25  ;;  %10378 = vmatpush3.bf16.msra.mxu1 %v11523_v26 }
 0x19b   : > { %10359 = vmatprep.subr.bf16.mxu0 %v15109_v0  ;;  %10379 = vmatprep.subr.bf16.mxu1 %v15109_v0 }
 0x19e   : > { %10360 = vmatpush3.bf16.msra.mxu0 %v11524_v27  ;;  %10380 = vmatpush3.bf16.msra.mxu1 %v11525_v28  ;;  %v11560_v27 = vld [vmem:[%s15095_s2 + $0xb0] sm:$0xff]  }
 0x19f   : > { %10361 = vmatprep.subr.bf16.mxu0 %v15109_v0  ;;  %10381 = vmatprep.subr.bf16.mxu1 %v15109_v0  ;;  %v11561_v28 = vld [vmem:[%s15095_s2 + $0xf0] sm:$0xff]  }
 0x1a0   : > { %v12747_v31 = vpop.f32.mrb[0].mxu0  ;;  %v12749_v32 = vpop.f32.mrb[0].mxu1 }
 0x1a1   : > { %v10089_v33 = vpop.f32.mrb[1].mxu0  ;;  %v10109_v34 = vpop.f32.mrb[1].mxu1 }
 0x1a2   : > { %10362 = vmatpush3.bf16.msra.mxu0 %v11526_v29  ;;  %10382 = vmatpush3.bf16.msra.mxu1 %v11527_v30  ;;  %v12751_v35 = vpop.f32.mrb[2].mxu0  ;;  %v12753_v36 = vpop.f32.mrb[2].mxu1 }
 0x1a3   : > { %v10090_v41 = vpop.f32.mrb[3].mxu0  ;;  %v10110_v42 = vpop.f32.mrb[3].mxu1  ;;  %10363 = vmatprep.subr.bf16.mxu0 %v15109_v0  ;;  %10383 = vmatprep.subr.bf16.mxu1 %v15109_v0 }
 0x1a4   : > { %v11564_v41 = vld [vmem:[%s15095_s2 + $0x100] sm:$0xff]  }
 0x1a5   : > { %v11565_v42 = vld [vmem:[%s15095_s2 + $0x140] sm:$0xff]  }
 0x1a6   : > { %10364 = vmatpush3.bf16.msra.mxu0 %v11528_v37  ;;  %10384 = vmatpush3.bf16.msra.mxu1 %v11529_v38  ;;  %v11562_v37 = vld [vmem:[%s15095_s2 + $0xb8] sm:$0xff]  }
 0x1a7   : > { %10365 = vmatprep.subr.bf16.mxu0 %v15109_v0  ;;  %10385 = vmatprep.subr.bf16.mxu1 %v15109_v0  ;;  %v11563_v38 = vld [vmem:[%s15095_s2 + $0xf8] sm:$0xff]  }
 0x1aa   : > { %10366 = vmatpush3.bf16.msra.mxu0 %v11530_v43  ;;  %10386 = vmatpush3.bf16.msra.mxu1 %v11531_v44  ;;  %v11566_v43 = vld [vmem:[%s15095_s2 + $0x108] sm:$0xff]  }
 0x1ab   : > { %10391 = vmatprep.subr.bf16.mxu0 %v15109_v0  ;;  %10411 = vmatprep.subr.bf16.mxu1 %v15109_v0  ;;  %v11567_v44 = vld [vmem:[%s15095_s2 + $0x148] sm:$0xff]  }
 0x1ad   : > { %10368 = vmatmul.mubr.bf16.vlgmr.msra.gmra.mrb[28].mxu0 %v12279_v49  ;;  %10388 = vmatmul.mubr.bf16.vlgmr.msra.gmra.mrb[28].mxu1 %v12279_v49 }
 0x1ae   : > { %10392 = vmatpush3.bf16.msra.mxu0 %v11532_v45  ;;  %10412 = vmatpush3.bf16.msra.mxu1 %v11533_v46  ;;  %v11568_v45 = vld [vmem:[%s15095_s2 + $0x110] sm:$0xff]  }
 0x1af   : > { %10393 = vmatprep.subr.bf16.mxu0 %v15109_v0  ;;  %10413 = vmatprep.subr.bf16.mxu1 %v15109_v0  ;;  %v11569_v46 = vld [vmem:[%s15095_s2 + $0x150] sm:$0xff]  }
 0x1b0   : > { %10407 = vmatprep.mubr.msk.bf16.mxu0 %vm12047_vm0, %v15109_v0  ;;  %10427 = vmatprep.mubr.msk.bf16.mxu1 %vm12047_vm0, %v15109_v0 }
 0x1b2   : > { %10394 = vmatpush3.bf16.msra.mxu0 %v11534_v47  ;;  %10414 = vmatpush3.bf16.msra.mxu1 %v11535_v48  ;;  %v11570_v47 = vld [vmem:[%s15095_s2 + $0x118] sm:$0xff]  }
 0x1b3   : > { %10395 = vmatprep.subr.bf16.mxu0 %v15109_v0  ;;  %10415 = vmatprep.subr.bf16.mxu1 %v15109_v0  ;;  %v11571_v48 = vld [vmem:[%s15095_s2 + $0x158] sm:$0xff]  }
 0x1b6   : > { %10396 = vmatpush3.bf16.msra.mxu0 %v11536_v50  ;;  %10416 = vmatpush3.bf16.msra.mxu1 %v11537_v51  ;;  %v11572_v50 = vld [vmem:[%s15095_s2 + $0x120] sm:$0xff]  }
 0x1b7   : > { %10397 = vmatprep.subr.bf16.mxu0 %v15109_v0  ;;  %10417 = vmatprep.subr.bf16.mxu1 %v15109_v0  ;;  %v11573_v51 = vld [vmem:[%s15095_s2 + $0x160] sm:$0xff]  }
 0x1ba   : > { %10398 = vmatpush3.bf16.msra.mxu0 %v11538_v52  ;;  %10418 = vmatpush3.bf16.msra.mxu1 %v11539_v53  ;;  %v11574_v52 = vld [vmem:[%s15095_s2 + $0x128] sm:$0xff]  }
 0x1bb   : > { %10399 = vmatprep.subr.bf16.mxu0 %v15109_v0  ;;  %10419 = vmatprep.subr.bf16.mxu1 %v15109_v0  ;;  %v11575_v53 = vld [vmem:[%s15095_s2 + $0x168] sm:$0xff]  }
 0x1be   : > { %10400 = vmatpush3.bf16.msra.mxu0 %v11540_v54  ;;  %10420 = vmatpush3.bf16.msra.mxu1 %v11541_v55 }
 0x1bf   : > { %10401 = vmatprep.subr.bf16.mxu0 %v15109_v0  ;;  %10421 = vmatprep.subr.bf16.mxu1 %v15109_v0 }
 0x1c0   : > { %v12829_v58 = vpop.f32.mrb[4].mxu0  ;;  %v12831_v59 = vpop.f32.mrb[4].mxu1 }
 0x1c1   : > { %v10129_v60 = vpop.f32.mrb[5].mxu0  ;;  %v10149_v61 = vpop.f32.mrb[5].mxu1 }
 0x1c2   : > { %v12833_v62 = vpop.f32.mrb[6].mxu0  ;;  %v12835_v63 = vpop.f32.mrb[6].mxu1  ;;  %10402 = vmatpush3.bf16.msra.mxu0 %v11542_v56  ;;  %10422 = vmatpush3.bf16.msra.mxu1 %v11543_v57 }
 0x1c3   : > { %v10130_v5 = vpop.f32.mrb[7].mxu0  ;;  %v10150_v6 = vpop.f32.mrb[7].mxu1  ;;  %10403 = vmatprep.subr.bf16.mxu0 %v15109_v0  ;;  %10423 = vmatprep.subr.bf16.mxu1 %v15109_v0 }
 0x1c6   : > { %10404 = vmatpush3.bf16.msra.mxu0 %v11544_v1  ;;  %10424 = vmatpush3.bf16.msra.mxu1 %v11545_v2  ;;  %v11576_v1 = vld [vmem:[%s15095_s2 + $0x130] sm:$0xff]  }
 0x1c7   : > { %10405 = vmatprep.subr.bf16.mxu0 %v15109_v0  ;;  %10425 = vmatprep.subr.bf16.mxu1 %v15109_v0  ;;  %v11577_v2 = vld [vmem:[%s15095_s2 + $0x170] sm:$0xff]  }
 0x1ca   : > { %10406 = vmatpush3.bf16.msra.mxu0 %v11546_v7  ;;  %10426 = vmatpush3.bf16.msra.mxu1 %v11547_v8 }
 0x1cb   : > { %10431 = vmatprep.subr.bf16.mxu0 %v15109_v0  ;;  %10451 = vmatprep.subr.bf16.mxu1 %v15109_v0 }
 0x1cd   : > { %10408 = vmatmul.mubr.bf16.vlgmr.msra.gmra.mrb[32].mxu0 %v12279_v49  ;;  %10428 = vmatmul.mubr.bf16.vlgmr.msra.gmra.mrb[32].mxu1 %v12279_v49 }
 0x1ce   : > { %10432 = vmatpush3.bf16.msra.mxu0 %v11548_v9  ;;  %10452 = vmatpush3.bf16.msra.mxu1 %v11549_v10  ;;  %v11578_v9 = vld [vmem:[%s15095_s2 + $0x138] sm:$0xff]  }
 0x1cf   : > { %10433 = vmatprep.subr.bf16.mxu0 %v15109_v0  ;;  %10453 = vmatprep.subr.bf16.mxu1 %v15109_v0  ;;  %v11579_v10 = vld [vmem:[%s15095_s2 + $0x178] sm:$0xff]  }
 0x1d0   : > { %10447 = vmatprep.mubr.msk.bf16.mxu0 %vm12047_vm0, %v15109_v0  ;;  %10467 = vmatprep.mubr.msk.bf16.mxu1 %vm12047_vm0, %v15109_v0 }
 0x1d2   : > { %10434 = vmatpush3.bf16.msra.mxu0 %v11550_v11  ;;  %10454 = vmatpush3.bf16.msra.mxu1 %v11551_v12  ;;  %v11580_v11 = vld [vmem:[%s15095_s2 + $0x180] sm:$0xff]  }
 0x1d3   : > { %10435 = vmatprep.subr.bf16.mxu0 %v15109_v0  ;;  %10455 = vmatprep.subr.bf16.mxu1 %v15109_v0  ;;  %v11581_v12 = vld [vmem:[%s15095_s2 + $0x1c0] sm:$0xff]  }
 0x1d6   : > { %10436 = vmatpush3.bf16.msra.mxu0 %v11552_v13  ;;  %10456 = vmatpush3.bf16.msra.mxu1 %v11553_v14  ;;  %v11582_v13 = vld [vmem:[%s15095_s2 + $0x188] sm:$0xff]  }
 0x1d7   : > { %10437 = vmatprep.subr.bf16.mxu0 %v15109_v0  ;;  %10457 = vmatprep.subr.bf16.mxu1 %v15109_v0  ;;  %v11583_v14 = vld [vmem:[%s15095_s2 + $0x1c8] sm:$0xff]  }
 0x1da   : > { %10438 = vmatpush3.bf16.msra.mxu0 %v11554_v15  ;;  %10458 = vmatpush3.bf16.msra.mxu1 %v11555_v16  ;;  %v11584_v15 = vld [vmem:[%s15095_s2 + $0x190] sm:$0xff]  }
 0x1db   : > { %10439 = vmatprep.subr.bf16.mxu0 %v15109_v0  ;;  %10459 = vmatprep.subr.bf16.mxu1 %v15109_v0  ;;  %v11585_v16 = vld [vmem:[%s15095_s2 + $0x1d0] sm:$0xff]  }
 0x1de   : > { %10440 = vmatpush3.bf16.msra.mxu0 %v11556_v17  ;;  %10460 = vmatpush3.bf16.msra.mxu1 %v11557_v18  ;;  %v11586_v17 = vld [vmem:[%s15095_s2 + $0x198] sm:$0xff]  }
 0x1df   : > { %10441 = vmatprep.subr.bf16.mxu0 %v15109_v0  ;;  %10461 = vmatprep.subr.bf16.mxu1 %v15109_v0  ;;  %v11587_v18 = vld [vmem:[%s15095_s2 + $0x1d8] sm:$0xff]  }
 0x1e0   : > { %v12911_v21 = vpop.f32.mrb[8].mxu0  ;;  %v12913_v22 = vpop.f32.mrb[8].mxu1 }
 0x1e1   : > { %v10169_v23 = vpop.f32.mrb[9].mxu0  ;;  %v10189_v24 = vpop.f32.mrb[9].mxu1 }
 0x1e2   : > { %v12915_v25 = vpop.f32.mrb[10].mxu0  ;;  %v12917_v26 = vpop.f32.mrb[10].mxu1  ;;  %10442 = vmatpush3.bf16.msra.mxu0 %v11558_v19  ;;  %10462 = vmatpush3.bf16.msra.mxu1 %v11559_v20  ;;  %v11588_v19 = vld [vmem:[%s15095_s2 + $0x1a0] sm:$0xff]   ;;  %v11590_v23 = vld [vmem:[%s15095_s2 + $0x1a8] sm:$0xff]  }
 0x1e3   : > { %v10170_v33 = vpop.f32.mrb[11].mxu0  ;;  %v10190_v34 = vpop.f32.mrb[11].mxu1  ;;  %10443 = vmatprep.subr.bf16.mxu0 %v15109_v0  ;;  %10463 = vmatprep.subr.bf16.mxu1 %v15109_v0  ;;  %v11589_v20 = vld [vmem:[%s15095_s2 + $0x1e0] sm:$0xff]   ;;  %v11591_v24 = vld [vmem:[%s15095_s2 + $0x1e8] sm:$0xff]  }
 0x1e6   : > { %10444 = vmatpush3.bf16.msra.mxu0 %v11560_v27  ;;  %10464 = vmatpush3.bf16.msra.mxu1 %v11561_v28 }
 0x1e7   : > { %10445 = vmatprep.subr.bf16.mxu0 %v15109_v0  ;;  %10465 = vmatprep.subr.bf16.mxu1 %v15109_v0 }
 0x1ea   : > { %10446 = vmatpush3.bf16.msra.mxu0 %v11562_v37  ;;  %10466 = vmatpush3.bf16.msra.mxu1 %v11563_v38 }
 0x1eb   : > { %10471 = vmatprep.subr.bf16.mxu0 %v15109_v0  ;;  %10491 = vmatprep.subr.bf16.mxu1 %v15109_v0 }
 0x1ed   : > { %10448 = vmatmul.mubr.bf16.vlgmr.msra.gmra.mrb[36].mxu0 %v12279_v49  ;;  %10468 = vmatmul.mubr.bf16.vlgmr.msra.gmra.mrb[36].mxu1 %v12279_v49 }
 0x1ee   : > { %10472 = vmatpush3.bf16.msra.mxu0 %v11564_v41  ;;  %10492 = vmatpush3.bf16.msra.mxu1 %v11565_v42  ;;  %v11592_v41 = vld [vmem:[%s15095_s2 + $0x1b0] sm:$0xff]  }
 0x1ef   : > { %10473 = vmatprep.subr.bf16.mxu0 %v15109_v0  ;;  %10493 = vmatprep.subr.bf16.mxu1 %v15109_v0  ;;  %v11593_v42 = vld [vmem:[%s15095_s2 + $0x1f0] sm:$0xff]  }
 0x1f0   : > { %10487 = vmatprep.mubr.msk.bf16.mxu0 %vm12047_vm0, %v15109_v0  ;;  %10507 = vmatprep.mubr.msk.bf16.mxu1 %vm12047_vm0, %v15109_v0 }
 0x1f2   : > { %10474 = vmatpush3.bf16.msra.mxu0 %v11566_v43  ;;  %10494 = vmatpush3.bf16.msra.mxu1 %v11567_v44  ;;  %v11688_v44 = vld [vmem:[%s15096_s3 + $0xb0] sm:$0xff]  }
 0x1f3   : > { %10475 = vmatprep.subr.bf16.mxu0 %v15109_v0  ;;  %10495 = vmatprep.subr.bf16.mxu1 %v15109_v0  ;;  %v11689_v43 = vld [vmem:[%s15096_s3 + $0xf0] sm:$0xff]  }
 0x1f6   : > { %10476 = vmatpush3.bf16.msra.mxu0 %v11568_v45  ;;  %10496 = vmatpush3.bf16.msra.mxu1 %v11569_v46 }
 0x1f7   : > { %10477 = vmatprep.subr.bf16.mxu0 %v15109_v0  ;;  %10497 = vmatprep.subr.bf16.mxu1 %v15109_v0 }
 0x1fa   : > { %10478 = vmatpush3.bf16.msra.mxu0 %v11570_v47  ;;  %10498 = vmatpush3.bf16.msra.mxu1 %v11571_v48  ;;  %v11594_v47 = vld [vmem:[%s15095_s2 + $0x1b8] sm:$0xff]  }
 0x1fb   : > { %10479 = vmatprep.subr.bf16.mxu0 %v15109_v0  ;;  %10499 = vmatprep.subr.bf16.mxu1 %v15109_v0  ;;  %v11595_v48 = vld [vmem:[%s15095_s2 + $0x1f8] sm:$0xff]  }
 0x1fe   : > { %10480 = vmatpush3.bf16.msra.mxu0 %v11572_v50  ;;  %10500 = vmatpush3.bf16.msra.mxu1 %v11573_v51  ;;  %v11596_v50 = vld [vmem:[%s15095_s2 + $0x200] sm:$0xff]  }
 0x1ff   : > { %10481 = vmatprep.subr.bf16.mxu0 %v15109_v0  ;;  %10501 = vmatprep.subr.bf16.mxu1 %v15109_v0  ;;  %v11597_v51 = vld [vmem:[%s15095_s2 + $0x240] sm:$0xff]  }
 0x200   : > { %v12993_v54 = vpop.f32.mrb[12].mxu0  ;;  %v12995_v55 = vpop.f32.mrb[12].mxu1 }
 0x201   : > { %v10209_v56 = vpop.f32.mrb[13].mxu0  ;;  %v10229_v57 = vpop.f32.mrb[13].mxu1 }
 0x202   : > { %v12997_v60 = vpop.f32.mrb[14].mxu0  ;;  %v12999_v61 = vpop.f32.mrb[14].mxu1  ;;  %10482 = vmatpush3.bf16.msra.mxu0 %v11574_v52  ;;  %10502 = vmatpush3.bf16.msra.mxu1 %v11575_v53  ;;  %v11598_v52 = vld [vmem:[%s15095_s2 + $0x208] sm:$0xff]   ;;  %v11600_v56 = vld [vmem:[%s15095_s2 + $0x210] sm:$0xff]  }
 0x203   : > { %v10210_v7 = vpop.f32.mrb[15].mxu0  ;;  %v10230_v8 = vpop.f32.mrb[15].mxu1  ;;  %10483 = vmatprep.subr.bf16.mxu0 %v15109_v0  ;;  %10503 = vmatprep.subr.bf16.mxu1 %v15109_v0  ;;  %v11599_v53 = vld [vmem:[%s15095_s2 + $0x248] sm:$0xff]   ;;  %v11601_v57 = vld [vmem:[%s15095_s2 + $0x250] sm:$0xff]  }
 0x204   : > { %v11604_v7 = vld [vmem:[%s15095_s2 + $0x220] sm:$0xff]  }
 0x205   : > { %v11605_v8 = vld [vmem:[%s15095_s2 + $0x260] sm:$0xff]  }
 0x206   : > { %10484 = vmatpush3.bf16.msra.mxu0 %v11576_v1  ;;  %10504 = vmatpush3.bf16.msra.mxu1 %v11577_v2  ;;  %v11602_v1 = vld [vmem:[%s15095_s2 + $0x218] sm:$0xff]  }
 0x207   : > { %10485 = vmatprep.subr.bf16.mxu0 %v15109_v0  ;;  %10505 = vmatprep.subr.bf16.mxu1 %v15109_v0  ;;  %v11603_v2 = vld [vmem:[%s15095_s2 + $0x258] sm:$0xff]  }
 0x20a   : > { %10486 = vmatpush3.bf16.msra.mxu0 %v11578_v9  ;;  %10506 = vmatpush3.bf16.msra.mxu1 %v11579_v10  ;;  %v11606_v9 = vld [vmem:[%s15095_s2 + $0x228] sm:$0xff]  }
 0x20b   : > { %10511 = vmatprep.subr.bf16.mxu0 %v15109_v0  ;;  %10531 = vmatprep.subr.bf16.mxu1 %v15109_v0  ;;  %v11607_v10 = vld [vmem:[%s15095_s2 + $0x268] sm:$0xff]  }
 0x20d   : > { %10488 = vmatmul.mubr.bf16.vlgmr.msra.gmra.mrb[40].mxu0 %v12279_v49  ;;  %10508 = vmatmul.mubr.bf16.vlgmr.msra.gmra.mrb[40].mxu1 %v12279_v49 }
 0x20e   : > { %10512 = vmatpush3.bf16.msra.mxu0 %v11580_v11  ;;  %10532 = vmatpush3.bf16.msra.mxu1 %v11581_v12 }
 0x20f   : > { %10513 = vmatprep.subr.bf16.mxu0 %v15109_v0  ;;  %10533 = vmatprep.subr.bf16.mxu1 %v15109_v0 }
 0x210   : > { %10527 = vmatprep.mubr.msk.bf16.mxu0 %vm12047_vm0, %v15109_v0  ;;  %10547 = vmatprep.mubr.msk.bf16.mxu1 %vm12047_vm0, %v15109_v0 }
 0x212   : > { %10514 = vmatpush3.bf16.msra.mxu0 %v11582_v13  ;;  %10534 = vmatpush3.bf16.msra.mxu1 %v11583_v14 }
 0x213   : > { %10515 = vmatprep.subr.bf16.mxu0 %v15109_v0  ;;  %10535 = vmatprep.subr.bf16.mxu1 %v15109_v0 }
 0x216   : > { %10516 = vmatpush3.bf16.msra.mxu0 %v11584_v15  ;;  %10536 = vmatpush3.bf16.msra.mxu1 %v11585_v16 }
 0x217   : > { %10517 = vmatprep.subr.bf16.mxu0 %v15109_v0  ;;  %10537 = vmatprep.subr.bf16.mxu1 %v15109_v0 }
 0x21a   : > { %10518 = vmatpush3.bf16.msra.mxu0 %v11586_v17  ;;  %10538 = vmatpush3.bf16.msra.mxu1 %v11587_v18  ;;  %v11608_v17 = vld [vmem:[%s15095_s2 + $0x230] sm:$0xff]  }
 0x21b   : > { %10519 = vmatprep.subr.bf16.mxu0 %v15109_v0  ;;  %10539 = vmatprep.subr.bf16.mxu1 %v15109_v0  ;;  %v11609_v18 = vld [vmem:[%s15095_s2 + $0x270] sm:$0xff]  }
 0x21e   : > { %10520 = vmatpush3.bf16.msra.mxu0 %v11588_v19  ;;  %10540 = vmatpush3.bf16.msra.mxu1 %v11589_v20 }
 0x21f   : > { %10521 = vmatprep.subr.bf16.mxu0 %v15109_v0  ;;  %10541 = vmatprep.subr.bf16.mxu1 %v15109_v0 }
 0x220   : > { %v13075_v27 = vpop.f32.mrb[16].mxu0  ;;  %v13077_v28 = vpop.f32.mrb[16].mxu1 }
 0x221   : > { %v10249_v33 = vpop.f32.mrb[17].mxu0  ;;  %v10269_v34 = vpop.f32.mrb[17].mxu1 }
 0x222   : > { %v13079_v37 = vpop.f32.mrb[18].mxu0  ;;  %v13081_v38 = vpop.f32.mrb[18].mxu1  ;;  %10522 = vmatpush3.bf16.msra.mxu0 %v11590_v23  ;;  %10542 = vmatpush3.bf16.msra.mxu1 %v11591_v24  ;;  %v11610_v33 = vld [vmem:[%s15095_s2 + $0x238] sm:$0xff]  }
 0x223   : > { %v10250_v45 = vpop.f32.mrb[19].mxu0  ;;  %v10270_v46 = vpop.f32.mrb[19].mxu1  ;;  %10523 = vmatprep.subr.bf16.mxu0 %v15109_v0  ;;  %10543 = vmatprep.subr.bf16.mxu1 %v15109_v0  ;;  %v11611_v34 = vld [vmem:[%s15095_s2 + $0x278] sm:$0xff]  }
 0x224   : > { %v11614_v45 = vld [vmem:[%s15095_s2 + $0x288] sm:$0xff]  }
 0x225   : > { %v11615_v46 = vld [vmem:[%s15095_s2 + $0x2c8] sm:$0xff]  }
 0x226   : > { %10524 = vmatpush3.bf16.msra.mxu0 %v11592_v41  ;;  %10544 = vmatpush3.bf16.msra.mxu1 %v11593_v42  ;;  %v11612_v41 = vld [vmem:[%s15095_s2 + $0x280] sm:$0xff]  }
 0x227   : > { %10525 = vmatprep.subr.bf16.mxu0 %v15109_v0  ;;  %10545 = vmatprep.subr.bf16.mxu1 %v15109_v0  ;;  %v11613_v42 = vld [vmem:[%s15095_s2 + $0x2c0] sm:$0xff]  }
 0x22a   : > { %10526 = vmatpush3.bf16.msra.mxu0 %v11594_v47  ;;  %10546 = vmatpush3.bf16.msra.mxu1 %v11595_v48  ;;  %v11616_v47 = vld [vmem:[%s15095_s2 + $0x290] sm:$0xff]  }
 0x22b   : > { %10551 = vmatprep.subr.bf16.mxu0 %v15109_v0  ;;  %10571 = vmatprep.subr.bf16.mxu1 %v15109_v0  ;;  %v11617_v48 = vld [vmem:[%s15095_s2 + $0x2d0] sm:$0xff]  }
 0x22d   : > { %10528 = vmatmul.mubr.bf16.vlgmr.msra.gmra.mrb[44].mxu0 %v12279_v49  ;;  %10548 = vmatmul.mubr.bf16.vlgmr.msra.gmra.mrb[44].mxu1 %v12279_v49 }
 0x22e   : > { %10552 = vmatpush3.bf16.msra.mxu0 %v11596_v50  ;;  %10572 = vmatpush3.bf16.msra.mxu1 %v11597_v51  ;;  %v11618_v50 = vld [vmem:[%s15095_s2 + $0x298] sm:$0xff]  }
 0x22f   : > { %10553 = vmatprep.subr.bf16.mxu0 %v15109_v0  ;;  %10573 = vmatprep.subr.bf16.mxu1 %v15109_v0  ;;  %v11619_v51 = vld [vmem:[%s15095_s2 + $0x2d8] sm:$0xff]  }
 0x230   : > { %10567 = vmatprep.mubr.msk.bf16.mxu0 %vm12047_vm0, %v15109_v0  ;;  %10587 = vmatprep.mubr.msk.bf16.mxu1 %vm12047_vm0, %v15109_v0 }
 0x232   : > { %10554 = vmatpush3.bf16.msra.mxu0 %v11598_v52  ;;  %10574 = vmatpush3.bf16.msra.mxu1 %v11599_v53  ;;  %v11620_v52 = vld [vmem:[%s15095_s2 + $0x2a0] sm:$0xff]  }
 0x233   : > { %10555 = vmatprep.subr.bf16.mxu0 %v15109_v0  ;;  %10575 = vmatprep.subr.bf16.mxu1 %v15109_v0  ;;  %v11621_v53 = vld [vmem:[%s15095_s2 + $0x2e0] sm:$0xff]  }
 0x236   : > { %10556 = vmatpush3.bf16.msra.mxu0 %v11600_v56  ;;  %10576 = vmatpush3.bf16.msra.mxu1 %v11601_v57  ;;  %v11622_v56 = vld [vmem:[%s15095_s2 + $0x2a8] sm:$0xff]  }
 0x237   : > { %10557 = vmatprep.subr.bf16.mxu0 %v15109_v0  ;;  %10577 = vmatprep.subr.bf16.mxu1 %v15109_v0  ;;  %v11623_v57 = vld [vmem:[%s15095_s2 + $0x2e8] sm:$0xff]  }
 0x23a   : > { %10558 = vmatpush3.bf16.msra.mxu0 %v11602_v1  ;;  %10578 = vmatpush3.bf16.msra.mxu1 %v11603_v2 }
 0x23b   : > { %10559 = vmatprep.subr.bf16.mxu0 %v15109_v0  ;;  %10579 = vmatprep.subr.bf16.mxu1 %v15109_v0 }
 0x23e   : > { %10560 = vmatpush3.bf16.msra.mxu0 %v11604_v7  ;;  %10580 = vmatpush3.bf16.msra.mxu1 %v11605_v8 }
 0x23f   : > { %10561 = vmatprep.subr.bf16.mxu0 %v15109_v0  ;;  %10581 = vmatprep.subr.bf16.mxu1 %v15109_v0 }
 0x240   : > { %v13157_v11 = vpop.f32.mrb[20].mxu0  ;;  %v13159_v12 = vpop.f32.mrb[20].mxu1 }
 0x241   : > { %15144 = vst [vmem:[#allocation7_spill] sm:$0xff] %v13159_v12  ;;  %v10289_v13 = vpop.f32.mrb[21].mxu0  ;;  %v10309_v14 = vpop.f32.mrb[21].mxu1 }
 0x242   : > { %v13161_v15 = vpop.f32.mrb[22].mxu0  ;;  %v13163_v16 = vpop.f32.mrb[22].mxu1  ;;  %10562 = vmatpush3.bf16.msra.mxu0 %v11606_v9  ;;  %10582 = vmatpush3.bf16.msra.mxu1 %v11607_v10  ;;  %v11624_v13 = vld [vmem:[%s15095_s2 + $0x2b0] sm:$0xff]  }
 0x243   : > { %15145 = vst [vmem:[#allocation8_spill] sm:$0xff] %v13163_v16  ;;  %v10290_v23 = vpop.f32.mrb[23].mxu0  ;;  %v10310_v24 = vpop.f32.mrb[23].mxu1  ;;  %10563 = vmatprep.subr.bf16.mxu0 %v15109_v0  ;;  %10583 = vmatprep.subr.bf16.mxu1 %v15109_v0  ;;  %v11625_v14 = vld [vmem:[%s15095_s2 + $0x2f0] sm:$0xff]  }
 0x246   : > { %10564 = vmatpush3.bf16.msra.mxu0 %v11608_v17  ;;  %10584 = vmatpush3.bf16.msra.mxu1 %v11609_v18 }
 0x247   : > { %10565 = vmatprep.subr.bf16.mxu0 %v15109_v0  ;;  %10585 = vmatprep.subr.bf16.mxu1 %v15109_v0 }
 0x24a   : > { %10566 = vmatpush3.bf16.msra.mxu0 %v11610_v33  ;;  %10586 = vmatpush3.bf16.msra.mxu1 %v11611_v34  ;;  %v11626_v33 = vld [vmem:[%s15095_s2 + $0x2b8] sm:$0xff]  }
 0x24b   : > { %10591 = vmatprep.subr.bf16.mxu0 %v15109_v0  ;;  %10611 = vmatprep.subr.bf16.mxu1 %v15109_v0  ;;  %v11627_v34 = vld [vmem:[%s15095_s2 + $0x2f8] sm:$0xff]  }
 0x24d   : > { %10568 = vmatmul.mubr.bf16.vlgmr.msra.gmra.mrb[48].mxu0 %v12279_v49  ;;  %10588 = vmatmul.mubr.bf16.vlgmr.msra.gmra.mrb[48].mxu1 %v12279_v49 }
 0x24e   : > { %10592 = vmatpush3.bf16.msra.mxu0 %v11612_v41  ;;  %10612 = vmatpush3.bf16.msra.mxu1 %v11613_v42  ;;  %v11628_v41 = vld [vmem:[%s15095_s2 + $0x300] sm:$0xff]  }
 0x24f   : > { %10593 = vmatprep.subr.bf16.mxu0 %v15109_v0  ;;  %10613 = vmatprep.subr.bf16.mxu1 %v15109_v0  ;;  %v11629_v42 = vld [vmem:[%s15095_s2 + $0x340] sm:$0xff]  }
 0x250   : > { %10607 = vmatprep.mubr.msk.bf16.mxu0 %vm12047_vm0, %v15109_v0  ;;  %10627 = vmatprep.mubr.msk.bf16.mxu1 %vm12047_vm0, %v15109_v0 }
 0x252   : > { %10594 = vmatpush3.bf16.msra.mxu0 %v11614_v45  ;;  %10614 = vmatpush3.bf16.msra.mxu1 %v11615_v46  ;;  %v11630_v45 = vld [vmem:[%s15095_s2 + $0x308] sm:$0xff]  }
 0x253   : > { %10595 = vmatprep.subr.bf16.mxu0 %v15109_v0  ;;  %10615 = vmatprep.subr.bf16.mxu1 %v15109_v0  ;;  %v11631_v46 = vld [vmem:[%s15095_s2 + $0x348] sm:$0xff]  }
 0x256   : > { %10596 = vmatpush3.bf16.msra.mxu0 %v11616_v47  ;;  %10616 = vmatpush3.bf16.msra.mxu1 %v11617_v48  ;;  %v11632_v47 = vld [vmem:[%s15095_s2 + $0x310] sm:$0xff]  }
 0x257   : > { %10597 = vmatprep.subr.bf16.mxu0 %v15109_v0  ;;  %10617 = vmatprep.subr.bf16.mxu1 %v15109_v0  ;;  %v11633_v48 = vld [vmem:[%s15095_s2 + $0x350] sm:$0xff]  }
 0x25a   : > { %10598 = vmatpush3.bf16.msra.mxu0 %v11618_v50  ;;  %10618 = vmatpush3.bf16.msra.mxu1 %v11619_v51  ;;  %v11634_v50 = vld [vmem:[%s15095_s2 + $0x318] sm:$0xff]  }
 0x25b   : > { %10599 = vmatprep.subr.bf16.mxu0 %v15109_v0  ;;  %10619 = vmatprep.subr.bf16.mxu1 %v15109_v0  ;;  %v11635_v51 = vld [vmem:[%s15095_s2 + $0x358] sm:$0xff]  }
 0x25e   : > { %10600 = vmatpush3.bf16.msra.mxu0 %v11620_v52  ;;  %10620 = vmatpush3.bf16.msra.mxu1 %v11621_v53  ;;  %v11636_v52 = vld [vmem:[%s15095_s2 + $0x320] sm:$0xff]  }
 0x25f   : > { %10601 = vmatprep.subr.bf16.mxu0 %v15109_v0  ;;  %10621 = vmatprep.subr.bf16.mxu1 %v15109_v0  ;;  %v11637_v53 = vld [vmem:[%s15095_s2 + $0x360] sm:$0xff]  }
 0x260   : > { %v13239_v1 = vpop.f32.mrb[24].mxu0  ;;  %v13241_v2 = vpop.f32.mrb[24].mxu1 }
 0x261   : > { %15146 = vst [vmem:[#allocation9_spill] sm:$0xff] %v13239_v1  ;;  %15147 = vst [vmem:[#allocation10_spill] sm:$0xff] %v13241_v2  ;;  %v10329_v7 = vpop.f32.mrb[25].mxu0  ;;  %v10349_v8 = vpop.f32.mrb[25].mxu1  ;;  %v11768_v1 = vld [vmem:[%s15096_s3 + $0x330] sm:$0xff]  }
 0x262   : > { %v13243_v9 = vpop.f32.mrb[26].mxu0  ;;  %v13245_v10 = vpop.f32.mrb[26].mxu1  ;;  %10602 = vmatpush3.bf16.msra.mxu0 %v11622_v56  ;;  %10622 = vmatpush3.bf16.msra.mxu1 %v11623_v57  ;;  %v11638_v56 = vld [vmem:[%s15095_s2 + $0x328] sm:$0xff]  }
 0x263   : > { %15148 = vst [vmem:[#allocation11_spill] sm:$0xff] %v13243_v9  ;;  %15149 = vst [vmem:[#allocation12_spill] sm:$0xff] %v13245_v10  ;;  %v10330_v23 = vpop.f32.mrb[27].mxu0  ;;  %v10350_v24 = vpop.f32.mrb[27].mxu1  ;;  %10603 = vmatprep.subr.bf16.mxu0 %v15109_v0  ;;  %10623 = vmatprep.subr.bf16.mxu1 %v15109_v0  ;;  %v11639_v57 = vld [vmem:[%s15095_s2 + $0x368] sm:$0xff]   ;;  %v11769_v9 = vld [vmem:[%s15096_s3 + $0x370] sm:$0xff]  }
 0x266   : > { %10604 = vmatpush3.bf16.msra.mxu0 %v11624_v13  ;;  %10624 = vmatpush3.bf16.msra.mxu1 %v11625_v14 }
 0x267   : > { %10605 = vmatprep.subr.bf16.mxu0 %v15109_v0  ;;  %10625 = vmatprep.subr.bf16.mxu1 %v15109_v0 }
 0x26a   : > { %10606 = vmatpush3.bf16.msra.mxu0 %v11626_v33  ;;  %10626 = vmatpush3.bf16.msra.mxu1 %v11627_v34  ;;  %v11640_v33 = vld [vmem:[%s15095_s2 + $0x330] sm:$0xff]  }
 0x26b   : > { %10631 = vmatprep.subr.bf16.mxu0 %v15109_v0  ;;  %10651 = vmatprep.subr.bf16.mxu1 %v15109_v0  ;;  %v11641_v34 = vld [vmem:[%s15095_s2 + $0x370] sm:$0xff]  }
 0x26d   : > { %10608 = vmatmul.mubr.bf16.vlgmr.msra.gmra.mrb[52].mxu0 %v12279_v49  ;;  %10628 = vmatmul.mubr.bf16.vlgmr.msra.gmra.mrb[52].mxu1 %v12279_v49 }
 0x26e   : > { %10632 = vmatpush3.bf16.msra.mxu0 %v11628_v41  ;;  %10652 = vmatpush3.bf16.msra.mxu1 %v11629_v42  ;;  %v11672_v42 = vld [vmem:[%s15096_s3 + $0x30] sm:$0xff]  }
 0x26f   : > { %10633 = vmatprep.subr.bf16.mxu0 %v15109_v0  ;;  %10653 = vmatprep.subr.bf16.mxu1 %v15109_v0  ;;  %v11673_v41 = vld [vmem:[%s15096_s3 + $0x70] sm:$0xff]  }
 0x270   : > { %10647 = vmatprep.mubr.msk.bf16.mxu0 %vm12047_vm0, %v15109_v0  ;;  %10667 = vmatprep.mubr.msk.bf16.mxu1 %vm12047_vm0, %v15109_v0 }
 0x272   : > { %10634 = vmatpush3.bf16.msra.mxu0 %v11630_v45  ;;  %10654 = vmatpush3.bf16.msra.mxu1 %v11631_v46 }
 0x273   : > { %10635 = vmatprep.subr.bf16.mxu0 %v15109_v0  ;;  %10655 = vmatprep.subr.bf16.mxu1 %v15109_v0 }
 0x276   : > { %10636 = vmatpush3.bf16.msra.mxu0 %v11632_v47  ;;  %10656 = vmatpush3.bf16.msra.mxu1 %v11633_v48  ;;  %v11642_v47 = vld [vmem:[%s15095_s2 + $0x338] sm:$0xff]  }
 0x277   : > { %10637 = vmatprep.subr.bf16.mxu0 %v15109_v0  ;;  %10657 = vmatprep.subr.bf16.mxu1 %v15109_v0  ;;  %v11643_v48 = vld [vmem:[%s15095_s2 + $0x378] sm:$0xff]  }
 0x27a   : > { %10638 = vmatpush3.bf16.msra.mxu0 %v11634_v50  ;;  %10658 = vmatpush3.bf16.msra.mxu1 %v11635_v51  ;;  %v11644_v50 = vld [vmem:[%s15095_s2 + $0x380] sm:$0xff]  }
 0x27b   : > { %10639 = vmatprep.subr.bf16.mxu0 %v15109_v0  ;;  %10659 = vmatprep.subr.bf16.mxu1 %v15109_v0  ;;  %v11645_v51 = vld [vmem:[%s15095_s2 + $0x3c0] sm:$0xff]  }
 0x27e   : > { %10640 = vmatpush3.bf16.msra.mxu0 %v11636_v52  ;;  %10660 = vmatpush3.bf16.msra.mxu1 %v11637_v53  ;;  %v11646_v52 = vld [vmem:[%s15095_s2 + $0x388] sm:$0xff]  }
 0x27f   : > { %10641 = vmatprep.subr.bf16.mxu0 %v15109_v0  ;;  %10661 = vmatprep.subr.bf16.mxu1 %v15109_v0  ;;  %v11647_v53 = vld [vmem:[%s15095_s2 + $0x3c8] sm:$0xff]  }
 0x280   : > { %v13321_v7 = vpop.f32.mrb[28].mxu0  ;;  %v13323_v8 = vpop.f32.mrb[28].mxu1 }
 0x281   : > { %15150 = vst [vmem:[#allocation13_spill] sm:$0xff] %v13321_v7  ;;  %15151 = vst [vmem:[#allocation14_spill] sm:$0xff] %v13323_v8  ;;  %v10369_v13 = vpop.f32.mrb[29].mxu0  ;;  %v10389_v14 = vpop.f32.mrb[29].mxu1  ;;  %v11752_v7 = vld [vmem:[%s15096_s3 + $0x2b0] sm:$0xff]  }
 0x282   : > { %v13325_v23 = vpop.f32.mrb[30].mxu0  ;;  %v13327_v24 = vpop.f32.mrb[30].mxu1  ;;  %10642 = vmatpush3.bf16.msra.mxu0 %v11638_v56  ;;  %10662 = vmatpush3.bf16.msra.mxu1 %v11639_v57  ;;  %v11648_v56 = vld [vmem:[%s15095_s2 + $0x390] sm:$0xff]   ;;  %v11650_v13 = vld [vmem:[%s15095_s2 + $0x398] sm:$0xff]  }
 0x283   : > { %15152 = vst [vmem:[#allocation15_spill] sm:$0xff] %v13325_v23  ;;  %15153 = vst [vmem:[#allocation16_spill] sm:$0xff] %v13327_v24  ;;  %v10370_v45 = vpop.f32.mrb[31].mxu0  ;;  %v10390_v46 = vpop.f32.mrb[31].mxu1  ;;  %10643 = vmatprep.subr.bf16.mxu0 %v15109_v0  ;;  %10663 = vmatprep.subr.bf16.mxu1 %v15109_v0  ;;  %v11649_v57 = vld [vmem:[%s15095_s2 + $0x3d0] sm:$0xff]   ;;  %v11651_v14 = vld [vmem:[%s15095_s2 + $0x3d8] sm:$0xff]  }
 0x284   : > { %v11654_v45 = vld [vmem:[%s15095_s2 + $0x3a8] sm:$0xff]   ;;  %v15154_v24 = vmov 0.0   ;;  %v11753_v23 = vld [vmem:[%s15096_s3 + $0x2f0] sm:$0xff]  }
 0x285   : > { %v11655_v46 = vld [vmem:[%s15095_s2 + $0x3e8] sm:$0xff]  }
 0x286   : > { %10644 = vmatpush3.bf16.msra.mxu0 %v11640_v33  ;;  %10664 = vmatpush3.bf16.msra.mxu1 %v11641_v34  ;;  %v11652_v33 = vld [vmem:[%s15095_s2 + $0x3a0] sm:$0xff]  }
 0x287   : > { %10645 = vmatprep.subr.bf16.mxu0 %v15109_v0  ;;  %10665 = vmatprep.subr.bf16.mxu1 %v15109_v0  ;;  %v11653_v34 = vld [vmem:[%s15095_s2 + $0x3e0] sm:$0xff]  }
 0x28a   : > { %10646 = vmatpush3.bf16.msra.mxu0 %v11642_v47  ;;  %10666 = vmatpush3.bf16.msra.mxu1 %v11643_v48 }
 0x28b   : > { %10671 = vmatprep.subr.bf16.mxu0 %v15109_v0  ;;  %10691 = vmatprep.subr.bf16.mxu1 %v15109_v0 }
 0x28d   : > { %10648 = vmatmul.mubr.bf16.vlgmr.msra.gmra.mrb[56].mxu0 %v12279_v49  ;;  %10668 = vmatmul.mubr.bf16.vlgmr.msra.gmra.mrb[56].mxu1 %v12279_v49 }
 0x28e   : > { %10672 = vmatpush3.bf16.msra.mxu0 %v11644_v50  ;;  %10692 = vmatpush3.bf16.msra.mxu1 %v11645_v51 }
 0x28f   : > { %10673 = vmatprep.subr.bf16.mxu0 %v15109_v0  ;;  %10693 = vmatprep.subr.bf16.mxu1 %v15109_v0 }
 0x290   : > { %10687 = vmatprep.mubr.msk.bf16.mxu0 %vm12047_vm0, %v15109_v0  ;;  %10707 = vmatprep.mubr.msk.bf16.mxu1 %vm12047_vm0, %v15109_v0 }
 0x292   : > { %10674 = vmatpush3.bf16.msra.mxu0 %v11646_v52  ;;  %10694 = vmatpush3.bf16.msra.mxu1 %v11647_v53 }
 0x293   : > { %10675 = vmatprep.subr.bf16.mxu0 %v15109_v0  ;;  %10695 = vmatprep.subr.bf16.mxu1 %v15109_v0 }
 0x296   : > { %10676 = vmatpush3.bf16.msra.mxu0 %v11648_v56  ;;  %10696 = vmatpush3.bf16.msra.mxu1 %v11649_v57  ;;  %v11656_v56 = vld [vmem:[%s15095_s2 + $0x3b0] sm:$0xff]  }
 0x297   : > { %10677 = vmatprep.subr.bf16.mxu0 %v15109_v0  ;;  %10697 = vmatprep.subr.bf16.mxu1 %v15109_v0  ;;  %v11657_v57 = vld [vmem:[%s15095_s2 + $0x3f0] sm:$0xff]  }
 0x29a   : > { %10678 = vmatpush3.bf16.msra.mxu0 %v11650_v13  ;;  %10698 = vmatpush3.bf16.msra.mxu1 %v11651_v14  ;;  %v11736_v14 = vld [vmem:[%s15096_s3 + $0x230] sm:$0xff]  }
 0x29b   : > { %10679 = vmatprep.subr.bf16.mxu0 %v15109_v0  ;;  %10699 = vmatprep.subr.bf16.mxu1 %v15109_v0  ;;  %v11737_v13 = vld [vmem:[%s15096_s3 + $0x270] sm:$0xff]  }
 0x29e   : > { %10680 = vmatpush3.bf16.msra.mxu0 %v11652_v33  ;;  %10700 = vmatpush3.bf16.msra.mxu1 %v11653_v34 }
 0x29f   : > { %10681 = vmatprep.subr.bf16.mxu0 %v15109_v0  ;;  %10701 = vmatprep.subr.bf16.mxu1 %v15109_v0 }
 0x2a0   : > { %v13403_v47 = vpop.f32.mrb[32].mxu0  ;;  %v13405_v48 = vpop.f32.mrb[32].mxu1 }
 0x2a1   : > { %v10409_v50 = vpop.f32.mrb[33].mxu0  ;;  %v10429_v51 = vpop.f32.mrb[33].mxu1 }
 0x2a2   : > { %v13407_v52 = vpop.f32.mrb[34].mxu0  ;;  %v13409_v53 = vpop.f32.mrb[34].mxu1  ;;  %10682 = vmatpush3.bf16.msra.mxu0 %v11654_v45  ;;  %10702 = vmatpush3.bf16.msra.mxu1 %v11655_v46  ;;  %v11658_v45 = vld [vmem:[%s15095_s2 + $0x3b8] sm:$0xff]   ;;  %v11660_v50 = vld [vmem:[%s15096_s3] sm:$0xff]  }
 0x2a3   : > { %v10410_v33 = vpop.f32.mrb[35].mxu0  ;;  %v10430_v34 = vpop.f32.mrb[35].mxu1  ;;  %10683 = vmatprep.subr.bf16.mxu0 %v15109_v0  ;;  %10703 = vmatprep.subr.bf16.mxu1 %v15109_v0  ;;  %v11659_v46 = vld [vmem:[%s15095_s2 + $0x3f8] sm:$0xff]   ;;  %v11661_v51 = vld [vmem:[%s15096_s3 + $0x40] sm:$0xff]  }
 0x2a4   : > { %v11664_v33 = vld [vmem:[%s15096_s3 + $0x10] sm:$0xff]  }
 0x2a5   : > { %v11665_v34 = vld [vmem:[%s15096_s3 + $0x50] sm:$0xff]  }
 0x2a6   : > { %10684 = vmatpush3.bf16.msra.mxu0 %v11656_v56  ;;  %10704 = vmatpush3.bf16.msra.mxu1 %v11657_v57  ;;  %v11662_v56 = vld [vmem:[%s15096_s3 + $0x8] sm:$0xff]  }
 0x2a7   : > { %10685 = vmatprep.subr.bf16.mxu0 %v15109_v0  ;;  %10705 = vmatprep.subr.bf16.mxu1 %v15109_v0  ;;  %v11663_v57 = vld [vmem:[%s15096_s3 + $0x48] sm:$0xff]  }
 0x2aa   : > { %10686 = vmatpush3.bf16.msra.mxu0 %v11658_v45  ;;  %10706 = vmatpush3.bf16.msra.mxu1 %v11659_v46  ;;  %v11666_v45 = vld [vmem:[%s15096_s3 + $0x18] sm:$0xff]  }
 0x2ab   : > { %10711 = vmatprep.subr.bf16.mxu0 %v15109_v0  ;;  %10731 = vmatprep.subr.bf16.mxu1 %v15109_v0  ;;  %v11667_v46 = vld [vmem:[%s15096_s3 + $0x58] sm:$0xff]  }
 0x2ad   : > { %10688 = vmatmul.mubr.bf16.vlgmr.msra.gmra.mrb[60].mxu0 %v12279_v49  ;;  %10708 = vmatmul.mubr.bf16.vlgmr.msra.gmra.mrb[60].mxu1 %v12279_v49 }
 0x2ae   : > { %10712 = vmatpush3.bf16.msra.mxu0 %v11660_v50  ;;  %10732 = vmatpush3.bf16.msra.mxu1 %v11661_v51  ;;  %v11668_v50 = vld [vmem:[%s15096_s3 + $0x20] sm:$0xff]  }
 0x2af   : > { %10713 = vmatprep.subr.bf16.mxu0 %v15109_v0  ;;  %10733 = vmatprep.subr.bf16.mxu1 %v15109_v0  ;;  %v11669_v51 = vld [vmem:[%s15096_s3 + $0x60] sm:$0xff]  }
 0x2b0   : > { %10727 = vmatprep.mubr.msk.bf16.mxu0 %vm12047_vm0, %v15109_v0  ;;  %10747 = vmatprep.mubr.msk.bf16.mxu1 %vm12047_vm0, %v15109_v0 }
 0x2b2   : > { %10714 = vmatpush3.bf16.msra.mxu0 %v11662_v56  ;;  %10734 = vmatpush3.bf16.msra.mxu1 %v11663_v57  ;;  %v11670_v56 = vld [vmem:[%s15096_s3 + $0x28] sm:$0xff]  }
 0x2b3   : > { %10715 = vmatprep.subr.bf16.mxu0 %v15109_v0  ;;  %10735 = vmatprep.subr.bf16.mxu1 %v15109_v0  ;;  %v11671_v57 = vld [vmem:[%s15096_s3 + $0x68] sm:$0xff]  }
 0x2b6   : > { %10716 = vmatpush3.bf16.msra.mxu0 %v11664_v33  ;;  %10736 = vmatpush3.bf16.msra.mxu1 %v11665_v34 }
 0x2b7   : > { %10717 = vmatprep.subr.bf16.mxu0 %v15109_v0  ;;  %10737 = vmatprep.subr.bf16.mxu1 %v15109_v0 }
 0x2ba   : > { %10718 = vmatpush3.bf16.msra.mxu0 %v11666_v45  ;;  %10738 = vmatpush3.bf16.msra.mxu1 %v11667_v46 }
 0x2bb   : > { %10719 = vmatprep.subr.bf16.mxu0 %v15109_v0  ;;  %10739 = vmatprep.subr.bf16.mxu1 %v15109_v0 }
 0x2be   : > { %10720 = vmatpush3.bf16.msra.mxu0 %v11668_v50  ;;  %10740 = vmatpush3.bf16.msra.mxu1 %v11669_v51 }
 0x2bf   : > { %10721 = vmatprep.subr.bf16.mxu0 %v15109_v0  ;;  %10741 = vmatprep.subr.bf16.mxu1 %v15109_v0 }
 0x2c0   : > { %v13485_v33 = vpop.f32.mrb[36].mxu0  ;;  %v13487_v34 = vpop.f32.mrb[36].mxu1 }
 0x2c1   : > { %v10449_v45 = vpop.f32.mrb[37].mxu0  ;;  %v10469_v46 = vpop.f32.mrb[37].mxu1 }
 0x2c2   : > { %v13489_v50 = vpop.f32.mrb[38].mxu0  ;;  %v13491_v51 = vpop.f32.mrb[38].mxu1  ;;  %10722 = vmatpush3.bf16.msra.mxu0 %v11670_v56  ;;  %10742 = vmatpush3.bf16.msra.mxu1 %v11671_v57  ;;  %v11674_v56 = vld [vmem:[%s15096_s3 + $0x38] sm:$0xff]  }
 0x2c3   : > { %v10450_v46 = vpop.f32.mrb[39].mxu0  ;;  %v10470_v17 = vpop.f32.mrb[39].mxu1  ;;  %10723 = vmatprep.subr.bf16.mxu0 %v15109_v0  ;;  %10743 = vmatprep.subr.bf16.mxu1 %v15109_v0  ;;  %v11675_v57 = vld [vmem:[%s15096_s3 + $0x78] sm:$0xff]  }
 0x2c4   : > { %v11676_v17 = vld [vmem:[%s15096_s3 + $0x80] sm:$0xff]   ;;  %v11679_v46 = vld [vmem:[%s15096_s3 + $0xc8] sm:$0xff]  }
 0x2c6   : > { %10724 = vmatpush3.bf16.msra.mxu0 %v11672_v42  ;;  %10744 = vmatpush3.bf16.msra.mxu1 %v11673_v41  ;;  %v11677_v41 = vld [vmem:[%s15096_s3 + $0xc0] sm:$0xff]   ;;  %v11678_v42 = vld [vmem:[%s15096_s3 + $0x88] sm:$0xff]  }
 0x2c7   : > { %10725 = vmatprep.subr.bf16.mxu0 %v15109_v0  ;;  %10745 = vmatprep.subr.bf16.mxu1 %v15109_v0 }
 0x2ca   : > { %10726 = vmatpush3.bf16.msra.mxu0 %v11674_v56  ;;  %10746 = vmatpush3.bf16.msra.mxu1 %v11675_v57  ;;  %v11680_v56 = vld [vmem:[%s15096_s3 + $0x90] sm:$0xff]  }
 0x2cb   : > { %10751 = vmatprep.subr.bf16.mxu0 %v15109_v0  ;;  %10771 = vmatprep.subr.bf16.mxu1 %v15109_v0  ;;  %v11681_v57 = vld [vmem:[%s15096_s3 + $0xd0] sm:$0xff]  }
 0x2cd   : > { %10728 = vmatmul.mubr.bf16.vlgmr.msra.gmra.mrb[64].mxu0 %v12279_v49  ;;  %10748 = vmatmul.mubr.bf16.vlgmr.msra.gmra.mrb[64].mxu1 %v12279_v49 }
 0x2ce   : > { %10752 = vmatpush3.bf16.msra.mxu0 %v11676_v17  ;;  %10772 = vmatpush3.bf16.msra.mxu1 %v11677_v41  ;;  %v11682_v17 = vld [vmem:[%s15096_s3 + $0x98] sm:$0xff]  }
 0x2cf   : > { %10753 = vmatprep.subr.bf16.mxu0 %v15109_v0  ;;  %10773 = vmatprep.subr.bf16.mxu1 %v15109_v0  ;;  %v11683_v41 = vld [vmem:[%s15096_s3 + $0xd8] sm:$0xff]  }
 0x2d0   : > { %10767 = vmatprep.mubr.msk.bf16.mxu0 %vm12047_vm0, %v15109_v0  ;;  %10787 = vmatprep.mubr.msk.bf16.mxu1 %vm12047_vm0, %v15109_v0 }
 0x2d2   : > { %10754 = vmatpush3.bf16.msra.mxu0 %v11678_v42  ;;  %10774 = vmatpush3.bf16.msra.mxu1 %v11679_v46  ;;  %v11684_v42 = vld [vmem:[%s15096_s3 + $0xa0] sm:$0xff]  }
 0x2d3   : > { %10755 = vmatprep.subr.bf16.mxu0 %v15109_v0  ;;  %10775 = vmatprep.subr.bf16.mxu1 %v15109_v0  ;;  %v11685_v46 = vld [vmem:[%s15096_s3 + $0xe0] sm:$0xff]  }
 0x2d6   : > { %10756 = vmatpush3.bf16.msra.mxu0 %v11680_v56  ;;  %10776 = vmatpush3.bf16.msra.mxu1 %v11681_v57  ;;  %v11686_v56 = vld [vmem:[%s15096_s3 + $0xa8] sm:$0xff]  }
 0x2d7   : > { %10757 = vmatprep.subr.bf16.mxu0 %v15109_v0  ;;  %10777 = vmatprep.subr.bf16.mxu1 %v15109_v0  ;;  %v11687_v57 = vld [vmem:[%s15096_s3 + $0xe8] sm:$0xff]  }
 0x2da   : > { %10758 = vmatpush3.bf16.msra.mxu0 %v11682_v17  ;;  %10778 = vmatpush3.bf16.msra.mxu1 %v11683_v41 }
 0x2db   : > { %10759 = vmatprep.subr.bf16.mxu0 %v15109_v0  ;;  %10779 = vmatprep.subr.bf16.mxu1 %v15109_v0 }
 0x2de   : > { %10760 = vmatpush3.bf16.msra.mxu0 %v11684_v42  ;;  %10780 = vmatpush3.bf16.msra.mxu1 %v11685_v46 }
 0x2df   : > { %10761 = vmatprep.subr.bf16.mxu0 %v15109_v0  ;;  %10781 = vmatprep.subr.bf16.mxu1 %v15109_v0 }
 0x2e0   : > { %v13567_v17 = vpop.f32.mrb[40].mxu0  ;;  %v13569_v41 = vpop.f32.mrb[40].mxu1 }
 0x2e1   : > { %v10489_v20 = vpop.f32.mrb[41].mxu0  ;;  %v10509_v19 = vpop.f32.mrb[41].mxu1 }
 0x2e2   : > { %v13571_v42 = vpop.f32.mrb[42].mxu0  ;;  %v13573_v46 = vpop.f32.mrb[42].mxu1  ;;  %10762 = vmatpush3.bf16.msra.mxu0 %v11686_v56  ;;  %10782 = vmatpush3.bf16.msra.mxu1 %v11687_v57  ;;  %v11690_v56 = vld [vmem:[%s15096_s3 + $0xb8] sm:$0xff]  }
 0x2e3   : > { %v10490_v20 = vpop.f32.mrb[43].mxu0  ;;  %v10510_v5 = vpop.f32.mrb[43].mxu1  ;;  %10763 = vmatprep.subr.bf16.mxu0 %v15109_v0  ;;  %10783 = vmatprep.subr.bf16.mxu1 %v15109_v0  ;;  %v11691_v57 = vld [vmem:[%s15096_s3 + $0xf8] sm:$0xff]  }
 0x2e4   : > { %v11692_v5 = vld [vmem:[%s15096_s3 + $0x100] sm:$0xff]   ;;  %v11695_v20 = vld [vmem:[%s15096_s3 + $0x148] sm:$0xff]  }
 0x2e6   : > { %10764 = vmatpush3.bf16.msra.mxu0 %v11688_v44  ;;  %10784 = vmatpush3.bf16.msra.mxu1 %v11689_v43  ;;  %v11693_v43 = vld [vmem:[%s15096_s3 + $0x140] sm:$0xff]   ;;  %v11694_v44 = vld [vmem:[%s15096_s3 + $0x108] sm:$0xff]  }
 0x2e7   : > { %10765 = vmatprep.subr.bf16.mxu0 %v15109_v0  ;;  %10785 = vmatprep.subr.bf16.mxu1 %v15109_v0 }
 0x2ea   : > { %10766 = vmatpush3.bf16.msra.mxu0 %v11690_v56  ;;  %10786 = vmatpush3.bf16.msra.mxu1 %v11691_v57  ;;  %v11696_v56 = vld [vmem:[%s15096_s3 + $0x110] sm:$0xff]  }
 0x2eb   : > { %10791 = vmatprep.subr.bf16.mxu0 %v15109_v0  ;;  %10811 = vmatprep.subr.bf16.mxu1 %v15109_v0  ;;  %v11697_v57 = vld [vmem:[%s15096_s3 + $0x150] sm:$0xff]  }
 0x2ed   : > { %10768 = vmatmul.mubr.bf16.vlgmr.msra.gmra.mrb[68].mxu0 %v12279_v49  ;;  %10788 = vmatmul.mubr.bf16.vlgmr.msra.gmra.mrb[68].mxu1 %v12279_v49 }
 0x2ee   : > { %10792 = vmatpush3.bf16.msra.mxu0 %v11692_v5  ;;  %10812 = vmatpush3.bf16.msra.mxu1 %v11693_v43  ;;  %v11698_v5 = vld [vmem:[%s15096_s3 + $0x118] sm:$0xff]  }
 0x2ef   : > { %10793 = vmatprep.subr.bf16.mxu0 %v15109_v0  ;;  %10813 = vmatprep.subr.bf16.mxu1 %v15109_v0  ;;  %v11699_v43 = vld [vmem:[%s15096_s3 + $0x158] sm:$0xff]  }
 0x2f0   : > { %10807 = vmatprep.mubr.msk.bf16.mxu0 %vm12047_vm0, %v15109_v0  ;;  %10827 = vmatprep.mubr.msk.bf16.mxu1 %vm12047_vm0, %v15109_v0 }
 0x2f2   : > { %10794 = vmatpush3.bf16.msra.mxu0 %v11694_v44  ;;  %10814 = vmatpush3.bf16.msra.mxu1 %v11695_v20  ;;  %v11700_v44 = vld [vmem:[%s15096_s3 + $0x120] sm:$0xff]  }
 0x2f3   : > { %10795 = vmatprep.subr.bf16.mxu0 %v15109_v0  ;;  %10815 = vmatprep.subr.bf16.mxu1 %v15109_v0  ;;  %v11701_v20 = vld [vmem:[%s15096_s3 + $0x160] sm:$0xff]  }
 0x2f6   : > { %10796 = vmatpush3.bf16.msra.mxu0 %v11696_v56  ;;  %10816 = vmatpush3.bf16.msra.mxu1 %v11697_v57  ;;  %v11702_v56 = vld [vmem:[%s15096_s3 + $0x128] sm:$0xff]  }
 0x2f7   : > { %10797 = vmatprep.subr.bf16.mxu0 %v15109_v0  ;;  %10817 = vmatprep.subr.bf16.mxu1 %v15109_v0  ;;  %v11703_v57 = vld [vmem:[%s15096_s3 + $0x168] sm:$0xff]  }
 0x2fa   : > { %10798 = vmatpush3.bf16.msra.mxu0 %v11698_v5  ;;  %10818 = vmatpush3.bf16.msra.mxu1 %v11699_v43 }
 0x2fb   : > { %10799 = vmatprep.subr.bf16.mxu0 %v15109_v0  ;;  %10819 = vmatprep.subr.bf16.mxu1 %v15109_v0 }
 0x2fe   : > { %10800 = vmatpush3.bf16.msra.mxu0 %v11700_v44  ;;  %10820 = vmatpush3.bf16.msra.mxu1 %v11701_v20 }
 0x2ff   : > { %10801 = vmatprep.subr.bf16.mxu0 %v15109_v0  ;;  %10821 = vmatprep.subr.bf16.mxu1 %v15109_v0 }
 0x300   : > { %v13649_v5 = vpop.f32.mrb[44].mxu0  ;;  %v13651_v43 = vpop.f32.mrb[44].mxu1 }
 0x301   : > { %v10529_v30 = vpop.f32.mrb[45].mxu0  ;;  %v10549_v29 = vpop.f32.mrb[45].mxu1 }
 0x302   : > { %v13653_v44 = vpop.f32.mrb[46].mxu0  ;;  %v13655_v20 = vpop.f32.mrb[46].mxu1  ;;  %10802 = vmatpush3.bf16.msra.mxu0 %v11702_v56  ;;  %10822 = vmatpush3.bf16.msra.mxu1 %v11703_v57  ;;  %v11706_v56 = vld [vmem:[%s15096_s3 + $0x138] sm:$0xff]  }
 0x303   : > { %v10530_v30 = vpop.f32.mrb[47].mxu0  ;;  %v10550_v6 = vpop.f32.mrb[47].mxu1  ;;  %10803 = vmatprep.subr.bf16.mxu0 %v15109_v0  ;;  %10823 = vmatprep.subr.bf16.mxu1 %v15109_v0  ;;  %v11707_v57 = vld [vmem:[%s15096_s3 + $0x178] sm:$0xff]  }
 0x304   : > { %v11708_v6 = vld [vmem:[%s15096_s3 + $0x180] sm:$0xff]   ;;  %v11711_v30 = vld [vmem:[%s15096_s3 + $0x1c8] sm:$0xff]  }
 0x306   : > { %10804 = vmatpush3.bf16.msra.mxu0 %v11704_v4  ;;  %10824 = vmatpush3.bf16.msra.mxu1 %v11705_v3  ;;  %v11709_v3 = vld [vmem:[%s15096_s3 + $0x1c0] sm:$0xff]   ;;  %v11710_v4 = vld [vmem:[%s15096_s3 + $0x188] sm:$0xff]  }
 0x307   : > { %10805 = vmatprep.subr.bf16.mxu0 %v15109_v0  ;;  %10825 = vmatprep.subr.bf16.mxu1 %v15109_v0 }
 0x30a   : > { %10806 = vmatpush3.bf16.msra.mxu0 %v11706_v56  ;;  %10826 = vmatpush3.bf16.msra.mxu1 %v11707_v57  ;;  %v11712_v56 = vld [vmem:[%s15096_s3 + $0x190] sm:$0xff]  }
 0x30b   : > { %10831 = vmatprep.subr.bf16.mxu0 %v15109_v0  ;;  %10851 = vmatprep.subr.bf16.mxu1 %v15109_v0  ;;  %v11713_v57 = vld [vmem:[%s15096_s3 + $0x1d0] sm:$0xff]  }
 0x30d   : > { %10808 = vmatmul.mubr.bf16.vlgmr.msra.gmra.mrb[72].mxu0 %v12279_v49  ;;  %10828 = vmatmul.mubr.bf16.vlgmr.msra.gmra.mrb[72].mxu1 %v12279_v49 }
 0x30e   : > { %10832 = vmatpush3.bf16.msra.mxu0 %v11708_v6  ;;  %10852 = vmatpush3.bf16.msra.mxu1 %v11709_v3  ;;  %v11714_v6 = vld [vmem:[%s15096_s3 + $0x198] sm:$0xff]  }
 0x30f   : > { %10833 = vmatprep.subr.bf16.mxu0 %v15109_v0  ;;  %10853 = vmatprep.subr.bf16.mxu1 %v15109_v0  ;;  %v11715_v3 = vld [vmem:[%s15096_s3 + $0x1d8] sm:$0xff]  }
 0x310   : > { %10847 = vmatprep.mubr.msk.bf16.mxu0 %vm12047_vm0, %v15109_v0  ;;  %10867 = vmatprep.mubr.msk.bf16.mxu1 %vm12047_vm0, %v15109_v0 }
 0x312   : > { %10834 = vmatpush3.bf16.msra.mxu0 %v11710_v4  ;;  %10854 = vmatpush3.bf16.msra.mxu1 %v11711_v30  ;;  %v11716_v4 = vld [vmem:[%s15096_s3 + $0x1a0] sm:$0xff]  }
 0x313   : > { %10835 = vmatprep.subr.bf16.mxu0 %v15109_v0  ;;  %10855 = vmatprep.subr.bf16.mxu1 %v15109_v0  ;;  %v11717_v30 = vld [vmem:[%s15096_s3 + $0x1e0] sm:$0xff]  }
 0x316   : > { %10836 = vmatpush3.bf16.msra.mxu0 %v11712_v56  ;;  %10856 = vmatpush3.bf16.msra.mxu1 %v11713_v57  ;;  %v11718_v56 = vld [vmem:[%s15096_s3 + $0x1a8] sm:$0xff]  }
 0x317   : > { %10837 = vmatprep.subr.bf16.mxu0 %v15109_v0  ;;  %10857 = vmatprep.subr.bf16.mxu1 %v15109_v0  ;;  %v11719_v57 = vld [vmem:[%s15096_s3 + $0x1e8] sm:$0xff]  }
 0x31a   : > { %10838 = vmatpush3.bf16.msra.mxu0 %v11714_v6  ;;  %10858 = vmatpush3.bf16.msra.mxu1 %v11715_v3 }
 0x31b   : > { %10839 = vmatprep.subr.bf16.mxu0 %v15109_v0  ;;  %10859 = vmatprep.subr.bf16.mxu1 %v15109_v0 }
 0x31e   : > { %10840 = vmatpush3.bf16.msra.mxu0 %v11716_v4  ;;  %10860 = vmatpush3.bf16.msra.mxu1 %v11717_v30 }
 0x31f   : > { %10841 = vmatprep.subr.bf16.mxu0 %v15109_v0  ;;  %10861 = vmatprep.subr.bf16.mxu1 %v15109_v0 }
 0x320   : > { %v13731_v6 = vpop.f32.mrb[48].mxu0  ;;  %v13733_v3 = vpop.f32.mrb[48].mxu1 }
 0x321   : > { %v10569_v29 = vpop.f32.mrb[49].mxu0  ;;  %v10589_v19 = vpop.f32.mrb[49].mxu1 }
 0x322   : > { %v13735_v4 = vpop.f32.mrb[50].mxu0  ;;  %v13737_v30 = vpop.f32.mrb[50].mxu1  ;;  %10842 = vmatpush3.bf16.msra.mxu0 %v11718_v56  ;;  %10862 = vmatpush3.bf16.msra.mxu1 %v11719_v57  ;;  %v11722_v56 = vld [vmem:[%s15096_s3 + $0x1b8] sm:$0xff]  }
 0x323   : > { %v10570_v29 = vpop.f32.mrb[51].mxu0  ;;  %v10590_v18 = vpop.f32.mrb[51].mxu1  ;;  %10843 = vmatprep.subr.bf16.mxu0 %v15109_v0  ;;  %10863 = vmatprep.subr.bf16.mxu1 %v15109_v0  ;;  %v11723_v57 = vld [vmem:[%s15096_s3 + $0x1f8] sm:$0xff]  }
 0x324   : > { %v11724_v18 = vld [vmem:[%s15096_s3 + $0x200] sm:$0xff]   ;;  %v11727_v29 = vld [vmem:[%s15096_s3 + $0x248] sm:$0xff]  }
 0x326   : > { %10844 = vmatpush3.bf16.msra.mxu0 %v11720_v40  ;;  %10864 = vmatpush3.bf16.msra.mxu1 %v11721_v39  ;;  %v11725_v39 = vld [vmem:[%s15096_s3 + $0x240] sm:$0xff]   ;;  %v11726_v40 = vld [vmem:[%s15096_s3 + $0x208] sm:$0xff]  }
 0x327   : > { %10845 = vmatprep.subr.bf16.mxu0 %v15109_v0  ;;  %10865 = vmatprep.subr.bf16.mxu1 %v15109_v0 }
 0x32a   : > { %10846 = vmatpush3.bf16.msra.mxu0 %v11722_v56  ;;  %10866 = vmatpush3.bf16.msra.mxu1 %v11723_v57  ;;  %v11728_v56 = vld [vmem:[%s15096_s3 + $0x210] sm:$0xff]  }
 0x32b   : > { %10871 = vmatprep.subr.bf16.mxu0 %v15109_v0  ;;  %10891 = vmatprep.subr.bf16.mxu1 %v15109_v0  ;;  %v11729_v57 = vld [vmem:[%s15096_s3 + $0x250] sm:$0xff]  }
 0x32d   : > { %10848 = vmatmul.mubr.bf16.vlgmr.msra.gmra.mrb[76].mxu0 %v12279_v49  ;;  %10868 = vmatmul.mubr.bf16.vlgmr.msra.gmra.mrb[76].mxu1 %v12279_v49 }
 0x32e   : > { %10872 = vmatpush3.bf16.msra.mxu0 %v11724_v18  ;;  %10892 = vmatpush3.bf16.msra.mxu1 %v11725_v39  ;;  %v11730_v18 = vld [vmem:[%s15096_s3 + $0x218] sm:$0xff]  }
 0x32f   : > { %10873 = vmatprep.subr.bf16.mxu0 %v15109_v0  ;;  %10893 = vmatprep.subr.bf16.mxu1 %v15109_v0  ;;  %v11731_v39 = vld [vmem:[%s15096_s3 + $0x258] sm:$0xff]  }
 0x330   : > { %10887 = vmatprep.mubr.msk.bf16.mxu0 %vm12047_vm0, %v15109_v0  ;;  %10907 = vmatprep.mubr.msk.bf16.mxu1 %vm12047_vm0, %v15109_v0 }
 0x332   : > { %10874 = vmatpush3.bf16.msra.mxu0 %v11726_v40  ;;  %10894 = vmatpush3.bf16.msra.mxu1 %v11727_v29  ;;  %v11732_v40 = vld [vmem:[%s15096_s3 + $0x220] sm:$0xff]  }
 0x333   : > { %10875 = vmatprep.subr.bf16.mxu0 %v15109_v0  ;;  %10895 = vmatprep.subr.bf16.mxu1 %v15109_v0  ;;  %v11733_v29 = vld [vmem:[%s15096_s3 + $0x260] sm:$0xff]  }
 0x336   : > { %10876 = vmatpush3.bf16.msra.mxu0 %v11728_v56  ;;  %10896 = vmatpush3.bf16.msra.mxu1 %v11729_v57  ;;  %v11734_v56 = vld [vmem:[%s15096_s3 + $0x228] sm:$0xff]  }
 0x337   : > { %10877 = vmatprep.subr.bf16.mxu0 %v15109_v0  ;;  %10897 = vmatprep.subr.bf16.mxu1 %v15109_v0  ;;  %v11735_v57 = vld [vmem:[%s15096_s3 + $0x268] sm:$0xff]  }
 0x33a   : > { %10878 = vmatpush3.bf16.msra.mxu0 %v11730_v18  ;;  %10898 = vmatpush3.bf16.msra.mxu1 %v11731_v39 }
 0x33b   : > { %10879 = vmatprep.subr.bf16.mxu0 %v15109_v0  ;;  %10899 = vmatprep.subr.bf16.mxu1 %v15109_v0 }
 0x33e   : > { %10880 = vmatpush3.bf16.msra.mxu0 %v11732_v40  ;;  %10900 = vmatpush3.bf16.msra.mxu1 %v11733_v29 }
 0x33f   : > { %10881 = vmatprep.subr.bf16.mxu0 %v15109_v0  ;;  %10901 = vmatprep.subr.bf16.mxu1 %v15109_v0 }
 0x340   : > { %v13813_v18 = vpop.f32.mrb[52].mxu0  ;;  %v13815_v39 = vpop.f32.mrb[52].mxu1 }
 0x341   : > { %v10609_v19 = vpop.f32.mrb[53].mxu0  ;;  %v10629_v45 = vpop.f32.mrb[53].mxu1 }
 0x342   : > { %v13817_v40 = vpop.f32.mrb[54].mxu0  ;;  %v13819_v29 = vpop.f32.mrb[54].mxu1  ;;  %10882 = vmatpush3.bf16.msra.mxu0 %v11734_v56  ;;  %10902 = vmatpush3.bf16.msra.mxu1 %v11735_v57  ;;  %v11738_v56 = vld [vmem:[%s15096_s3 + $0x238] sm:$0xff]  }
 0x343   : > { %v10610_v19 = vpop.f32.mrb[55].mxu0  ;;  %v10630_v8 = vpop.f32.mrb[55].mxu1  ;;  %10883 = vmatprep.subr.bf16.mxu0 %v15154_v24  ;;  %10903 = vmatprep.subr.bf16.mxu1 %v15154_v24  ;;  %v11739_v57 = vld [vmem:[%s15096_s3 + $0x278] sm:$0xff]  }
 0x344   : > { %v11740_v8 = vld [vmem:[%s15096_s3 + $0x280] sm:$0xff]   ;;  %v11743_v19 = vld [vmem:[%s15096_s3 + $0x2c8] sm:$0xff]  }
 0x346   : > { %10884 = vmatpush3.bf16.msra.mxu0 %v11736_v14  ;;  %10904 = vmatpush3.bf16.msra.mxu1 %v11737_v13  ;;  %v11741_v13 = vld [vmem:[%s15096_s3 + $0x2c0] sm:$0xff]   ;;  %v11742_v14 = vld [vmem:[%s15096_s3 + $0x288] sm:$0xff]  }
 0x347   : > { %10885 = vmatprep.subr.bf16.mxu0 %v15154_v24  ;;  %10905 = vmatprep.subr.bf16.mxu1 %v15154_v24 }
 0x34a   : > { %10886 = vmatpush3.bf16.msra.mxu0 %v11738_v56  ;;  %10906 = vmatpush3.bf16.msra.mxu1 %v11739_v57  ;;  %v11744_v56 = vld [vmem:[%s15096_s3 + $0x290] sm:$0xff]  }
 0x34b   : > { %10911 = vmatprep.subr.bf16.mxu0 %v15154_v24  ;;  %10931 = vmatprep.subr.bf16.mxu1 %v15154_v24  ;;  %v11745_v57 = vld [vmem:[%s15096_s3 + $0x2d0] sm:$0xff]  }
 0x34d   : > { %10888 = vmatmul.mubr.bf16.vlgmr.msra.gmra.mrb[80].mxu0 %v12279_v49  ;;  %10908 = vmatmul.mubr.bf16.vlgmr.msra.gmra.mrb[80].mxu1 %v12279_v49 }
 0x34e   : > { %10912 = vmatpush3.bf16.msra.mxu0 %v11740_v8  ;;  %10932 = vmatpush3.bf16.msra.mxu1 %v11741_v13  ;;  %v11746_v8 = vld [vmem:[%s15096_s3 + $0x298] sm:$0xff]  }
 0x34f   : > { %10913 = vmatprep.subr.bf16.mxu0 %v15154_v24  ;;  %10933 = vmatprep.subr.bf16.mxu1 %v15154_v24  ;;  %v11747_v13 = vld [vmem:[%s15096_s3 + $0x2d8] sm:$0xff]  }
 0x350   : > { %10927 = vmatprep.mubr.msk.bf16.mxu0 %vm12047_vm0, %v15154_v24  ;;  %10947 = vmatprep.mubr.msk.bf16.mxu1 %vm12047_vm0, %v15154_v24 }
 0x352   : > { %10914 = vmatpush3.bf16.msra.mxu0 %v11742_v14  ;;  %10934 = vmatpush3.bf16.msra.mxu1 %v11743_v19  ;;  %v11748_v14 = vld [vmem:[%s15096_s3 + $0x2a0] sm:$0xff]  }
 0x353   : > { %10915 = vmatprep.subr.bf16.mxu0 %v15154_v24  ;;  %10935 = vmatprep.subr.bf16.mxu1 %v15154_v24  ;;  %v11749_v19 = vld [vmem:[%s15096_s3 + $0x2e0] sm:$0xff]  }
 0x356   : > { %10916 = vmatpush3.bf16.msra.mxu0 %v11744_v56  ;;  %10936 = vmatpush3.bf16.msra.mxu1 %v11745_v57  ;;  %v11750_v56 = vld [vmem:[%s15096_s3 + $0x2a8] sm:$0xff]  }
 0x357   : > { %10917 = vmatprep.subr.bf16.mxu0 %v15154_v24  ;;  %10937 = vmatprep.subr.bf16.mxu1 %v15154_v24  ;;  %v11751_v57 = vld [vmem:[%s15096_s3 + $0x2e8] sm:$0xff]  }
 0x35a   : > { %10918 = vmatpush3.bf16.msra.mxu0 %v11746_v8  ;;  %10938 = vmatpush3.bf16.msra.mxu1 %v11747_v13 }
 0x35b   : > { %10919 = vmatprep.subr.bf16.mxu0 %v15154_v24  ;;  %10939 = vmatprep.subr.bf16.mxu1 %v15154_v24 }
 0x35e   : > { %10920 = vmatpush3.bf16.msra.mxu0 %v11748_v14  ;;  %10940 = vmatpush3.bf16.msra.mxu1 %v11749_v19 }
 0x35f   : > { %10921 = vmatprep.subr.bf16.mxu0 %v15154_v24  ;;  %10941 = vmatprep.subr.bf16.mxu1 %v15154_v24 }
 0x360   : > { %v13895_v8 = vpop.f32.mrb[56].mxu0  ;;  %v13897_v13 = vpop.f32.mrb[56].mxu1 }
 0x361   : > { %v10649_v45 = vpop.f32.mrb[57].mxu0  ;;  %v10669_v0 = vpop.f32.mrb[57].mxu1 }
 0x362   : > { %v13899_v14 = vpop.f32.mrb[58].mxu0  ;;  %v13901_v19 = vpop.f32.mrb[58].mxu1  ;;  %10922 = vmatpush3.bf16.msra.mxu0 %v11750_v56  ;;  %10942 = vmatpush3.bf16.msra.mxu1 %v11751_v57  ;;  %v11754_v56 = vld [vmem:[%s15096_s3 + $0x2b8] sm:$0xff]  }
 0x363   : > { %v10650_v45 = vpop.f32.mrb[59].mxu0  ;;  %v10670_v10 = vpop.f32.mrb[59].mxu1  ;;  %10923 = vmatprep.subr.bf16.mxu0 %v15154_v24  ;;  %10943 = vmatprep.subr.bf16.mxu1 %v15154_v24  ;;  %v11755_v57 = vld [vmem:[%s15096_s3 + $0x2f8] sm:$0xff]  }
 0x364   : > { %v11756_v10 = vld [vmem:[%s15096_s3 + $0x300] sm:$0xff]   ;;  %v11759_v45 = vld [vmem:[%s15096_s3 + $0x348] sm:$0xff]  }
 0x366   : > { %10924 = vmatpush3.bf16.msra.mxu0 %v11752_v7  ;;  %10944 = vmatpush3.bf16.msra.mxu1 %v11753_v23  ;;  %v11757_v7 = vld [vmem:[%s15096_s3 + $0x340] sm:$0xff]   ;;  %v11758_v23 = vld [vmem:[%s15096_s3 + $0x308] sm:$0xff]  }
 0x367   : > { %10925 = vmatprep.subr.bf16.mxu0 %v15154_v24  ;;  %10945 = vmatprep.subr.bf16.mxu1 %v15154_v24 }
 0x36a   : > { %10926 = vmatpush3.bf16.msra.mxu0 %v11754_v56  ;;  %10946 = vmatpush3.bf16.msra.mxu1 %v11755_v57  ;;  %v11760_v56 = vld [vmem:[%s15096_s3 + $0x310] sm:$0xff]  }
 0x36b   : > { %10951 = vmatprep.subr.bf16.mxu0 %v15154_v24  ;;  %10971 = vmatprep.subr.bf16.mxu1 %v15154_v24  ;;  %v11761_v57 = vld [vmem:[%s15096_s3 + $0x350] sm:$0xff]  }
 0x36d   : > { %10928 = vmatmul.mubr.bf16.vlgmr.msra.gmra.mrb[84].mxu0 %v12279_v49  ;;  %10948 = vmatmul.mubr.bf16.vlgmr.msra.gmra.mrb[84].mxu1 %v12279_v49 }
 0x36e   : > { %10952 = vmatpush3.bf16.msra.mxu0 %v11756_v10  ;;  %10972 = vmatpush3.bf16.msra.mxu1 %v11757_v7  ;;  %v11762_v10 = vld [vmem:[%s15096_s3 + $0x318] sm:$0xff]  }
 0x36f   : > { %10953 = vmatprep.subr.bf16.mxu0 %v15154_v24  ;;  %10973 = vmatprep.subr.bf16.mxu1 %v15154_v24  ;;  %v11763_v7 = vld [vmem:[%s15096_s3 + $0x358] sm:$0xff]  }
 0x370   : > { %10967 = vmatprep.mubr.msk.bf16.mxu0 %vm12047_vm0, %v15154_v24  ;;  %10987 = vmatprep.mubr.msk.bf16.mxu1 %vm12047_vm0, %v15154_v24 }
 0x372   : > { %10954 = vmatpush3.bf16.msra.mxu0 %v11758_v23  ;;  %10974 = vmatpush3.bf16.msra.mxu1 %v11759_v45  ;;  %v11764_v23 = vld [vmem:[%s15096_s3 + $0x320] sm:$0xff]  }
 0x373   : > { %10955 = vmatprep.subr.bf16.mxu0 %v15154_v24  ;;  %10975 = vmatprep.subr.bf16.mxu1 %v15154_v24  ;;  %v11765_v45 = vld [vmem:[%s15096_s3 + $0x360] sm:$0xff]  }
 0x376   : > { %10956 = vmatpush3.bf16.msra.mxu0 %v11760_v56  ;;  %10976 = vmatpush3.bf16.msra.mxu1 %v11761_v57  ;;  %v11766_v56 = vld [vmem:[%s15096_s3 + $0x328] sm:$0xff]  }
 0x377   : > { %10957 = vmatprep.subr.bf16.mxu0 %v15154_v24  ;;  %10977 = vmatprep.subr.bf16.mxu1 %v15154_v24  ;;  %v11767_v57 = vld [vmem:[%s15096_s3 + $0x368] sm:$0xff]  }
 0x37a   : > { %10958 = vmatpush3.bf16.msra.mxu0 %v11762_v10  ;;  %10978 = vmatpush3.bf16.msra.mxu1 %v11763_v7 }
 0x37b   : > { %10959 = vmatprep.subr.bf16.mxu0 %v15154_v24  ;;  %10979 = vmatprep.subr.bf16.mxu1 %v15154_v24 }
 0x37e   : > { %10960 = vmatpush3.bf16.msra.mxu0 %v11764_v23  ;;  %10980 = vmatpush3.bf16.msra.mxu1 %v11765_v45 }
 0x37f   : > { %10961 = vmatprep.subr.bf16.mxu0 %v15154_v24  ;;  %10981 = vmatprep.subr.bf16.mxu1 %v15154_v24 }
 0x380   : > { %v13977_v10 = vpop.f32.mrb[60].mxu0  ;;  %v13979_v7 = vpop.f32.mrb[60].mxu1 }
 0x381   : > { %15155 = vst [vmem:[#allocation17_spill] sm:$0xff] %v13977_v10  ;;  %15156 = vst [vmem:[#allocation18_spill] sm:$0xff] %v13979_v7  ;;  %v10689_v0 = vpop.f32.mrb[61].mxu0  ;;  %v10709_v2 = vpop.f32.mrb[61].mxu1  ;;  %v11784_v7 = vld [vmem:[%s15096_s3 + $0x3b0] sm:$0xff]  }
 0x382   : > { %v13981_v23 = vpop.f32.mrb[62].mxu0  ;;  %v13983_v45 = vpop.f32.mrb[62].mxu1  ;;  %10962 = vmatpush3.bf16.msra.mxu0 %v11766_v56  ;;  %10982 = vmatpush3.bf16.msra.mxu1 %v11767_v57  ;;  %v11770_v56 = vld [vmem:[%s15096_s3 + $0x338] sm:$0xff]  }
 0x383   : > { %15157 = vst [vmem:[#allocation19_spill] sm:$0xff] %v13981_v23  ;;  %15158 = vst [vmem:[#allocation20_spill] sm:$0xff] %v13983_v45  ;;  %v10690_v0 = vpop.f32.mrb[63].mxu0  ;;  %v10710_v16 = vpop.f32.mrb[63].mxu1  ;;  %10963 = vmatprep.subr.bf16.mxu0 %v15154_v24  ;;  %10983 = vmatprep.subr.bf16.mxu1 %v15154_v24  ;;  %v11771_v57 = vld [vmem:[%s15096_s3 + $0x378] sm:$0xff]   ;;  %v11785_v45 = vld [vmem:[%s15096_s3 + $0x3f0] sm:$0xff]  }
 0x384   : > { %v11772_v16 = vld [vmem:[%s15096_s3 + $0x380] sm:$0xff]   ;;  %v11775_v0 = vld [vmem:[%s15096_s3 + $0x3c8] sm:$0xff]  }
 0x386   : > { %10964 = vmatpush3.bf16.msra.mxu0 %v11768_v1  ;;  %10984 = vmatpush3.bf16.msra.mxu1 %v11769_v9  ;;  %v11773_v1 = vld [vmem:[%s15096_s3 + $0x3c0] sm:$0xff]   ;;  %v11774_v9 = vld [vmem:[%s15096_s3 + $0x388] sm:$0xff]  }
 0x387   : > { %10965 = vmatprep.subr.bf16.mxu0 %v15154_v24  ;;  %10985 = vmatprep.subr.bf16.mxu1 %v15154_v24 }
 0x38a   : > { %10966 = vmatpush3.bf16.msra.mxu0 %v11770_v56  ;;  %10986 = vmatpush3.bf16.msra.mxu1 %v11771_v57  ;;  %v11776_v56 = vld [vmem:[%s15096_s3 + $0x390] sm:$0xff]  }
 0x38b   : > { %10991 = vmatprep.subr.bf16.mxu0 %v15154_v24  ;;  %11011 = vmatprep.subr.bf16.mxu1 %v15154_v24  ;;  %v11777_v57 = vld [vmem:[%s15096_s3 + $0x3d0] sm:$0xff]  }
 0x38d   : > { %10968 = vmatmul.mubr.bf16.vlgmr.msra.gmra.mrb[88].mxu0 %v12279_v49  ;;  %10988 = vmatmul.mubr.bf16.vlgmr.msra.gmra.mrb[88].mxu1 %v12279_v49 }
 0x38e   : > { %10992 = vmatpush3.bf16.msra.mxu0 %v11772_v16  ;;  %11012 = vmatpush3.bf16.msra.mxu1 %v11773_v1  ;;  %v11778_v16 = vld [vmem:[%s15096_s3 + $0x398] sm:$0xff]  }
 0x38f   : > { %10993 = vmatprep.subr.bf16.mxu0 %v15154_v24  ;;  %11013 = vmatprep.subr.bf16.mxu1 %v15154_v24  ;;  %v11779_v1 = vld [vmem:[%s15096_s3 + $0x3d8] sm:$0xff]  }
 0x390   : > { %11007 = vmatprep.mubr.msk.bf16.mxu0 %vm12047_vm0, %v15154_v24  ;;  %11027 = vmatprep.mubr.msk.bf16.mxu1 %vm12047_vm0, %v15154_v24 }
 0x392   : > { %10994 = vmatpush3.bf16.msra.mxu0 %v11774_v9  ;;  %11014 = vmatpush3.bf16.msra.mxu1 %v11775_v0  ;;  %v11780_v9 = vld [vmem:[%s15096_s3 + $0x3a0] sm:$0xff]  }
 0x393   : > { %10995 = vmatprep.subr.bf16.mxu0 %v15154_v24  ;;  %11015 = vmatprep.subr.bf16.mxu1 %v15154_v24  ;;  %v11781_v0 = vld [vmem:[%s15096_s3 + $0x3e0] sm:$0xff]  }
 0x396   : > { %10996 = vmatpush3.bf16.msra.mxu0 %v11776_v56  ;;  %11016 = vmatpush3.bf16.msra.mxu1 %v11777_v57  ;;  %v11782_v56 = vld [vmem:[%s15096_s3 + $0x3a8] sm:$0xff]  }
 0x397   : > { %10997 = vmatprep.subr.bf16.mxu0 %v15154_v24  ;;  %11017 = vmatprep.subr.bf16.mxu1 %v15154_v24  ;;  %v11783_v57 = vld [vmem:[%s15096_s3 + $0x3e8] sm:$0xff]  }
 0x39a   : > { %10998 = vmatpush3.bf16.msra.mxu0 %v11778_v16  ;;  %11018 = vmatpush3.bf16.msra.mxu1 %v11779_v1 }
 0x39b   : > { %10999 = vmatprep.subr.bf16.mxu0 %v15154_v24  ;;  %11019 = vmatprep.subr.bf16.mxu1 %v15154_v24 }
 0x39e   : > { %11000 = vmatpush3.bf16.msra.mxu0 %v11780_v9  ;;  %11020 = vmatpush3.bf16.msra.mxu1 %v11781_v0 }
 0x39f   : > { %11001 = vmatprep.subr.bf16.mxu0 %v15154_v24  ;;  %11021 = vmatprep.subr.bf16.mxu1 %v15154_v24 }
 0x3a0   : > { %v14059_v16 = vpop.f32.mrb[64].mxu0  ;;  %v14061_v1 = vpop.f32.mrb[64].mxu1 }
 0x3a1   : > { %v10729_v2 = vpop.f32.mrb[65].mxu0  ;;  %v10749_v12 = vpop.f32.mrb[65].mxu1 }
 0x3a2   : > { %v14063_v9 = vpop.f32.mrb[66].mxu0  ;;  %v14065_v0 = vpop.f32.mrb[66].mxu1  ;;  %11002 = vmatpush3.bf16.msra.mxu0 %v11782_v56  ;;  %11022 = vmatpush3.bf16.msra.mxu1 %v11783_v57  ;;  %v11786_v56 = vld [vmem:[%s15096_s3 + $0x3b8] sm:$0xff]  }
 0x3a3   : > { %v5586_v10 = vpack.c.bf16 %v14063_v9, %v14059_v16  ;;  %v5587_v12 = vpack.c.bf16 %v14065_v0, %v14061_v1  ;;  %v10730_v2 = vpop.f32.mrb[67].mxu0  ;;  %v10750_v23 = vpop.f32.mrb[67].mxu1  ;;  %11003 = vmatprep.subr.bf16.mxu0 %v15154_v24  ;;  %11023 = vmatprep.subr.bf16.mxu1 %v15154_v24  ;;  %v11787_v57 = vld [vmem:[%s15096_s3 + $0x3f8] sm:$0xff]  }
 0x3a6   : > { %11004 = vmatpush3.bf16.msra.mxu0 %v11784_v7  ;;  %11024 = vmatpush3.bf16.msra.mxu1 %v11785_v45  ;;  %v15159_v7 = vpack.c.bf16 %v13407_v52, %v13403_v47  ;;  %v15160_v45 = vpack.c.bf16 %v13409_v53, %v13405_v48  ;;  %v15162_v47 = vpack.c.bf16 %v13491_v51, %v13487_v34 }
 0x3a7   : > { %11005 = vmatprep.subr.bf16.mxu0 %v15154_v24  ;;  %11025 = vmatprep.subr.bf16.mxu1 %v15154_v24  ;;  %v15163_v48 = vpack.c.bf16 %v12751_v35, %v12747_v31  ;;  %v15164_v53 = vpack.c.bf16 %v12753_v36, %v12749_v32  ;;  %v15165_v36 = vpack.c.bf16 %v13571_v42, %v13567_v17 }
 0x3a8   : > { %v5632_v23 = vsel %vm5627_vm1, %v15159_v7, 0  ;;  %v5679_v2 = vsel %vm5627_vm1, %v15160_v45, 0  ;;  %v5773_v52 = vsel %vm5627_vm1, %v15162_v47, 0  ;;  %v15168_v45 = vpack.c.bf16 %v12835_v63, %v12831_v59 }
 0x3a9   : > { %v5820_v34 = vsel %vm5627_vm1, %v15165_v36, 0 }
 0x3aa   : > { %11006 = vmatpush3.bf16.msra.mxu0 %v11786_v56  ;;  %11026 = vmatpush3.bf16.msra.mxu1 %v11787_v57 }
 0x3ab   : > { %11031 = vmatprep.subr.bf16.mxu0 %v15154_v24  ;;  %11037 = vmatprep.subr.bf16.mxu1 %v15154_v24 }
 0x3ad   : > { %11008 = vmatmul.mubr.bf16.vlgmr.msra.gmra.mrb[92].mxu0 %v12279_v49  ;;  %11028 = vmatmul.mubr.bf16.vlgmr.msra.gmra.mrb[92].mxu1 %v12279_v49  ;;  %v15161_v49 = vpack.c.bf16 %v13489_v50, %v13485_v33  ;;  %v15166_v50 = vpack.c.bf16 %v13573_v46, %v13569_v41 }
 0x3ae   : > { %11033 = vmatprep.mubr.msk.bf16.mxu0 %vm12047_vm0, %v15154_v24  ;;  %11039 = vmatprep.mubr.msk.bf16.mxu1 %vm12047_vm0, %v15154_v24 }
 0x3af   : > { %v5726_v56 = vsel %vm5627_vm1, %v15161_v49, 0  ;;  %v5867_v51 = vsel %vm5627_vm1, %v15166_v50, 0  ;;  %v15172_v49 = vpack.c.bf16 %v12917_v26, %v12913_v22  ;;  %v15174_v22 = vpack.c.bf16 %v13737_v30, %v13733_v3  ;;  %v15194_v50 = vld [vmem:[#allocation9_spill] sm:$0xff] }
 0x3b1   : > { %v6055_v26 = vsel %vm5627_vm1, %v15174_v22, 0 }
 0x3b3   : > { %11032 = vmatpush3.bf16.xpose.msra.mxu0 %v5632_v23  ;;  %11038 = vmatpush3.bf16.xpose.msra.mxu1 %v5679_v2  ;;  %v15167_v23 = vpack.c.bf16 %v12833_v62, %v12829_v58  ;;  %v15169_v58 = vpack.c.bf16 %v13653_v44, %v13649_v5  ;;  %v15170_v62 = vpack.c.bf16 %v13655_v20, %v13651_v43 }
 0x3b4   : > { %11043 = vmatprep.subr.bf16.mxu0 %v15154_v24  ;;  %11049 = vmatprep.subr.bf16.mxu1 %v15154_v24  ;;  %v15171_v2 = vpack.c.bf16 %v12915_v25, %v12911_v21  ;;  %v15173_v21 = vpack.c.bf16 %v13735_v4, %v13731_v6  ;;  %v15175_v5 = vpack.c.bf16 %v12997_v60, %v12993_v54 }
 0x3b5   : > { %v5914_v59 = vsel %vm5627_vm1, %v15169_v58, 0  ;;  %v5961_v63 = vsel %vm5627_vm1, %v15170_v62, 0  ;;  %v15176_v43 = vpack.c.bf16 %v12999_v61, %v12995_v55  ;;  %v15177_v54 = vpack.c.bf16 %v13817_v40, %v13813_v18  ;;  %v15200_v58 = vld [vmem:[#allocation13_spill] sm:$0xff]  ;;  %v15202_v62 = vld [vmem:[#allocation16_spill] sm:$0xff] }
 0x3b6   : > { %v6008_v25 = vsel %vm5627_vm1, %v15173_v21, 0  ;;  %v15178_v55 = vpack.c.bf16 %v13819_v29, %v13815_v39  ;;  %v15179_v44 = vpack.c.bf16 %v13079_v37, %v13075_v27  ;;  %v15180_v20 = vpack.c.bf16 %v13081_v38, %v13077_v28  ;;  %v15184_v29 = vld [vmem:[#allocation8_spill] sm:$0xff] }
 0x3b7   : > { %v6102_v60 = vsel %vm5627_vm1, %v15177_v54, 0  ;;  %v15181_v38 = vpack.c.bf16 %v13899_v14, %v13895_v8  ;;  %v15182_v4 = vpack.c.bf16 %v13901_v19, %v13897_v13  ;;  %v15183_v40 = vpack.c.bf16 %v13161_v15, %v13157_v11  ;;  %v15187_v11 = vld [vmem:[#allocation19_spill] sm:$0xff]  ;;  %v15188_v15 = vld [vmem:[#allocation17_spill] sm:$0xff] }
 0x3b8   : > { %v6149_v61 = vsel %vm5627_vm1, %v15178_v55, 0 }
 0x3b9   : > { %v6196_v3 = vsel %vm5627_vm1, %v15181_v38, 0  ;;  %v6243_v30 = vsel %vm5627_vm1, %v15182_v4, 0 }
 0x3ba   : > { %11034 = vmatmul.mubr.msk.bf16.vlgmr.msra.gmra.mrb[96].mxu0 %vm5627_vm1, %v15163_v48  ;;  %11040 = vmatmul.mubr.msk.bf16.vlgmr.msra.gmra.mrb[96].mxu1 %vm5627_vm1, %v15164_v53  ;;  %v15190_v53 = vld [vmem:[#allocation20_spill] sm:$0xff] }
 0x3bb   : > { %11044 = vmatpush3.bf16.xpose.msra.mxu0 %v5726_v56  ;;  %11050 = vmatpush3.bf16.xpose.msra.mxu1 %v5773_v52  ;;  %v15185_v56 = vld [vmem:[#allocation7_spill] sm:$0xff]  ;;  %v15189_v52 = vpack.c.bf16 %v15187_v11, %v15188_v15 }
 0x3bc   : > { %11045 = vmatprep.mubr.msk.bf16.mxu0 %vm12047_vm0, %v15154_v24  ;;  %11051 = vmatprep.mubr.msk.bf16.mxu1 %vm12047_vm0, %v15154_v24  ;;  %v15186_v47 = vpack.c.bf16 %v15184_v29, %v15185_v56 }
 0x3bd   : > { %11055 = vmatprep.subr.bf16.mxu0 %v15154_v24  ;;  %11061 = vmatprep.subr.bf16.mxu1 %v15154_v24  ;;  %v6290_v48 = vsel %vm5627_vm1, %v15189_v52, 0 }
 0x3c0   : > { %v14127_v31 = vpop.f32.mrb[68].mxu0  ;;  %v14129_v35 = vpop.f32.mrb[68].mxu1 }
 0x3c1   : > { %v10769_v33 = vpop.f32.mrb[69].mxu0  ;;  %v10789_v32 = vpop.f32.mrb[69].mxu1 }
 0x3c2   : > { %v14139_v57 = vpop.f32.mrb[70].mxu0  ;;  %v14141_v7 = vpop.f32.mrb[70].mxu1  ;;  %11046 = vmatmul.mubr.msk.bf16.vlgmr.msra.gmra.mrb[100].mxu0 %vm5627_vm1, %v15167_v23  ;;  %11052 = vmatmul.mubr.msk.bf16.vlgmr.msra.gmra.mrb[100].mxu1 %vm5627_vm1, %v15168_v45  ;;  %v15191_v33 = vld [vmem:[#allocation18_spill] sm:$0xff]  ;;  %v15196_v23 = vld [vmem:[#allocation12_spill] sm:$0xff] }
 0x3c3   : > { %v10770_v42 = vpop.f32.mrb[71].mxu0  ;;  %v10790_v46 = vpop.f32.mrb[71].mxu1  ;;  %11056 = vmatpush3.bf16.xpose.msra.mxu0 %v5820_v34  ;;  %11062 = vmatpush3.bf16.xpose.msra.mxu1 %v5867_v51  ;;  %v15192_v32 = vpack.c.bf16 %v15190_v53, %v15191_v33  ;;  %v15193_v34 = vld [vmem:[#allocation11_spill] sm:$0xff]  ;;  %v15197_v45 = vld [vmem:[#allocation10_spill] sm:$0xff] }
 0x3c4   : > { %11057 = vmatprep.mubr.msk.bf16.mxu0 %vm12047_vm0, %v15154_v24  ;;  %11063 = vmatprep.mubr.msk.bf16.mxu1 %vm12047_vm0, %v15154_v24  ;;  %v15195_v51 = vpack.c.bf16 %v15193_v34, %v15194_v50  ;;  %v15198_v42 = vpack.c.bf16 %v15196_v23, %v15197_v45  ;;  %v15199_v46 = vld [vmem:[#allocation15_spill] sm:$0xff]  ;;  %v5602_v23 = vlaneseq }
 0x3c5   : > { %11067 = vmatprep.subr.bf16.mxu0 %v15154_v24  ;;  %11073 = vmatprep.subr.bf16.mxu1 %v15154_v24  ;;  %v6337_v36 = vsel %vm5627_vm1, %v15192_v32, 0 }
 0x3ca   : > { %11058 = vmatmul.mubr.msk.bf16.vlgmr.msra.gmra.mrb[104].mxu0 %vm5627_vm1, %v15171_v2  ;;  %11064 = vmatmul.mubr.msk.bf16.vlgmr.msra.gmra.mrb[104].mxu1 %vm5627_vm1, %v15172_v49 }
 0x3cb   : > { %11068 = vmatpush3.bf16.xpose.msra.mxu0 %v5914_v59  ;;  %11074 = vmatpush3.bf16.xpose.msra.mxu1 %v5961_v63  ;;  %v15201_v59 = vpack.c.bf16 %v15199_v46, %v15200_v58  ;;  %v15203_v63 = vld [vmem:[#allocation14_spill] sm:$0xff] }
 0x3cc   : > { %11069 = vmatprep.mubr.msk.bf16.mxu0 %vm12047_vm0, %v15154_v24  ;;  %11075 = vmatprep.mubr.msk.bf16.mxu1 %vm12047_vm0, %v15154_v24  ;;  %v15204_v2 = vpack.c.bf16 %v15202_v62, %v15203_v63 }
 0x3cd   : > { %11079 = vmatprep.subr.bf16.mxu0 %v15154_v24  ;;  %11085 = vmatprep.subr.bf16.mxu1 %v15154_v24 }
 0x3d2   : > { %11070 = vmatmul.mubr.msk.bf16.vlgmr.msra.gmra.mrb[108].mxu0 %vm5627_vm1, %v15175_v5  ;;  %11076 = vmatmul.mubr.msk.bf16.vlgmr.msra.gmra.mrb[108].mxu1 %vm5627_vm1, %v15176_v43 }
 0x3d3   : > { %11080 = vmatpush3.bf16.xpose.msra.mxu0 %v6008_v25  ;;  %11086 = vmatpush3.bf16.xpose.msra.mxu1 %v6055_v26 }
 0x3d4   : > { %11081 = vmatprep.mubr.msk.bf16.mxu0 %vm12047_vm0, %v15154_v24  ;;  %11087 = vmatprep.mubr.msk.bf16.mxu1 %vm12047_vm0, %v15154_v24 }
 0x3d5   : > { %11091 = vmatprep.subr.bf16.mxu0 %v15154_v24  ;;  %11097 = vmatprep.subr.bf16.mxu1 %v15154_v24 }
 0x3da   : > { %11082 = vmatmul.mubr.msk.bf16.vlgmr.msra.gmra.mrb[112].mxu0 %vm5627_vm1, %v15179_v44  ;;  %11088 = vmatmul.mubr.msk.bf16.vlgmr.msra.gmra.mrb[112].mxu1 %vm5627_vm1, %v15180_v20 }
 0x3db   : > { %11092 = vmatpush3.bf16.xpose.msra.mxu0 %v6102_v60  ;;  %11098 = vmatpush3.bf16.xpose.msra.mxu1 %v6149_v61 }
 0x3dc   : > { %11093 = vmatprep.mubr.msk.bf16.mxu0 %vm12047_vm0, %v15154_v24  ;;  %11099 = vmatprep.mubr.msk.bf16.mxu1 %vm12047_vm0, %v15154_v24 }
 0x3dd   : > { %11103 = vmatprep.subr.bf16.mxu0 %v15154_v24  ;;  %11109 = vmatprep.subr.bf16.mxu1 %v15154_v24 }
 0x3e0   : > { %v14227_v27 = vpop.f32.mrb[72].mxu0  ;;  %v14229_v37 = vpop.f32.mrb[72].mxu1 }
 0x3e1   : > { %v10809_v6 = vpop.f32.mrb[73].mxu0  ;;  %v10829_v28 = vpop.f32.mrb[73].mxu1 }
 0x3e2   : > { %v14239_v18 = vpop.f32.mrb[74].mxu0  ;;  %v14241_v39 = vpop.f32.mrb[74].mxu1  ;;  %11094 = vmatmul.mubr.msk.bf16.vlgmr.msra.gmra.mrb[116].mxu0 %vm5627_vm1, %v15183_v40  ;;  %11100 = vmatmul.mubr.msk.bf16.vlgmr.msra.gmra.mrb[116].mxu1 %vm5627_vm1, %v15186_v47 }
 0x3e3   : > { %v10810_v14 = vpop.f32.mrb[75].mxu0  ;;  %v10830_v19 = vpop.f32.mrb[75].mxu1  ;;  %11104 = vmatpush3.bf16.xpose.msra.mxu0 %v6196_v3  ;;  %11110 = vmatpush3.bf16.xpose.msra.mxu1 %v6243_v30 }
 0x3e4   : > { %11105 = vmatprep.mubr.msk.bf16.mxu0 %vm12047_vm0, %v15154_v24  ;;  %11111 = vmatprep.mubr.msk.bf16.mxu1 %vm12047_vm0, %v15154_v24 }
 0x3e5   : > { %11115 = vmatprep.subr.bf16.mxu0 %v15154_v24  ;;  %11121 = vmatprep.subr.bf16.mxu1 %v15154_v24 }
 0x3ea   : > { %11106 = vmatmul.mubr.msk.bf16.vlgmr.msra.gmra.mrb[120].mxu0 %vm5627_vm1, %v15195_v51  ;;  %11112 = vmatmul.mubr.msk.bf16.vlgmr.msra.gmra.mrb[120].mxu1 %vm5627_vm1, %v15198_v42 }
 0x3eb   : > { %11116 = vmatpush3.bf16.xpose.msra.mxu0 %v6290_v48  ;;  %11122 = vmatpush3.bf16.xpose.msra.mxu1 %v6337_v36 }
 0x3ec   : > { %11117 = vmatprep.mubr.msk.bf16.mxu0 %vm12047_vm0, %v15154_v24  ;;  %11123 = vmatprep.mubr.msk.bf16.mxu1 %vm12047_vm0, %v15154_v24 }
 0x3ed   : > { %11127 = vmatprep.subr.bf16.mxu0 %v15154_v24  ;;  %11133 = vmatprep.subr.bf16.mxu1 %v15154_v24 }
 0x3f2   : > { %11118 = vmatmul.mubr.msk.bf16.vlgmr.msra.gmra.mrb[124].mxu0 %vm5627_vm1, %v15201_v59  ;;  %11124 = vmatmul.mubr.msk.bf16.vlgmr.msra.gmra.mrb[124].mxu1 %vm5627_vm1, %v15204_v2 }
 0x3f3   : > { %11128 = vmatpush3.bf16.msra.mxu0 %v5586_v10  ;;  %11134 = vmatpush3.bf16.msra.mxu1 %v5587_v12 }
 0x3f4   : > { %11129 = vmatprep.mubr.msk.bf16.mxu0 %vm12047_vm0, %v15154_v24  ;;  %11139 = vmatprep.subr.bf16.mxu0 %v15154_v24 }
 0x3f5   : > { %11135 = vmatprep.mubr.msk.bf16.mxu1 %vm12047_vm0, %v15154_v24  ;;  %11145 = vmatprep.subr.bf16.mxu1 %v15154_v24 }
 0x400   : > { %v14303_v49 = vpop.f32.mrb[76].mxu0  ;;  %v14305_v21 = vpop.f32.mrb[76].mxu1 }
 0x401   : > { %v10849_v16 = vpop.f32.mrb[77].mxu0  ;;  %v10869_v10 = vpop.f32.mrb[77].mxu1 }
 0x402   : > { %v14307_v9 = vpop.f32.mrb[78].mxu0  ;;  %v14309_v1 = vpop.f32.mrb[78].mxu1  ;;  %v14363_v16 = vshrl.u32 %v5602_v23, 7  ;;  %v5606_v10 = vand.u32 127, %v5602_v23 }
 0x403   : > { %v10850_v25 = vpop.f32.mrb[79].mxu0  ;;  %v10870_v22 = vpop.f32.mrb[79].mxu1 }
 0x404   : > { %15215 = vst [vmem:[#allocation15_spill] sm:$0xff] %v14363_v16  ;;  %v5604_v25 = vadd.s32 8, %v14363_v16  ;;  %vm5607_vm2 = vcmp.le.s32.totalorder %v5606_v10, %v14363_v16 }
 0x406   : > { %vm5608_vm3 = vcmp.le.s32.totalorder %v5606_v10, %v5604_v25 }
 0x420   : > { %v14315_v26 = vpop.f32.mrb[80].mxu0  ;;  %v14317_v5 = vpop.f32.mrb[80].mxu1 }
 0x421   : > { %v10889_v43 = vpop.f32.mrb[81].mxu0  ;;  %v10909_v54 = vpop.f32.mrb[81].mxu1 }
 0x422   : > { %v14319_v60 = vpop.f32.mrb[82].mxu0  ;;  %v14321_v55 = vpop.f32.mrb[82].mxu1  ;;  %v12048_v54 = vmov -1e+30  }
 0x423   : > { %v10890_v20 = vpop.f32.mrb[83].mxu0  ;;  %v10910_v6 = vpop.f32.mrb[83].mxu1 }
 0x424   : > { %v14367_v20 = vsel %vm5607_vm2, 0.0, %v12048_v54 }
 0x440   : > { %v14327_v28 = vpop.f32.mrb[84].mxu0  ;;  %v14329_v38 = vpop.f32.mrb[84].mxu1 }
 0x441   : > { %15205 = vst [vmem:[#allocation8_spill] sm:$0xff] %v14329_v38  ;;  %v10929_v3 = vpop.f32.mrb[85].mxu0  ;;  %v10949_v4 = vpop.f32.mrb[85].mxu1 }
 0x442   : > { %v14331_v30 = vpop.f32.mrb[86].mxu0  ;;  %v14333_v40 = vpop.f32.mrb[86].mxu1 }
 0x443   : > { %15206 = vst [vmem:[#allocation7_spill] sm:$0xff] %v14333_v40  ;;  %v10930_v47 = vpop.f32.mrb[87].mxu0  ;;  %v10950_v14 = vpop.f32.mrb[87].mxu1 }
 0x460   : > { %v14339_v19 = vpop.f32.mrb[88].mxu0  ;;  %v14341_v11 = vpop.f32.mrb[88].mxu1 }
 0x461   : > { %15207 = vst [vmem:[#allocation19_spill] sm:$0xff] %v14339_v19  ;;  %15208 = vst [vmem:[#allocation17_spill] sm:$0xff] %v14341_v11  ;;  %v10969_v15 = vpop.f32.mrb[89].mxu0  ;;  %v10989_v52 = vpop.f32.mrb[89].mxu1 }
 0x462   : > { %v14343_v48 = vpop.f32.mrb[90].mxu0  ;;  %v14345_v53 = vpop.f32.mrb[90].mxu1  ;;  %v14369_v52 = vsel %vm5608_vm3, 0.0, %v12048_v54 }
 0x463   : > { %15209 = vst [vmem:[#allocation20_spill] sm:$0xff] %v14343_v48  ;;  %15210 = vst [vmem:[#allocation18_spill] sm:$0xff] %v14345_v53  ;;  %v10970_v36 = vpop.f32.mrb[91].mxu0  ;;  %v10990_v34 = vpop.f32.mrb[91].mxu1 }
 0x480   : > { %v14351_v50 = vpop.f32.mrb[92].mxu0  ;;  %v14353_v51 = vpop.f32.mrb[92].mxu1 }
 0x481   : > { %15211 = vst [vmem:[#allocation11_spill] sm:$0xff] %v14351_v50  ;;  %15212 = vst [vmem:[#allocation9_spill] sm:$0xff] %v14353_v51  ;;  %v11009_v45 = vpop.f32.mrb[93].mxu0  ;;  %v11029_v42 = vpop.f32.mrb[93].mxu1 }
 0x482   : > { %v14355_v46 = vpop.f32.mrb[94].mxu0  ;;  %v14357_v58 = vpop.f32.mrb[94].mxu1 }
 0x483   : > { %15213 = vst [vmem:[#allocation12_spill] sm:$0xff] %v14355_v46  ;;  %15214 = vst [vmem:[#allocation10_spill] sm:$0xff] %v14357_v58  ;;  %v11010_v63 = vpop.f32.mrb[95].mxu0  ;;  %v11030_v2 = vpop.f32.mrb[95].mxu1 }
 0x48d   : > { %v5668_v22 = vpop.f32.mrb[96].mxu0  ;;  %v5715_v43 = vpop.f32.mrb[96].mxu1 }
 0x48e   : > { %v6380_v6 = vmul.f32 0.10910895, %v5668_v22  ;;  %v6382_v3 = vmul.f32 0.10910895, %v5715_v43  ;;  %v11035_v4 = vpop.f32.mrb[97].mxu0  ;;  %v11041_v47 = vpop.f32.mrb[97].mxu1 }
 0x48f   : > { %v5671_v14 = vpop.f32.mrb[98].mxu0  ;;  %v5718_v15 = vpop.f32.mrb[98].mxu1 }
 0x490   : > { %v6381_v36 = vmul.f32 0.10910895, %v5671_v14  ;;  %v6383_v34 = vmul.f32 0.10910895, %v5718_v15  ;;  %v11036_v23 = vpop.f32.mrb[99].mxu0  ;;  %v11042_v45 = vpop.f32.mrb[99].mxu1  ;;  %v14372_v42 = vadd.f32 %v6380_v6, %v14367_v20  ;;  %v14375_v63 = vadd.f32 %v6382_v3, %v14367_v20 }
 0x492   : > { %v6445_v2 = vsel %vm6444_vm4, %v14372_v42, -inf  ;;  %v14380_v10 = vadd.f32 %v6381_v36, %v14369_v52  ;;  %v14383_v25 = vadd.f32 %v6383_v34, %v14369_v52  ;;  %v6451_v6 = vsel %vm6444_vm4, %v14375_v63, -inf }
 0x493   : > { %6446 = vmax.xlane.f32.xlu0 %v6445_v2 }
 0x494   : > { %v6448_v22 = vsel %vm6444_vm4, %v14380_v10, -inf  ;;  %v6454_v34 = vsel %vm6444_vm4, %v14383_v25, -inf }
 0x495   : > { %v5809_v43 = vpop.f32.mrb[100].mxu1  ;;  %6449 = vmax.xlane.f32.xlu1 %v6448_v22  ;;  %v5762_v54 = vpop.f32.mrb[100].mxu0 }
 0x496   : > { %v6386_v3 = vmul.f32 0.10910895, %v5809_v43  ;;  %v6384_v4 = vmul.f32 0.10910895, %v5762_v54  ;;  %v11047_v47 = vpop.f32.mrb[101].mxu0  ;;  %v11053_v14 = vpop.f32.mrb[101].mxu1 }
 0x497   : > { %v5812_v15 = vpop.f32.mrb[102].mxu1  ;;  %6452 = vmax.xlane.f32.xlu0 %v6451_v6  ;;  %v5765_v36 = vpop.f32.mrb[102].mxu0 }
 0x498   : > { %v6387_v23 = vmul.f32 0.10910895, %v5812_v15  ;;  %v6385_v45 = vmul.f32 0.10910895, %v5765_v36  ;;  %v11048_v2 = vpop.f32.mrb[103].mxu0  ;;  %v11054_v62 = vpop.f32.mrb[103].mxu1  ;;  %v14392_v22 = vadd.f32 %v6384_v4, %v14367_v20  ;;  %v14395_v59 = vadd.f32 %v6386_v3, %v14367_v20 }
 0x499   : > { %6455 = vmax.xlane.f32.xlu1 %v6454_v34 }
 0x49a   : > { %v6457_v43 = vsel %vm6444_vm4, %v14392_v22, -inf  ;;  %v14400_v54 = vadd.f32 %v6385_v45, %v14369_v52  ;;  %v14403_v6 = vadd.f32 %v6387_v23, %v14369_v52  ;;  %v6463_v3 = vsel %vm6444_vm4, %v14395_v59, -inf }
 0x49b   : > { %6458 = vmax.xlane.f32.xlu0 %v6457_v43 }
 0x49c   : > { %v6460_v62 = vsel %vm6444_vm4, %v14400_v54, -inf  ;;  %v6466_v23 = vsel %vm6444_vm4, %v14403_v6, -inf }
 0x49d   : > { %v5903_v47 = vpop.f32.mrb[104].mxu1  ;;  %6461 = vmax.xlane.f32.xlu1 %v6460_v62  ;;  %v5856_v4 = vpop.f32.mrb[104].mxu0 }
 0x49e   : > { %v6390_v14 = vmul.f32 0.10910895, %v5903_v47  ;;  %v6388_v15 = vmul.f32 0.10910895, %v5856_v4  ;;  %v11059_v36 = vpop.f32.mrb[105].mxu0  ;;  %v11065_v34 = vpop.f32.mrb[105].mxu1 }
 0x49f   : > { %v5906_v2 = vpop.f32.mrb[106].mxu1  ;;  %6464 = vmax.xlane.f32.xlu0 %v6463_v3  ;;  %v5859_v45 = vpop.f32.mrb[106].mxu0 }
 0x4a0   : > { %v6391_v43 = vmul.f32 0.10910895, %v5906_v2  ;;  %v6389_v32 = vmul.f32 0.10910895, %v5859_v45  ;;  %v11060_v33 = vpop.f32.mrb[107].mxu0  ;;  %v11066_v56 = vpop.f32.mrb[107].mxu1  ;;  %v14412_v62 = vadd.f32 %v6388_v15, %v14367_v20  ;;  %v14415_v29 = vadd.f32 %v6390_v14, %v14367_v20 }
 0x4a1   : > { %6467 = vmax.xlane.f32.xlu1 %v6466_v23 }
 0x4a2   : > { %v6469_v47 = vsel %vm6444_vm4, %v14412_v62, -inf  ;;  %v14420_v4 = vadd.f32 %v6389_v32, %v14369_v52  ;;  %v14423_v3 = vadd.f32 %v6391_v43, %v14369_v52  ;;  %v6475_v14 = vsel %vm6444_vm4, %v14415_v29, -inf }
 0x4a3   : > { %6470 = vmax.xlane.f32.xlu0 %v6469_v47 }
 0x4a4   : > { %v6472_v56 = vsel %vm6444_vm4, %v14420_v4, -inf  ;;  %v6478_v43 = vsel %vm6444_vm4, %v14423_v3, -inf }
 0x4a5   : > { %v5997_v33 = vpop.f32.mrb[108].mxu1  ;;  %6473 = vmax.xlane.f32.xlu1 %v6472_v56  ;;  %v5950_v15 = vpop.f32.mrb[108].mxu0 }
 0x4a6   : > { %v6394_v36 = vmul.f32 0.10910895, %v5997_v33  ;;  %v6392_v34 = vmul.f32 0.10910895, %v5950_v15  ;;  %v11071_v2 = vpop.f32.mrb[109].mxu0  ;;  %v11077_v45 = vpop.f32.mrb[109].mxu1 }
 0x4a7   : > { %v6000_v23 = vpop.f32.mrb[110].mxu1  ;;  %6476 = vmax.xlane.f32.xlu0 %v6475_v14  ;;  %v5953_v32 = vpop.f32.mrb[110].mxu0 }
 0x4a8   : > { %v6395_v47 = vmul.f32 0.10910895, %v6000_v23  ;;  %v6393_v44 = vmul.f32 0.10910895, %v5953_v32  ;;  %v11072_v61 = vpop.f32.mrb[111].mxu0  ;;  %v11078_v12 = vpop.f32.mrb[111].mxu1  ;;  %v14432_v56 = vadd.f32 %v6392_v34, %v14367_v20  ;;  %v14435_v0 = vadd.f32 %v6394_v36, %v14367_v20 }
 0x4a9   : > { %6479 = vmax.xlane.f32.xlu1 %v6478_v43 }
 0x4aa   : > { %v6481_v33 = vsel %vm6444_vm4, %v14432_v56, -inf  ;;  %v14440_v15 = vadd.f32 %v6393_v44, %v14369_v52  ;;  %v14443_v14 = vadd.f32 %v6395_v47, %v14369_v52  ;;  %v6487_v36 = vsel %vm6444_vm4, %v14435_v0, -inf }
 0x4ab   : > { %6482 = vmax.xlane.f32.xlu0 %v6481_v33 }
 0x4ac   : > { %v6484_v12 = vsel %vm6444_vm4, %v14440_v15, -inf  ;;  %v6490_v47 = vsel %vm6444_vm4, %v14443_v14, -inf }
 0x4ad   : > { %v6091_v61 = vpop.f32.mrb[112].mxu1  ;;  %6485 = vmax.xlane.f32.xlu1 %v6484_v12  ;;  %v6044_v34 = vpop.f32.mrb[112].mxu0 }
 0x4ae   : > { %v6398_v2 = vmul.f32 0.10910895, %v6091_v61  ;;  %v6396_v45 = vmul.f32 0.10910895, %v6044_v34  ;;  %v11083_v23 = vpop.f32.mrb[113].mxu0  ;;  %v11089_v32 = vpop.f32.mrb[113].mxu1 }
 0x4af   : > { %v6094_v43 = vpop.f32.mrb[114].mxu1  ;;  %6488 = vmax.xlane.f32.xlu0 %v6487_v36  ;;  %v6047_v44 = vpop.f32.mrb[114].mxu0 }
 0x4b0   : > { %v6399_v33 = vmul.f32 0.10910895, %v6094_v43  ;;  %v6397_v13 = vmul.f32 0.10910895, %v6047_v44  ;;  %v11084_v8 = vpop.f32.mrb[115].mxu0  ;;  %v11090_v41 = vpop.f32.mrb[115].mxu1  ;;  %v14452_v12 = vadd.f32 %v6396_v45, %v14367_v20  ;;  %v14455_v17 = vadd.f32 %v6398_v2, %v14367_v20 }
 0x4b1   : > { %6491 = vmax.xlane.f32.xlu1 %v6490_v47 }
 0x4b2   : > { %v6493_v61 = vsel %vm6444_vm4, %v14452_v12, -inf  ;;  %v14460_v34 = vadd.f32 %v6397_v13, %v14369_v52  ;;  %v14463_v36 = vadd.f32 %v6399_v33, %v14369_v52  ;;  %v6499_v2 = vsel %vm6444_vm4, %v14455_v17, -inf }
 0x4b3   : > { %6494 = vmax.xlane.f32.xlu0 %v6493_v61 }
 0x4b4   : > { %v6496_v41 = vsel %vm6444_vm4, %v14460_v34, -inf  ;;  %v6502_v33 = vsel %vm6444_vm4, %v14463_v36, -inf }
 0x4b5   : > { %v6185_v8 = vpop.f32.mrb[116].mxu1  ;;  %6497 = vmax.xlane.f32.xlu1 %v6496_v41  ;;  %v6138_v45 = vpop.f32.mrb[116].mxu0 }
 0x4b6   : > { %v6402_v23 = vmul.f32 0.10910895, %v6185_v8  ;;  %v6400_v32 = vmul.f32 0.10910895, %v6138_v45  ;;  %v11095_v43 = vpop.f32.mrb[117].mxu0  ;;  %v11101_v44 = vpop.f32.mrb[117].mxu1 }
 0x4b7   : > { %v6188_v47 = vpop.f32.mrb[118].mxu1  ;;  %6500 = vmax.xlane.f32.xlu0 %v6499_v2  ;;  %v6141_v13 = vpop.f32.mrb[118].mxu0 }
 0x4b8   : > { %v6403_v61 = vmul.f32 0.10910895, %v6188_v47  ;;  %v6401_v16 = vmul.f32 0.10910895, %v6141_v13  ;;  %v11096_v51 = vpop.f32.mrb[119].mxu0  ;;  %v11102_v58 = vpop.f32.mrb[119].mxu1  ;;  %v14472_v41 = vadd.f32 %v6400_v32, %v14367_v20  ;;  %v14475_v50 = vadd.f32 %v6402_v23, %v14367_v20 }
 0x4b9   : > { %6503 = vmax.xlane.f32.xlu1 %v6502_v33 }
 0x4ba   : > { %v6505_v8 = vsel %vm6444_vm4, %v14472_v41, -inf  ;;  %v14480_v45 = vadd.f32 %v6401_v16, %v14369_v52  ;;  %v14483_v2 = vadd.f32 %v6403_v61, %v14369_v52  ;;  %v6511_v23 = vsel %vm6444_vm4, %v14475_v50, -inf }
 0x4bb   : > { %6506 = vmax.xlane.f32.xlu0 %v6505_v8 }
 0x4bc   : > { %v6508_v51 = vsel %vm6444_vm4, %v14480_v45, -inf  ;;  %v6514_v61 = vsel %vm6444_vm4, %v14483_v2, -inf }
 0x4bd   : > { %v6279_v58 = vpop.f32.mrb[120].mxu1  ;;  %6509 = vmax.xlane.f32.xlu1 %v6508_v51  ;;  %v6232_v32 = vpop.f32.mrb[120].mxu0 }
 0x4be   : > { %v6406_v43 = vmul.f32 0.10910895, %v6279_v58  ;;  %v6404_v44 = vmul.f32 0.10910895, %v6232_v32  ;;  %v11107_v47 = vpop.f32.mrb[121].mxu0  ;;  %v11113_v13 = vpop.f32.mrb[121].mxu1 }
 0x4bf   : > { %v6282_v33 = vpop.f32.mrb[122].mxu1  ;;  %6512 = vmax.xlane.f32.xlu0 %v6511_v23  ;;  %v6235_v16 = vpop.f32.mrb[122].mxu0 }
 0x4c0   : > { %v6407_v8 = vmul.f32 0.10910895, %v6282_v33  ;;  %v6405_v46 = vmul.f32 0.10910895, %v6235_v16  ;;  %v11108_v11 = vpop.f32.mrb[123].mxu0  ;;  %v11114_v53 = vpop.f32.mrb[123].mxu1  ;;  %v14492_v51 = vadd.f32 %v6404_v44, %v14367_v20  ;;  %v14495_v19 = vadd.f32 %v6406_v43, %v14367_v20 }
 0x4c1   : > { %6515 = vmax.xlane.f32.xlu1 %v6514_v61 }
 0x4c2   : > { %v6517_v58 = vsel %vm6444_vm4, %v14492_v51, -inf  ;;  %v14500_v32 = vadd.f32 %v6405_v46, %v14369_v52  ;;  %v14503_v23 = vadd.f32 %v6407_v8, %v14369_v52  ;;  %v6523_v43 = vsel %vm6444_vm4, %v14495_v19, -inf }
 0x4c3   : > { %6518 = vmax.xlane.f32.xlu0 %v6517_v58 }
 0x4c4   : > { %v6520_v11 = vsel %vm6444_vm4, %v14500_v32, -inf  ;;  %v6526_v8 = vsel %vm6444_vm4, %v14503_v23, -inf }
 0x4c5   : > { %v6373_v53 = vpop.f32.mrb[124].mxu1  ;;  %6521 = vmax.xlane.f32.xlu1 %v6520_v11  ;;  %v6326_v44 = vpop.f32.mrb[124].mxu0 }
 0x4c6   : > { %v6410_v47 = vmul.f32 0.10910895, %v6373_v53  ;;  %v6408_v13 = vmul.f32 0.10910895, %v6326_v44  ;;  %v11119_v33 = vpop.f32.mrb[125].mxu0  ;;  %v11125_v16 = vpop.f32.mrb[125].mxu1 }
 0x4c7   : > { %v6376_v61 = vpop.f32.mrb[126].mxu1  ;;  %6524 = vmax.xlane.f32.xlu0 %v6523_v43  ;;  %v6329_v46 = vpop.f32.mrb[126].mxu0 }
 0x4c8   : > { %v6411_v58 = vmul.f32 0.10910895, %v6376_v61  ;;  %v6409_v48 = vmul.f32 0.10910895, %v6329_v46  ;;  %v11120_v38 = vpop.f32.mrb[127].mxu0  ;;  %v11126_v40 = vpop.f32.mrb[127].mxu1  ;;  %v14512_v11 = vadd.f32 %v6408_v13, %v14367_v20  ;;  %v14520_v43 = vadd.f32 %v6410_v47, %v14367_v20 }
 0x4c9   : > { %6527 = vmax.xlane.f32.xlu1 %v6526_v8 }
 0x4ca   : > { %v6529_v53 = vsel %vm6444_vm4, %v14512_v11, -inf  ;;  %v14517_v44 = vadd.f32 %v6409_v48, %v14369_v52  ;;  %v14525_v38 = vadd.f32 %v6411_v58, %v14369_v52  ;;  %v6535_v40 = vsel %vm6444_vm4, %v14520_v43, -inf }
 0x4cb   : > { %6530 = vmax.xlane.f32.xlu0 %v6529_v53 }
 0x4cc   : > { %v6532_v33 = vsel %vm6444_vm4, %v14517_v44, -inf  ;;  %15216 = vst [vmem:[#allocation13_spill] sm:$0xff] %v14525_v38  ;;  %v6538_v13 = vsel %vm6444_vm4, %v14525_v38, -inf }
 0x4cd   : > { %6533 = vmax.xlane.f32.xlu1 %v6532_v33 }
 0x4cf   : > { %6536 = vmax.xlane.f32.xlu0 %v6535_v40 }
 0x4d1   : > { %6539 = vmax.xlane.f32.xlu1 %v6538_v13 }
 0x520   : > { %v6447_v48 = vpop.xlane.xlu0 %6446 }
 0x521   : > { %v6541_v20 = vsub.f32 %v14372_v42, %v6447_v48 }
 0x522   : > { %v6450_v47 = vpop.xlane.xlu1 %6449 }
 0x523   : > { %v6573_v16 = vmul.f32 1.442695, %v6541_v20  ;;  %v6542_v61 = vsub.f32 %v14380_v10, %v6450_v47 }
 0x524   : > { %v6453_v46 = vpop.xlane.xlu0 %6452 }
 0x525   : > { %11848 = vpow2.f32 %v6573_v16  ;;  %v6575_v52 = vmul.f32 1.442695, %v6542_v61  ;;  %v6543_v8 = vsub.f32 %v14375_v63, %v6453_v46 }
 0x526   : > { %v6456_v58 = vpop.xlane.xlu1 %6455 }
 0x527   : > { %11850 = vpow2.f32 %v6575_v52  ;;  %v6577_v53 = vmul.f32 1.442695, %v6543_v8  ;;  %v6544_v33 = vsub.f32 %v14383_v25, %v6456_v58 }
 0x528   : > { %v6459_v40 = vpop.xlane.xlu0 %6458 }
 0x529   : > { %11852 = vpow2.f32 %v6577_v53  ;;  %v6579_v13 = vmul.f32 1.442695, %v6544_v33  ;;  %v6545_v38 = vsub.f32 %v14392_v22, %v6459_v40 }
 0x52a   : > { %v6462_v42 = vpop.xlane.xlu1 %6461 }
 0x52b   : > { %11854 = vpow2.f32 %v6579_v13  ;;  %v6581_v48 = vmul.f32 1.442695, %v6545_v38  ;;  %v6546_v10 = vsub.f32 %v14400_v54, %v6462_v42 }
 0x52c   : > { %v6465_v20 = vpop.xlane.xlu0 %6464 }
 0x52d   : > { %11856 = vpow2.f32 %v6581_v48  ;;  %v6583_v47 = vmul.f32 1.442695, %v6546_v10  ;;  %v6547_v63 = vsub.f32 %v14395_v59, %v6465_v20 }
 0x52e   : > { %v6468_v16 = vpop.xlane.xlu1 %6467 }
 0x52f   : > { %v11849_v61 = vpop.eup %11848  ;;  %11858 = vpow2.f32 %v6583_v47  ;;  %v6585_v46 = vmul.f32 1.442695, %v6547_v63  ;;  %v6548_v25 = vsub.f32 %v14403_v6, %v6468_v16 }
 0x530   : > { %v6471_v52 = vpop.xlane.xlu0 %6470  ;;  %v6637_v8 = vsel %vm6444_vm4, %v11849_v61, 0.0 }
 0x531   : > { %v11851_v22 = vpop.eup %11850  ;;  %11860 = vpow2.f32 %v6585_v46  ;;  %v6587_v58 = vmul.f32 1.442695, %v6548_v25  ;;  %v6549_v38 = vsub.f32 %v14412_v62, %v6471_v52  ;;  %6638 = vadd.xlane.f32.xlu0 %v6637_v8  ;;  %v15217_v62 = vpack.c.bf16 %v14139_v57, %v14127_v31 }
 0x532   : > { %v6474_v54 = vpop.xlane.xlu1 %6473  ;;  %v6640_v53 = vsel %vm6444_vm4, %v11851_v22, 0.0  ;;  %v6733_v33 = vpack.c.bf16 %v11851_v22, %v11849_v61  ;;  %v15218_v52 = vpack.c.bf16 %v14141_v7, %v14129_v35 }
 0x533   : > { %v11853_v59 = vpop.eup %11852  ;;  %11862 = vpow2.f32 %v6587_v58  ;;  %v6589_v40 = vmul.f32 1.442695, %v6549_v38  ;;  %v6550_v13 = vsub.f32 %v14420_v4, %v6474_v54  ;;  %6641 = vadd.xlane.f32.xlu1 %v6640_v53 }
 0x534   : > { %11130 = vmatmul.mubr.msk.bf16.vlgmr.msra.gmra.mrb[128].mxu0 %vm6444_vm4, %v6733_v33  ;;  %v6477_v6 = vpop.xlane.xlu0 %6476  ;;  %v6643_v42 = vsel %vm6444_vm4, %v11853_v59, 0.0 }
 0x535   : > { %v11855_v48 = vpop.eup %11854  ;;  %11864 = vpow2.f32 %v6589_v40  ;;  %v6591_v10 = vmul.f32 1.442695, %v6550_v13  ;;  %11140 = vmatpush3.bf16.msra.mxu0 %v15217_v62  ;;  %v6551_v20 = vsub.f32 %v14415_v29, %v6477_v6  ;;  %6644 = vadd.xlane.f32.xlu0 %v6643_v42 }
 0x536   : > { %v6480_v47 = vpop.xlane.xlu1 %6479  ;;  %v6646_v63 = vsel %vm6444_vm4, %v11855_v48, 0.0  ;;  %v6734_v4 = vpack.c.bf16 %v11855_v48, %v11853_v59  ;;  %11141 = vmatprep.mubr.msk.bf16.mxu0 %vm12047_vm0, %v15154_v24  ;;  %11151 = vmatprep.subr.bf16.mxu0 %v15154_v24  ;;  %v15219_v59 = vpack.c.bf16 %v14239_v18, %v14227_v27 }
 0x537   : > { %v11857_v16 = vpop.eup %11856  ;;  %11866 = vpow2.f32 %v6591_v10  ;;  %v6593_v61 = vmul.f32 1.442695, %v6551_v20  ;;  %v6552_v46 = vsub.f32 %v14423_v3, %v6480_v47  ;;  %6647 = vadd.xlane.f32.xlu1 %v6646_v63  ;;  %v15220_v20 = vpack.c.bf16 %v14241_v39, %v14229_v37 }
 0x538   : > { %11136 = vmatmul.mubr.msk.bf16.vlgmr.msra.gmra.mrb[128].mxu1 %vm6444_vm4, %v6734_v4  ;;  %v6483_v31 = vpop.xlane.xlu0 %6482  ;;  %v6649_v57 = vsel %vm6444_vm4, %v11857_v16, 0.0 }
 0x539   : > { %v11859_v29 = vpop.eup %11858  ;;  %11868 = vpow2.f32 %v6593_v61  ;;  %v6595_v25 = vmul.f32 1.442695, %v6552_v46  ;;  %11146 = vmatpush3.bf16.msra.mxu1 %v15218_v52  ;;  %v6553_v8 = vsub.f32 %v14432_v56, %v6483_v31  ;;  %6650 = vadd.xlane.f32.xlu0 %v6649_v57  ;;  %v15221_v57 = vpack.c.bf16 %v14307_v9, %v14303_v49 }
 0x53a   : > { %v6486_v22 = vpop.xlane.xlu1 %6485  ;;  %v6652_v58 = vsel %vm6444_vm4, %v11859_v29, 0.0  ;;  %v6735_v3 = vpack.c.bf16 %v11859_v29, %v11857_v16  ;;  %11147 = vmatprep.mubr.msk.bf16.mxu1 %vm12047_vm0, %v15154_v24  ;;  %11157 = vmatprep.subr.bf16.mxu1 %v15154_v24 }
 0x53b   : > { %v11861_v38 = vpop.eup %11860  ;;  %11870 = vpow2.f32 %v6595_v25  ;;  %v6597_v54 = vmul.f32 1.442695, %v6553_v8  ;;  %v6554_v53 = vsub.f32 %v14440_v15, %v6486_v22  ;;  %6653 = vadd.xlane.f32.xlu1 %v6652_v58 }
 0x53c   : > { %11142 = vmatmul.mubr.msk.bf16.vlgmr.msra.gmra.mrb[132].mxu0 %vm6444_vm4, %v6735_v3  ;;  %v6489_v35 = vpop.xlane.xlu0 %6488  ;;  %v6655_v7 = vsel %vm6444_vm4, %v11861_v38, 0.0 }
 0x53d   : > { %v11863_v56 = vpop.eup %11862  ;;  %11872 = vpow2.f32 %v6597_v54  ;;  %v6599_v33 = vmul.f32 1.442695, %v6554_v53  ;;  %11152 = vmatpush3.bf16.msra.mxu0 %v15219_v59  ;;  %v6555_v40 = vsub.f32 %v14435_v0, %v6489_v35  ;;  %6656 = vadd.xlane.f32.xlu0 %v6655_v7 }
 0x53e   : > { %v6492_v13 = vpop.xlane.xlu1 %6491  ;;  %v6658_v6 = vsel %vm6444_vm4, %v11863_v56, 0.0  ;;  %v6736_v15 = vpack.c.bf16 %v11863_v56, %v11861_v38  ;;  %11153 = vmatprep.mubr.msk.bf16.mxu0 %vm12047_vm0, %v15154_v24  ;;  %11163 = vmatprep.subr.bf16.mxu0 %v15154_v24  ;;  %v15222_v38 = vpack.c.bf16 %v14309_v1, %v14305_v21 }
 0x53f   : > { %v11865_v42 = vpop.eup %11864  ;;  %11874 = vpow2.f32 %v6599_v33  ;;  %v6601_v48 = vmul.f32 1.442695, %v6555_v40  ;;  %v6556_v10 = vsub.f32 %v14443_v14, %v6492_v13  ;;  %6659 = vadd.xlane.f32.xlu1 %v6658_v6  ;;  %v15223_v40 = vpack.c.bf16 %v14319_v60, %v14315_v26 }
 0x540   : > { %11148 = vmatmul.mubr.msk.bf16.vlgmr.msra.gmra.mrb[132].mxu1 %vm6444_vm4, %v6736_v15  ;;  %v6495_v27 = vpop.xlane.xlu0 %6494  ;;  %v6661_v18 = vsel %vm6444_vm4, %v11865_v42, 0.0 }
 0x541   : > { %v11867_v0 = vpop.eup %11866  ;;  %11876 = vpow2.f32 %v6601_v48  ;;  %v6603_v62 = vmul.f32 1.442695, %v6556_v10  ;;  %11158 = vmatpush3.bf16.msra.mxu1 %v15220_v20  ;;  %v6557_v47 = vsub.f32 %v14452_v12, %v6495_v27  ;;  %6662 = vadd.xlane.f32.xlu0 %v6661_v18  ;;  %v15224_v18 = vpack.c.bf16 %v14321_v55, %v14317_v5 }
 0x542   : > { %v6498_v63 = vpop.xlane.xlu1 %6497  ;;  %v6664_v4 = vsel %vm6444_vm4, %v11867_v0, 0.0  ;;  %v6737_v14 = vpack.c.bf16 %v11867_v0, %v11865_v42  ;;  %11159 = vmatprep.mubr.msk.bf16.mxu1 %vm12047_vm0, %v15154_v24  ;;  %11169 = vmatprep.subr.bf16.mxu1 %v15154_v24 }
 0x543   : > { %v11869_v16 = vpop.eup %11868  ;;  %11878 = vpow2.f32 %v6603_v62  ;;  %v6605_v61 = vmul.f32 1.442695, %v6557_v47  ;;  %v6558_v46 = vsub.f32 %v14460_v34, %v6498_v63  ;;  %6665 = vadd.xlane.f32.xlu1 %v6664_v4 }
 0x544   : > { %11154 = vmatmul.mubr.msk.bf16.vlgmr.msra.gmra.mrb[136].mxu0 %vm6444_vm4, %v6737_v14  ;;  %v6501_v37 = vpop.xlane.xlu0 %6500  ;;  %v6667_v39 = vsel %vm6444_vm4, %v11869_v16, 0.0 }
 0x545   : > { %v11871_v12 = vpop.eup %11870  ;;  %11880 = vpow2.f32 %v6605_v61  ;;  %v6607_v31 = vmul.f32 1.442695, %v6558_v46  ;;  %11164 = vmatpush3.bf16.msra.mxu0 %v15221_v57  ;;  %v6559_v29 = vsub.f32 %v14455_v17, %v6501_v37  ;;  %6668 = vadd.xlane.f32.xlu0 %v6667_v39 }
 0x546   : > { %v6504_v25 = vpop.xlane.xlu1 %6503  ;;  %v6670_v52 = vsel %vm6444_vm4, %v11871_v12, 0.0  ;;  %v6738_v34 = vpack.c.bf16 %v11871_v12, %v11869_v16  ;;  %11165 = vmatprep.mubr.msk.bf16.mxu0 %vm12047_vm0, %v15154_v24  ;;  %11175 = vmatprep.subr.bf16.mxu0 %v15154_v24  ;;  %v15225_v16 = vpack.c.bf16 %v14331_v30, %v14327_v28 }
 0x547   : > { %v11873_v8 = vpop.eup %11872  ;;  %11882 = vpow2.f32 %v6607_v31  ;;  %v6609_v22 = vmul.f32 1.442695, %v6559_v29  ;;  %v6560_v58 = vsub.f32 %v14463_v36, %v6504_v25  ;;  %6671 = vadd.xlane.f32.xlu1 %v6670_v52  ;;  %v15226_v29 = vld [vmem:[#allocation7_spill] sm:$0xff]  ;;  %v15227_v25 = vld [vmem:[#allocation8_spill] sm:$0xff] }
 0x548   : > { %11160 = vmatmul.mubr.msk.bf16.vlgmr.msra.gmra.mrb[136].mxu1 %vm6444_vm4, %v6738_v34  ;;  %v6507_v49 = vpop.xlane.xlu0 %6506  ;;  %v6673_v17 = vsel %vm6444_vm4, %v11873_v8, 0.0  ;;  %v15228_v52 = vpack.c.bf16 %v15226_v29, %v15227_v25 }
 0x549   : > { %v11875_v9 = vpop.eup %11874  ;;  %11884 = vpow2.f32 %v6609_v22  ;;  %v6611_v3 = vmul.f32 1.442695, %v6560_v58  ;;  %11170 = vmatpush3.bf16.msra.mxu1 %v15222_v38  ;;  %v6561_v54 = vsub.f32 %v14472_v41, %v6507_v49  ;;  %6674 = vadd.xlane.f32.xlu0 %v6673_v17 }
 0x54a   : > { %v6510_v53 = vpop.xlane.xlu1 %6509  ;;  %v6676_v35 = vsel %vm6444_vm4, %v11875_v9, 0.0  ;;  %v6739_v36 = vpack.c.bf16 %v11875_v9, %v11873_v8  ;;  %11171 = vmatprep.mubr.msk.bf16.mxu1 %vm12047_vm0, %v15154_v24  ;;  %11181 = vmatprep.subr.bf16.mxu1 %v15154_v24 }
 0x54b   : > { %v11877_v7 = vpop.eup %11876  ;;  %11886 = vpow2.f32 %v6611_v3  ;;  %v6613_v56 = vmul.f32 1.442695, %v6561_v54  ;;  %v6562_v33 = vsub.f32 %v14480_v45, %v6510_v53  ;;  %6677 = vadd.xlane.f32.xlu1 %v6676_v35  ;;  %v15229_v54 = vld [vmem:[#allocation20_spill] sm:$0xff]  ;;  %v15230_v53 = vld [vmem:[#allocation19_spill] sm:$0xff] }
 0x54c   : > { %11166 = vmatmul.mubr.msk.bf16.vlgmr.msra.gmra.mrb[140].mxu0 %vm6444_vm4, %v6739_v36  ;;  %v6513_v21 = vpop.xlane.xlu0 %6512  ;;  %v6679_v1 = vsel %vm6444_vm4, %v11877_v7, 0.0  ;;  %v15231_v35 = vpack.c.bf16 %v15229_v54, %v15230_v53 }
 0x54d   : > { %v11879_v41 = vpop.eup %11878  ;;  %11888 = vpow2.f32 %v6613_v56  ;;  %v6615_v59 = vmul.f32 1.442695, %v6562_v33  ;;  %11176 = vmatpush3.bf16.msra.mxu0 %v15223_v40  ;;  %v6563_v13 = vsub.f32 %v14475_v50, %v6513_v21  ;;  %6680 = vadd.xlane.f32.xlu0 %v6679_v1  ;;  %v15232_v1 = vld [vmem:[#allocation13_spill] sm:$0xff] }
 0x54e   : > { %v6516_v6 = vpop.xlane.xlu1 %6515  ;;  %v6682_v15 = vsel %vm6444_vm4, %v11879_v41, 0.0  ;;  %v6740_v45 = vpack.c.bf16 %v11879_v41, %v11877_v7  ;;  %11177 = vmatprep.mubr.msk.bf16.mxu0 %vm12047_vm0, %v15154_v24  ;;  %11187 = vmatprep.subr.bf16.mxu0 %v15154_v24 }
 0x54f   : > { %v11881_v42 = vpop.eup %11880  ;;  %11890 = vpow2.f32 %v6615_v59  ;;  %v6617_v48 = vmul.f32 1.442695, %v6563_v13  ;;  %v6564_v10 = vsub.f32 %v14483_v2, %v6516_v6  ;;  %6683 = vadd.xlane.f32.xlu1 %v6682_v15  ;;  %v15233_v13 = vld [vmem:[#allocation18_spill] sm:$0xff]  ;;  %v15234_v6 = vld [vmem:[#allocation17_spill] sm:$0xff] }
 0x550   : > { %11172 = vmatmul.mubr.msk.bf16.vlgmr.msra.gmra.mrb[140].mxu1 %vm6444_vm4, %v6740_v45  ;;  %v6519_v26 = vpop.xlane.xlu0 %6518  ;;  %v6685_v60 = vsel %vm6444_vm4, %v11881_v42, 0.0  ;;  %v15235_v15 = vpack.c.bf16 %v15233_v13, %v15234_v6  ;;  %v5614_v13 = vld [vmem:[%s15097_s4 + $0xc] sm:$0xf] }
 0x551   : > { %v11883_v50 = vpop.eup %11882  ;;  %11892 = vpow2.f32 %v6617_v48  ;;  %v6619_v27 = vmul.f32 1.442695, %v6564_v10  ;;  %11182 = vmatpush3.bf16.msra.mxu1 %v15224_v18  ;;  %v6565_v0 = vsub.f32 %v14492_v51, %v6519_v26  ;;  %6686 = vadd.xlane.f32.xlu0 %v6685_v60  ;;  %v15236_v60 = vld [vmem:[#allocation12_spill] sm:$0xff] }
 0x552   : > { %v6522_v62 = vpop.xlane.xlu1 %6521  ;;  %v6688_v20 = vsel %vm6444_vm4, %v11883_v50, 0.0  ;;  %v6741_v2 = vpack.c.bf16 %v11883_v50, %v11881_v42  ;;  %11183 = vmatprep.mubr.msk.bf16.mxu1 %vm12047_vm0, %v15154_v24  ;;  %11193 = vmatprep.subr.bf16.mxu1 %v15154_v24  ;;  %v15237_v50 = vld [vmem:[#allocation11_spill] sm:$0xff] }
 0x553   : > { %v11885_v47 = vpop.eup %11884  ;;  %11894 = vpow2.f32 %v6619_v27  ;;  %v6621_v63 = vmul.f32 1.442695, %v6565_v0  ;;  %v6566_v4 = vsub.f32 %v14500_v32, %v6522_v62  ;;  %6689 = vadd.xlane.f32.xlu1 %v6688_v20  ;;  %v15238_v27 = vpack.c.bf16 %v15236_v60, %v15237_v50 }
 0x554   : > { %11178 = vmatmul.mubr.msk.bf16.vlgmr.msra.gmra.mrb[144].mxu0 %vm6444_vm4, %v6741_v2  ;;  %v6525_v5 = vpop.xlane.xlu0 %6524  ;;  %v6691_v55 = vsel %vm6444_vm4, %v11885_v47, 0.0  ;;  %v7679_v50 = vsel %vm7536_vm5, %v5614_v13, 0 }
 0x555   : > { %v11887_v51 = vpop.eup %11886  ;;  %11896 = vpow2.f32 %v6621_v63  ;;  %v6623_v14 = vmul.f32 1.442695, %v6566_v4  ;;  %11188 = vmatpush3.bf16.msra.mxu0 %v15225_v16  ;;  %v6567_v61 = vsub.f32 %v14495_v19, %v6525_v5  ;;  %6692 = vadd.xlane.f32.xlu0 %v6691_v55  ;;  %v15240_v63 = vld [vmem:[#allocation9_spill] sm:$0xff] }
 0x556   : > { %v6528_v46 = vpop.xlane.xlu1 %6527  ;;  %v6694_v37 = vsel %vm6444_vm4, %v11887_v51, 0.0  ;;  %v6742_v32 = vpack.c.bf16 %v11887_v51, %v11885_v47  ;;  %11189 = vmatprep.mubr.msk.bf16.mxu0 %vm12047_vm0, %v15154_v24  ;;  %11199 = vmatprep.subr.bf16.mxu0 %v15154_v24  ;;  %v15239_v47 = vld [vmem:[#allocation10_spill] sm:$0xff] }
 0x557   : > { %v11889_v39 = vpop.eup %11888  ;;  %11898 = vpow2.f32 %v6623_v14  ;;  %v6625_v12 = vmul.f32 1.442695, %v6567_v61  ;;  %v6568_v31 = vsub.f32 %v14503_v23, %v6528_v46  ;;  %6695 = vadd.xlane.f32.xlu1 %v6694_v37  ;;  %v15241_v4 = vpack.c.bf16 %v15239_v47, %v15240_v63  ;;  %v5611_v37 = vld [vmem:[%s15097_s4] sm:$0xf] }
 0x558   : > { %11184 = vmatmul.mubr.msk.bf16.vlgmr.msra.gmra.mrb[144].mxu1 %vm6444_vm4, %v6742_v32  ;;  %v6531_v28 = vpop.xlane.xlu0 %6530  ;;  %v6697_v30 = vsel %vm6444_vm4, %v11889_v39, 0.0  ;;  %v7538_v32 = vsel %vm7536_vm5, %v5611_v37, 0 }
 0x559   : > { %v11891_v19 = vpop.eup %11890  ;;  %11900 = vpow2.f32 %v6625_v12  ;;  %v6627_v57 = vmul.f32 1.442695, %v6568_v31  ;;  %11194 = vmatpush3.bf16.msra.mxu1 %v15228_v52  ;;  %v6569_v34 = vsub.f32 %v14512_v11, %v6531_v28  ;;  %6698 = vadd.xlane.f32.xlu0 %v6697_v30 }
 0x55a   : > { %v6534_v8 = vpop.xlane.xlu1 %6533  ;;  %v6700_v22 = vsel %vm6444_vm4, %v11891_v19, 0.0  ;;  %v6743_v23 = vpack.c.bf16 %v11891_v19, %v11889_v39  ;;  %11195 = vmatprep.mubr.msk.bf16.mxu1 %vm12047_vm0, %v15154_v24  ;;  %11205 = vmatprep.subr.bf16.mxu1 %v15154_v24  ;;  %v5612_v39 = vld [vmem:[%s15097_s4 + $0x4] sm:$0xf] }
 0x55b   : > { %v11893_v58 = vpop.eup %11892  ;;  %11902 = vpow2.f32 %v6627_v57  ;;  %v6629_v49 = vmul.f32 1.442695, %v6569_v34  ;;  %v6570_v17 = vsub.f32 %v14517_v44, %v6534_v8  ;;  %6701 = vadd.xlane.f32.xlu1 %v6700_v22  ;;  %v7585_v12 = vsel %vm7536_vm5, %v5612_v39, 0 }
 0x55c   : > { %11190 = vmatmul.mubr.msk.bf16.vlgmr.msra.gmra.mrb[148].mxu0 %vm6444_vm4, %v6743_v23  ;;  %v6537_v9 = vpop.xlane.xlu0 %6536  ;;  %v6703_v11 = vsel %vm6444_vm4, %v11893_v58, 0.0 }
 0x55d   : > { %v11895_v3 = vpop.eup %11894  ;;  %11904 = vpow2.f32 %v6629_v49  ;;  %v6631_v38 = vmul.f32 1.442695, %v6570_v17  ;;  %11200 = vmatpush3.bf16.msra.mxu0 %v15231_v35  ;;  %v6571_v36 = vsub.f32 %v14520_v43, %v6537_v9  ;;  %6704 = vadd.xlane.f32.xlu0 %v6703_v11  ;;  %v5613_v35 = vld [vmem:[%s15097_s4 + $0x8] sm:$0xf] }
 0x55e   : > { %v6540_v7 = vpop.xlane.xlu1 %6539  ;;  %v6706_v56 = vsel %vm6444_vm4, %v11895_v3, 0.0  ;;  %v6744_v44 = vpack.c.bf16 %v11895_v3, %v11893_v58  ;;  %11201 = vmatprep.mubr.msk.bf16.mxu0 %vm12047_vm0, %v15154_v24  ;;  %11211 = vmatprep.subr.bf16.mxu0 %v15154_v24 }
 0x55f   : > { %v11897_v33 = vpop.eup %11896  ;;  %11906 = vpow2.f32 %v6631_v38  ;;  %v6633_v21 = vmul.f32 1.442695, %v6571_v36  ;;  %v6572_v41 = vsub.f32 %v15232_v1, %v6540_v7  ;;  %6707 = vadd.xlane.f32.xlu1 %v6706_v56 }
 0x560   : > { %11196 = vmatmul.mubr.msk.bf16.vlgmr.msra.gmra.mrb[148].mxu1 %vm6444_vm4, %v6744_v44  ;;  %v6709_v43 = vsel %vm6444_vm4, %v11897_v33, 0.0 }
 0x561   : > { %v11899_v59 = vpop.eup %11898  ;;  %11908 = vpow2.f32 %v6633_v21  ;;  %v6635_v40 = vmul.f32 1.442695, %v6572_v41  ;;  %11206 = vmatpush3.bf16.msra.mxu1 %v15235_v15  ;;  %6710 = vadd.xlane.f32.xlu0 %v6709_v43  ;;  %v7632_v41 = vsel %vm7536_vm5, %v5613_v35, 0 }
 0x562   : > { %v6712_v45 = vsel %vm6444_vm4, %v11899_v59, 0.0  ;;  %v6745_v42 = vpack.c.bf16 %v11899_v59, %v11897_v33  ;;  %11207 = vmatprep.mubr.msk.bf16.mxu1 %vm12047_vm0, %v15154_v24  ;;  %11217 = vmatprep.subr.bf16.mxu1 %v15154_v24 }
 0x563   : > { %v11901_v48 = vpop.eup %11900  ;;  %11910 = vpow2.f32 %v6635_v40  ;;  %6713 = vadd.xlane.f32.xlu1 %v6712_v45 }
 0x564   : > { %11202 = vmatmul.mubr.msk.bf16.vlgmr.msra.gmra.mrb[152].mxu0 %vm6444_vm4, %v6745_v42  ;;  %v6715_v10 = vsel %vm6444_vm4, %v11901_v48, 0.0 }
 0x565   : > { %v11903_v26 = vpop.eup %11902  ;;  %11212 = vmatpush3.bf16.msra.mxu0 %v15238_v27  ;;  %6716 = vadd.xlane.f32.xlu0 %v6715_v10 }
 0x566   : > { %v6718_v18 = vsel %vm6444_vm4, %v11903_v26, 0.0  ;;  %v6746_v0 = vpack.c.bf16 %v11903_v26, %v11901_v48  ;;  %11213 = vmatprep.mubr.msk.bf16.mxu0 %vm12047_vm0, %v15154_v24  ;;  %11223 = vmatprep.subr.bf16.mxu0 %v15154_v24 }
 0x567   : > { %v11905_v62 = vpop.eup %11904  ;;  %6719 = vadd.xlane.f32.xlu1 %v6718_v18 }
 0x568   : > { %11208 = vmatmul.mubr.msk.bf16.vlgmr.msra.gmra.mrb[152].mxu1 %vm6444_vm4, %v6746_v0  ;;  %v6721_v20 = vsel %vm6444_vm4, %v11905_v62, 0.0  ;;  %v5615_v0 = vld [vmem:[%s15097_s4 + $0x10] sm:$0xf] }
 0x569   : > { %v11907_v2 = vpop.eup %11906  ;;  %11218 = vmatpush3.bf16.msra.mxu1 %v15241_v4  ;;  %6722 = vadd.xlane.f32.xlu0 %v6721_v20 }
 0x56a   : > { %v6724_v5 = vsel %vm6444_vm4, %v11907_v2, 0.0  ;;  %v6747_v55 = vpack.c.bf16 %v11907_v2, %v11905_v62  ;;  %11219 = vmatprep.mubr.msk.bf16.mxu1 %vm12047_vm0, %v15154_v24  ;;  %11229 = vmatprep.subr.bf16.mxu1 %v15154_v24 }
 0x56b   : > { %v11909_v51 = vpop.eup %11908  ;;  %6725 = vadd.xlane.f32.xlu1 %v6724_v5 }
 0x56c   : > { %11214 = vmatmul.mubr.msk.bf16.vlgmr.msra.gmra.mrb[156].mxu0 %vm6444_vm4, %v6747_v55  ;;  %v6727_v14 = vsel %vm6444_vm4, %v11909_v51, 0.0 }
 0x56d   : > { %v11911_v16 = vpop.eup %11910  ;;  %6728 = vadd.xlane.f32.xlu0 %v6727_v14  ;;  %11225 = vmatprep.mubr.msk.bf16.mxu0 %vm12047_vm0, %v15154_v24  ;;  %v7726_v14 = vsel %vm7536_vm5, %v5615_v0, 0 }
 0x56e   : > { %v6730_v61 = vsel %vm6444_vm4, %v11911_v16, 0.0  ;;  %v6748_v46 = vpack.c.bf16 %v11911_v16, %v11909_v51  ;;  %11224 = vmatpush3.bf16.msra.mxu0 %v7538_v32 }
 0x56f   : > { %6731 = vadd.xlane.f32.xlu1 %v6730_v61  ;;  %11235 = vmatprep.subr.bf16.mxu0 %v15154_v24 }
 0x570   : > { %11220 = vmatmul.mubr.msk.bf16.vlgmr.msra.gmra.mrb[156].mxu1 %vm6444_vm4, %v6748_v46  ;;  %v5616_v46 = vld [vmem:[%s15097_s4 + $0x14] sm:$0xf] }
 0x571   : > { %11231 = vmatprep.mubr.msk.bf16.mxu1 %vm12047_vm0, %v15154_v24  ;;  %11230 = vmatpush3.bf16.msra.mxu1 %v7585_v12 }
 0x572   : > { %11241 = vmatprep.subr.bf16.mxu1 %v15154_v24 }
 0x5be   : > { %v6639_v31 = vpop.xlane.xlu0 %6638 }
 0x5bf   : > { %11912 = vrcp.f32 %v6639_v31 }
 0x5c0   : > { %v6642_v28 = vpop.xlane.xlu1 %6641 }
 0x5c1   : > { %11914 = vrcp.f32 %v6642_v28 }
 0x5c2   : > { %v6645_v30 = vpop.xlane.xlu0 %6644 }
 0x5c3   : > { %11916 = vrcp.f32 %v6645_v30 }
 0x5c4   : > { %v6648_v19 = vpop.xlane.xlu1 %6647 }
 0x5c5   : > { %11918 = vrcp.f32 %v6648_v19  ;;  %v7773_v19 = vsel %vm7536_vm5, %v5616_v46, 0 }
 0x5c6   : > { %v6651_v57 = vpop.xlane.xlu0 %6650 }
 0x5c7   : > { %11920 = vrcp.f32 %v6651_v57 }
 0x5c8   : > { %v6654_v29 = vpop.xlane.xlu1 %6653 }
 0x5c9   : > { %11922 = vrcp.f32 %v6654_v29  ;;  %v11913_v11 = vpop.eup %11912 }
 0x5ca   : > { %v6657_v25 = vpop.xlane.xlu0 %6656 }
 0x5cb   : > { %v11915_v54 = vpop.eup %11914  ;;  %11924 = vrcp.f32 %v6657_v25 }
 0x5cc   : > { %v6660_v52 = vpop.xlane.xlu1 %6659 }
 0x5cd   : > { %11926 = vrcp.f32 %v6660_v52  ;;  %v11917_v33 = vpop.eup %11916  ;;  %v5617_v52 = vld [vmem:[%s15097_s4 + $0x18] sm:$0xf] }
 0x5ce   : > { %v6663_v34 = vpop.xlane.xlu0 %6662 }
 0x5cf   : > { %v11919_v43 = vpop.eup %11918  ;;  %11928 = vrcp.f32 %v6663_v34 }
 0x5d0   : > { %v6666_v8 = vpop.xlane.xlu1 %6665 }
 0x5d1   : > { %11930 = vrcp.f32 %v6666_v8  ;;  %v11921_v10 = vpop.eup %11920 }
 0x5d2   : > { %v6669_v22 = vpop.xlane.xlu0 %6668 }
 0x5d3   : > { %v11923_v27 = vpop.eup %11922  ;;  %11932 = vrcp.f32 %v6669_v22 }
 0x5d4   : > { %v6672_v23 = vpop.xlane.xlu1 %6671 }
 0x5d5   : > { %11934 = vrcp.f32 %v6672_v23  ;;  %v11925_v4 = vpop.eup %11924 }
 0x5d6   : > { %v14709_v58 = vpop.xlane.xlu0 %6674 }
 0x5d7   : > { %v11927_v16 = vpop.eup %11926  ;;  %11936 = vrcp.f32 %v14709_v58 }
 0x5d8   : > { %v14711_v49 = vpop.xlane.xlu1 %6677 }
 0x5d9   : > { %11938 = vrcp.f32 %v14711_v49  ;;  %v11929_v31 = vpop.eup %11928 }
 0x5da   : > { %v14713_v17 = vpop.xlane.xlu0 %6680 }
 0x5db   : > { %v11931_v57 = vpop.eup %11930  ;;  %11940 = vrcp.f32 %v14713_v17 }
 0x5dc   : > { %v14715_v3 = vpop.xlane.xlu1 %6683 }
 0x5dd   : > { %11942 = vrcp.f32 %v14715_v3  ;;  %v11933_v49 = vpop.eup %11932 }
 0x5de   : > { %v14721_v59 = vpop.xlane.xlu0 %6686 }
 0x5df   : > { %v11935_v17 = vpop.eup %11934  ;;  %11944 = vrcp.f32 %v14721_v59 }
 0x5e0   : > { %v14726_v6 = vpop.xlane.xlu1 %6689 }
 0x5e1   : > { %11946 = vrcp.f32 %v14726_v6 }
 0x5e2   : > { %v14737_v47 = vpop.xlane.xlu0 %6692 }
 0x5e3   : > { %11948 = vrcp.f32 %v14737_v47 }
 0x5e4   : > { %v14741_v5 = vpop.xlane.xlu1 %6695 }
 0x5e5   : > { %11950 = vrcp.f32 %v14741_v5 }
 0x5e6   : > { %v6699_v29 = vpop.xlane.xlu0 %6698 }
 0x5e7   : > { %11952 = vrcp.f32 %v6699_v29 }
 0x5e8   : > { %v6702_v34 = vpop.xlane.xlu1 %6701 }
 0x5e9   : > { %11954 = vrcp.f32 %v6702_v34 }
 0x607   : > { %v6786_v9 = vpop.f32.mrb[128].mxu0 }
 0x608   : > { %v11131_v38 = vpop.f32.mrb[129].mxu0  ;;  %v7485_v36 = vmul.f32 %v11913_v11, %v6786_v9 }
 0x609   : > { %v6789_v53 = vpop.f32.mrb[130].mxu0  ;;  %v7820_v38 = vsel %vm7536_vm5, %v5617_v52, 0 }
 0x60a   : > { %v7486_v7 = vmul.f32 %v11915_v54, %v6789_v53  ;;  %v11132_v56 = vpop.f32.mrb[131].mxu0  ;;  %v5618_v53 = vld [vmem:[%s15097_s4 + $0x1c] sm:$0xf] }
 0x60b   : > { %v6830_v44 = vpop.f32.mrb[128].mxu1 }
 0x60c   : > { %v7517_v21 = vpack.c.bf16 %v7486_v7, %v7485_v36  ;;  %v11137_v1 = vpop.f32.mrb[129].mxu1  ;;  %v7487_v15 = vmul.f32 %v11917_v33, %v6830_v44  ;;  %v6705_v7 = vpop.xlane.xlu0 %6704 }
 0x60d   : > { %v6833_v40 = vpop.f32.mrb[130].mxu1  ;;  %v11937_v44 = vpop.eup %11936  ;;  %11956 = vrcp.f32 %v6705_v7 }
 0x60e   : > { %v7488_v45 = vmul.f32 %v11919_v43, %v6833_v40  ;;  %v11138_v42 = vpop.f32.mrb[131].mxu1  ;;  %11226 = vmatmul.mubr.msk.bf16.vlgmr.msra.gmra.mrb[160].mxu0 %vm5627_vm1, %v7517_v21  ;;  %v6708_v33 = vpop.xlane.xlu1 %6707  ;;  %v5619_v40 = vld [vmem:[%s15097_s4 + $0x20] sm:$0xf] }
 0x60f   : > { %v6874_v48 = vpop.f32.mrb[132].mxu0  ;;  %11236 = vmatpush3.bf16.msra.mxu0 %v7632_v41  ;;  %11237 = vmatprep.mubr.msk.bf16.mxu0 %vm12047_vm0, %v15154_v24  ;;  %v7867_v41 = vsel %vm7536_vm5, %v5618_v53, 0  ;;  %v11939_v43 = vpop.eup %11938  ;;  %11958 = vrcp.f32 %v6708_v33 }
 0x610   : > { %v7518_v26 = vpack.c.bf16 %v7488_v45, %v7487_v15  ;;  %v11143_v60 = vpop.f32.mrb[133].mxu0  ;;  %11247 = vmatprep.subr.bf16.mxu0 %v15154_v24  ;;  %v7489_v62 = vmul.f32 %v11921_v10, %v6874_v48  ;;  %v11941_v42 = vpop.eup %11940 }
 0x611   : > { %v6877_v18 = vpop.f32.mrb[134].mxu0  ;;  %v11943_v60 = vpop.eup %11942 }
 0x612   : > { %v7490_v20 = vmul.f32 %v11923_v27, %v6877_v18  ;;  %v11144_v2 = vpop.f32.mrb[135].mxu0  ;;  %11232 = vmatmul.mubr.msk.bf16.vlgmr.msra.gmra.mrb[160].mxu1 %vm5627_vm1, %v7518_v26  ;;  %v7914_v26 = vsel %vm7536_vm5, %v5619_v40, 0  ;;  %v5620_v18 = vld [vmem:[%s15097_s4 + $0x24] sm:$0xf]  ;;  %v6714_v0 = vpop.xlane.xlu1 %6713 }
 0x613   : > { %v6918_v63 = vpop.f32.mrb[132].mxu1  ;;  %11242 = vmatpush3.bf16.msra.mxu1 %v7679_v50  ;;  %11243 = vmatprep.mubr.msk.bf16.mxu1 %vm12047_vm0, %v15154_v24  ;;  %v6711_v50 = vpop.xlane.xlu0 %6710 }
 0x614   : > { %v7519_v55 = vpack.c.bf16 %v7490_v20, %v7489_v62  ;;  %v11149_v51 = vpop.f32.mrb[133].mxu1  ;;  %11253 = vmatprep.subr.bf16.mxu1 %v15154_v24  ;;  %v7491_v37 = vmul.f32 %v11925_v4, %v6918_v63  ;;  %v11945_v63 = vpop.eup %11944  ;;  %11960 = vrcp.f32 %v6711_v50 }
 0x615   : > { %v6921_v61 = vpop.f32.mrb[134].mxu1  ;;  %v11947_v51 = vpop.eup %11946  ;;  %11962 = vrcp.f32 %v6714_v0 }
 0x616   : > { %v7492_v32 = vmul.f32 %v11927_v16, %v6921_v61  ;;  %v11150_v39 = vpop.f32.mrb[135].mxu1  ;;  %11238 = vmatmul.mubr.msk.bf16.vlgmr.msra.gmra.mrb[164].mxu0 %vm5627_vm1, %v7519_v55  ;;  %v7961_v55 = vsel %vm7536_vm5, %v5620_v18, 0  ;;  %v5621_v16 = vld [vmem:[%s15097_s4 + $0x28] sm:$0xf] }
 0x617   : > { %v6962_v12 = vpop.f32.mrb[136].mxu0  ;;  %11248 = vmatpush3.bf16.msra.mxu0 %v7726_v14  ;;  %11249 = vmatprep.mubr.msk.bf16.mxu0 %vm12047_vm0, %v15154_v24 }
 0x618   : > { %v7520_v28 = vpack.c.bf16 %v7492_v32, %v7491_v37  ;;  %v11155_v30 = vpop.f32.mrb[137].mxu0  ;;  %11259 = vmatprep.subr.bf16.mxu0 %v15154_v24  ;;  %v7493_v8 = vmul.f32 %v11929_v31, %v6962_v12  ;;  %v6717_v32 = vpop.xlane.xlu0 %6716 }
 0x619   : > { %v6965_v25 = vpop.f32.mrb[138].mxu0  ;;  %v11949_v12 = vpop.eup %11948  ;;  %11964 = vrcp.f32 %v6717_v32 }
 0x61a   : > { %v7494_v22 = vmul.f32 %v11931_v57, %v6965_v25  ;;  %v11156_v23 = vpop.f32.mrb[139].mxu0  ;;  %11244 = vmatmul.mubr.msk.bf16.vlgmr.msra.gmra.mrb[164].mxu1 %vm5627_vm1, %v7520_v28  ;;  %v6720_v31 = vpop.xlane.xlu1 %6719  ;;  %v5622_v25 = vld [vmem:[%s15097_s4 + $0x2c] sm:$0xf] }
 0x61b   : > { %v7006_v58 = vpop.f32.mrb[136].mxu1  ;;  %11254 = vmatpush3.bf16.msra.mxu1 %v7773_v19  ;;  %11255 = vmatprep.mubr.msk.bf16.mxu1 %vm12047_vm0, %v15154_v24  ;;  %v8008_v19 = vsel %vm7536_vm5, %v5621_v16, 0  ;;  %v11951_v57 = vpop.eup %11950  ;;  %11966 = vrcp.f32 %v6720_v31 }
 0x61c   : > { %v7521_v9 = vpack.c.bf16 %v7494_v22, %v7493_v8  ;;  %v11161_v11 = vpop.f32.mrb[137].mxu1  ;;  %11265 = vmatprep.subr.bf16.mxu1 %v15154_v24  ;;  %v7495_v3 = vmul.f32 %v11933_v49, %v7006_v58  ;;  %v11953_v23 = vpop.eup %11952 }
 0x61d   : > { %v7009_v54 = vpop.f32.mrb[138].mxu1  ;;  %v11955_v11 = vpop.eup %11954 }
 0x61e   : > { %v7496_v35 = vmul.f32 %v11935_v17, %v7009_v54  ;;  %v11162_v36 = vpop.f32.mrb[139].mxu1  ;;  %11250 = vmatmul.mubr.msk.bf16.vlgmr.msra.gmra.mrb[168].mxu0 %vm5627_vm1, %v7521_v9  ;;  %v8055_v9 = vsel %vm7536_vm5, %v5622_v25, 0  ;;  %v5623_v54 = vld [vmem:[%s15097_s4 + $0x30] sm:$0xf]  ;;  %v6726_v53 = vpop.xlane.xlu1 %6725 }
 0x61f   : > { %v7050_v56 = vpop.f32.mrb[140].mxu0  ;;  %11260 = vmatpush3.bf16.msra.mxu0 %v7820_v38  ;;  %11261 = vmatprep.mubr.msk.bf16.mxu0 %vm12047_vm0, %v15154_v24  ;;  %v6723_v38 = vpop.xlane.xlu0 %6722 }
 0x620   : > { %v7522_v21 = vpack.c.bf16 %v7496_v35, %v7495_v3  ;;  %v11167_v1 = vpop.f32.mrb[141].mxu0  ;;  %11271 = vmatprep.subr.bf16.mxu0 %v15154_v24  ;;  %v7497_v13 = vmul.f32 %v11937_v44, %v7050_v56  ;;  %v11957_v56 = vpop.eup %11956  ;;  %11968 = vrcp.f32 %v6723_v38  ;;  %v11790_v38 = vld [vmem:[%s15103_s10 + $0x4] ss:$12 sps:$4 sm:$0xff]  }
 0x621   : > { %v7053_v59 = vpop.f32.mrb[142].mxu0  ;;  %v11959_v1 = vpop.eup %11958  ;;  %11970 = vrcp.f32 %v6726_v53 }
 0x622   : > { %v7498_v6 = vmul.f32 %v11939_v43, %v7053_v59  ;;  %v11168_v15 = vpop.f32.mrb[143].mxu0  ;;  %11256 = vmatmul.mubr.msk.bf16.vlgmr.msra.gmra.mrb[168].mxu1 %vm5627_vm1, %v7522_v21  ;;  %v8102_v21 = vsel %vm7536_vm5, %v5623_v54, 0  ;;  %v5624_v43 = vld [vmem:[%s15097_s4 + $0x34] sm:$0xf] }
 0x623   : > { %v7094_v45 = vpop.f32.mrb[140].mxu1  ;;  %11266 = vmatpush3.bf16.msra.mxu1 %v7867_v41  ;;  %11267 = vmatprep.mubr.msk.bf16.mxu1 %vm12047_vm0, %v15154_v24 }
 0x624   : > { %v7523_v48 = vpack.c.bf16 %v7498_v6, %v7497_v13  ;;  %v11173_v10 = vpop.f32.mrb[141].mxu1  ;;  %11277 = vmatprep.subr.bf16.mxu1 %v15154_v24  ;;  %v7499_v62 = vmul.f32 %v11941_v42, %v7094_v45  ;;  %v6729_v6 = vpop.xlane.xlu0 %6728 }
 0x625   : > { %v7097_v27 = vpop.f32.mrb[142].mxu1  ;;  %v11961_v45 = vpop.eup %11960  ;;  %11972 = vrcp.f32 %v6729_v6 }
 0x626   : > { %v7500_v20 = vmul.f32 %v11943_v60, %v7097_v27  ;;  %v11174_v2 = vpop.f32.mrb[143].mxu1  ;;  %11262 = vmatmul.mubr.msk.bf16.vlgmr.msra.gmra.mrb[172].mxu0 %vm5627_vm1, %v7523_v48  ;;  %v6732_v42 = vpop.xlane.xlu1 %6731  ;;  %v5625_v27 = vld [vmem:[%s15097_s4 + $0x38] sm:$0xf] }
 0x627   : > { %v7138_v47 = vpop.f32.mrb[144].mxu0  ;;  %11272 = vmatpush3.bf16.msra.mxu0 %v7914_v26  ;;  %11273 = vmatprep.mubr.msk.bf16.mxu0 %vm12047_vm0, %v15154_v24  ;;  %v8149_v26 = vsel %vm7536_vm5, %v5624_v43, 0  ;;  %v11963_v60 = vpop.eup %11962  ;;  %11974 = vrcp.f32 %v6732_v42 }
 0x628   : > { %v7524_v4 = vpack.c.bf16 %v7500_v20, %v7499_v62  ;;  %v11179_v5 = vpop.f32.mrb[145].mxu0  ;;  %11283 = vmatprep.subr.bf16.mxu0 %v15154_v24  ;;  %v7501_v61 = vmul.f32 %v11945_v63, %v7138_v47  ;;  %v11965_v2 = vpop.eup %11964 }
 0x629   : > { %v7141_v14 = vpop.f32.mrb[146].mxu0  ;;  %v11967_v5 = vpop.eup %11966 }
 0x62a   : > { %v7502_v46 = vmul.f32 %v11947_v51, %v7141_v14  ;;  %v11180_v37 = vpop.f32.mrb[147].mxu0  ;;  %11268 = vmatmul.mubr.msk.bf16.vlgmr.msra.gmra.mrb[172].mxu1 %vm5627_vm1, %v7524_v4  ;;  %v8196_v4 = vsel %vm7536_vm5, %v5625_v27, 0  ;;  %v5626_v51 = vld [vmem:[%s15097_s4 + $0x3c] sm:$0xf] }
 0x62b   : > { %v7182_v39 = vpop.f32.mrb[144].mxu1  ;;  %11278 = vmatpush3.bf16.msra.mxu1 %v7961_v55  ;;  %11279 = vmatprep.mubr.msk.bf16.mxu1 %vm12047_vm0, %v15154_v24  ;;  %v11969_v37 = vpop.eup %11968 }
 0x62c   : > { %v7525_v28 = vpack.c.bf16 %v7502_v46, %v7501_v61  ;;  %v11185_v30 = vpop.f32.mrb[145].mxu1  ;;  %11289 = vmatprep.subr.bf16.mxu1 %v15154_v24  ;;  %v7503_v52 = vmul.f32 %v11949_v12, %v7182_v39  ;;  %v8243_v12 = vsel %vm7536_vm5, %v5626_v51, 0  ;;  %v11971_v31 = vpop.eup %11970 }
 0x62d   : > { %v7185_v29 = vpop.f32.mrb[146].mxu1 }
 0x62e   : > { %v7504_v34 = vmul.f32 %v11951_v57, %v7185_v29  ;;  %v11186_v8 = vpop.f32.mrb[147].mxu1  ;;  %11274 = vmatmul.mubr.msk.bf16.vlgmr.msra.gmra.mrb[176].mxu0 %vm5627_vm1, %v7525_v28 }
 0x62f   : > { %v7226_v22 = vpop.f32.mrb[148].mxu0  ;;  %11284 = vmatpush3.bf16.msra.mxu0 %v8008_v19  ;;  %11285 = vmatprep.mubr.msk.bf16.mxu0 %vm12047_vm0, %v15154_v24  ;;  %v11973_v25 = vpop.eup %11972 }
 0x630   : > { %v7526_v58 = vpack.c.bf16 %v7504_v34, %v7503_v52  ;;  %v11191_v49 = vpop.f32.mrb[149].mxu0  ;;  %11295 = vmatprep.subr.bf16.mxu0 %v15154_v24  ;;  %v7505_v3 = vmul.f32 %v11953_v23, %v7226_v22 }
 0x631   : > { %v7229_v17 = vpop.f32.mrb[150].mxu0  ;;  %v11975_v8 = vpop.eup %11974 }
 0x632   : > { %v7506_v35 = vmul.f32 %v11955_v11, %v7229_v17  ;;  %v11192_v36 = vpop.f32.mrb[151].mxu0  ;;  %11280 = vmatmul.mubr.msk.bf16.vlgmr.msra.gmra.mrb[176].mxu1 %vm5627_vm1, %v7526_v58  ;;  %v11788_v11 = vld [vmem:[%s15103_s10] ss:$12 sps:$4 sm:$0xff]  }
 0x633   : > { %v7270_v7 = vpop.f32.mrb[148].mxu1  ;;  %11290 = vmatpush3.bf16.msra.mxu1 %v8055_v9  ;;  %11291 = vmatprep.mubr.msk.bf16.mxu1 %vm12047_vm0, %v15154_v24 }
 0x634   : > { %v7527_v44 = vpack.c.bf16 %v7506_v35, %v7505_v3  ;;  %v11197_v33 = vpop.f32.mrb[149].mxu1  ;;  %11301 = vmatprep.subr.bf16.mxu1 %v15154_v24  ;;  %v7507_v59 = vmul.f32 %v11957_v56, %v7270_v7 }
 0x635   : > { %v7273_v41 = vpop.f32.mrb[150].mxu1 }
 0x636   : > { %v7508_v40 = vmul.f32 %v11959_v1, %v7273_v41  ;;  %v11198_v13 = vpop.f32.mrb[151].mxu1  ;;  %11286 = vmatmul.mubr.msk.bf16.vlgmr.msra.gmra.mrb[180].mxu0 %vm5627_vm1, %v7527_v44 }
 0x637   : > { %v7314_v15 = vpop.f32.mrb[152].mxu0  ;;  %11296 = vmatpush3.bf16.msra.mxu0 %v8102_v21  ;;  %11297 = vmatprep.mubr.msk.bf16.mxu0 %vm12047_vm0, %v15154_v24 }
 0x638   : > { %v7528_v48 = vpack.c.bf16 %v7508_v40, %v7507_v59  ;;  %v11203_v10 = vpop.f32.mrb[153].mxu0  ;;  %11307 = vmatprep.subr.bf16.mxu0 %v15154_v24  ;;  %v7509_v18 = vmul.f32 %v11961_v45, %v7314_v15 }
 0x639   : > { %v7317_v50 = vpop.f32.mrb[154].mxu0 }
 0x63a   : > { %v7510_v0 = vmul.f32 %v11963_v60, %v7317_v50  ;;  %v11204_v62 = vpop.f32.mrb[155].mxu0  ;;  %11292 = vmatmul.mubr.msk.bf16.vlgmr.msra.gmra.mrb[180].mxu1 %vm5627_vm1, %v7528_v48 }
 0x63b   : > { %v7358_v20 = vpop.f32.mrb[152].mxu1  ;;  %11302 = vmatpush3.bf16.msra.mxu1 %v8149_v26  ;;  %11303 = vmatprep.mubr.msk.bf16.mxu1 %vm12047_vm0, %v15154_v24 }
 0x63c   : > { %v7529_v47 = vpack.c.bf16 %v7510_v0, %v7509_v18  ;;  %v11209_v63 = vpop.f32.mrb[153].mxu1  ;;  %11313 = vmatprep.subr.bf16.mxu1 %v15154_v24  ;;  %v7511_v14 = vmul.f32 %v11965_v2, %v7358_v20 }
 0x63d   : > { %v7361_v55 = vpop.f32.mrb[154].mxu1 }
 0x63e   : > { %v7512_v16 = vmul.f32 %v11967_v5, %v7361_v55  ;;  %v11210_v61 = vpop.f32.mrb[155].mxu1  ;;  %11298 = vmatmul.mubr.msk.bf16.vlgmr.msra.gmra.mrb[184].mxu0 %vm5627_vm1, %v7529_v47 }
 0x63f   : > { %v7402_v46 = vpop.f32.mrb[156].mxu0  ;;  %11308 = vmatpush3.bf16.msra.mxu0 %v8196_v4  ;;  %11309 = vmatprep.mubr.msk.bf16.mxu0 %vm12047_vm0, %v15154_v24 }
 0x640   : > { %v7530_v32 = vpack.c.bf16 %v7512_v16, %v7511_v14  ;;  %v11215_v39 = vpop.f32.mrb[157].mxu0  ;;  %v7513_v30 = vmul.f32 %v11969_v37, %v7402_v46  ;;  %8549 = vmatprep.subr.bf16.mxu0 %v11790_v38 }
 0x641   : > { %v7405_v28 = vpop.f32.mrb[158].mxu0 }
 0x642   : > { %v7514_v19 = vmul.f32 %v11971_v31, %v7405_v28  ;;  %v11216_v57 = vpop.f32.mrb[159].mxu0  ;;  %11304 = vmatmul.mubr.msk.bf16.vlgmr.msra.gmra.mrb[184].mxu1 %vm5627_vm1, %v7530_v32 }
 0x643   : > { %v7446_v29 = vpop.f32.mrb[156].mxu1  ;;  %11314 = vmatpush3.bf16.msra.mxu1 %v8243_v12  ;;  %11315 = vmatprep.mubr.msk.bf16.mxu1 %vm12047_vm0, %v15154_v24 }
 0x644   : > { %v7531_v52 = vpack.c.bf16 %v7514_v19, %v7513_v30  ;;  %v11221_v34 = vpop.f32.mrb[157].mxu1  ;;  %11319 = vmatprep.subr.bf16.mxu1 %v15154_v24  ;;  %v7515_v23 = vmul.f32 %v11973_v25, %v7446_v29 }
 0x645   : > { %v7449_v22 = vpop.f32.mrb[158].mxu1 }
 0x646   : > { %v7516_v58 = vmul.f32 %v11975_v8, %v7449_v22  ;;  %v11222_v49 = vpop.f32.mrb[159].mxu1  ;;  %11310 = vmatmul.mubr.msk.bf16.vlgmr.msra.gmra.mrb[188].mxu0 %vm5627_vm1, %v7531_v52 }
 0x647   : > { %8550 = vmatpush1.bf16.msra.mxu0 %v11788_v11 }
 0x648   : > { %v7532_v9 = vpack.c.bf16 %v7516_v58, %v7515_v23 }
 0x64a   : > { %11316 = vmatmul.mubr.msk.bf16.vlgmr.msra.gmra.mrb[188].mxu1 %vm5627_vm1, %v7532_v9 }
 0x64b   : > { %11335 = vmatprep.mubr.msk.bf16.mxu1 %vm12047_vm0, %v15154_v24 }
 0x6e1   : > { %v7574_v17 = vpop.f32.mrb[160].mxu0 }
 0x6e2   : > { %v11227_v54 = vpop.f32.mrb[161].mxu0 }
 0x6e3   : > { %v7577_v53 = vpop.f32.mrb[162].mxu0 }
 0x6e4   : > { %v11228_v3 = vpop.f32.mrb[163].mxu0 }
 0x6e5   : > { %v7621_v35 = vpop.f32.mrb[160].mxu1 }
 0x6e6   : > { %v8286_v36 = vadd.f32 %v7621_v35, %v7574_v17  ;;  %v11233_v7 = vpop.f32.mrb[161].mxu1 }
 0x6e7   : > { %v7624_v56 = vpop.f32.mrb[162].mxu1 }
 0x6e8   : > { %v8301_v44 = vadd.f32 %v7624_v56, %v7577_v53  ;;  %v11234_v33 = vpop.f32.mrb[163].mxu1 }
 0x6e9   : > { %v7668_v21 = vpop.f32.mrb[164].mxu0 }
 0x6ea   : > { %v8287_v1 = vadd.f32 %v8286_v36, %v7668_v21  ;;  %v11239_v41 = vpop.f32.mrb[165].mxu0 }
 0x6eb   : > { %v7671_v43 = vpop.f32.mrb[166].mxu0 }
 0x6ec   : > { %v8302_v59 = vadd.f32 %v8301_v44, %v7671_v43  ;;  %v11240_v40 = vpop.f32.mrb[167].mxu0 }
 0x6ed   : > { %v7715_v13 = vpop.f32.mrb[164].mxu1 }
 0x6ee   : > { %v8288_v6 = vadd.f32 %v8287_v1, %v7715_v13  ;;  %v11245_v15 = vpop.f32.mrb[165].mxu1 }
 0x6ef   : > { %v7718_v45 = vpop.f32.mrb[166].mxu1 }
 0x6f0   : > { %v8303_v42 = vadd.f32 %v8302_v59, %v7718_v45  ;;  %v11246_v48 = vpop.f32.mrb[167].mxu1 }
 0x6f1   : > { %v7762_v10 = vpop.f32.mrb[168].mxu0 }
 0x6f2   : > { %v8289_v26 = vadd.f32 %v8288_v6, %v7762_v10  ;;  %v11251_v60 = vpop.f32.mrb[169].mxu0 }
 0x6f3   : > { %v7765_v50 = vpop.f32.mrb[170].mxu0 }
 0x6f4   : > { %v8304_v27 = vadd.f32 %v8303_v42, %v7765_v50  ;;  %v11252_v18 = vpop.f32.mrb[171].mxu0 }
 0x6f5   : > { %v7809_v0 = vpop.f32.mrb[168].mxu1 }
 0x6f6   : > { %v8290_v62 = vadd.f32 %v8289_v26, %v7809_v0  ;;  %v11257_v20 = vpop.f32.mrb[169].mxu1 }
 0x6f7   : > { %v7812_v2 = vpop.f32.mrb[170].mxu1 }
 0x6f8   : > { %v8305_v47 = vadd.f32 %v8304_v27, %v7812_v2  ;;  %v11258_v63 = vpop.f32.mrb[171].mxu1  ;;  %v9444_v27 = vld [vmem:[%s15098_s5] ss:$0 sm:$0xff] }
 0x6f9   : > { %v7856_v4 = vpop.f32.mrb[172].mxu0  ;;  %v11980_v63 = vld [vmem:[%s12190_s15] sm:$0xff] }
 0x6fa   : > { %v8291_v5 = vadd.f32 %v8290_v62, %v7856_v4  ;;  %v11263_v55 = vpop.f32.mrb[173].mxu0 }
 0x6fb   : > { %v7859_v51 = vpop.f32.mrb[174].mxu0  ;;  %v11981_v55 = vld [vmem:[%s12190_s15 + $0x8] sm:$0xff]  ;;  %s12050_s15 = smov [#allocation2]  }
 0x6fc   : > { %v8306_v14 = vadd.f32 %v8305_v47, %v7859_v51  ;;  %v11264_v16 = vpop.f32.mrb[175].mxu0  ;;  %s11986_s22 = sshll.u32 %s12050_s15, 4  ;;  %s11987_s22 = int_to_ptr.vmem [resolvable:$false] %s11986_s22 }
 0x6fd   : > { %v7903_v61 = vpop.f32.mrb[172].mxu1  ;;  %s11988_s0 = scalar_lea.vmem %s11987_s22, 512  ;;  %p11989_p0 = scmp.lt.s32.totalorder %s15049_s26, %s11987_s22 }
 0x6fe   : > { %v8292_v46 = vadd.f32 %v8291_v5, %v7903_v61  ;;  %v11269_v37 = vpop.f32.mrb[173].mxu1  ;;  %v11791_v61 = vld [vmem:[%s15103_s10 + $0x8] ss:$12 sps:$4 sm:$0xff]   ;;  %p11990_p1 = scmp.lt.s32.totalorder %s11988_s0, %s11982_s21 }
 0x6ff   : > { %v7906_v32 = vpop.f32.mrb[174].mxu1  ;;  %11320 = vmatpush3.bf16.msra.mxu1 %v11791_v61  ;;  %v11792_v37 = vld [vmem:[%s15103_s10 + $0x18] ss:$12 sps:$4 sm:$0xff]  }
 0x700   : > { %v8307_v39 = vadd.f32 %v8306_v14, %v7906_v32  ;;  %v11270_v12 = vpop.f32.mrb[175].mxu1  ;;  %11321 = vmatprep.subr.bf16.mxu1 %v15154_v24  ;;  %v11795_v32 = vld [vmem:[%s15103_s10 + $0x20] ss:$12 sps:$4 sm:$0xff]   ;;  %v11831_v61 = vld [vmem:[%s15105_s12 + $0x18] sm:$0xff]   ;;  %p11991_p2 = por %p11990_p1, %p11989_p0 }
 0x701   : > { %v7950_v31 = vpop.f32.mrb[176].mxu0  ;;  %v11796_v12 = vld [vmem:[%s15103_s10 + $0x30] ss:$12 sps:$4 sm:$0xff]  }
 0x702   : > { %v8293_v28 = vadd.f32 %v8292_v46, %v7950_v31  ;;  %v11275_v30 = vpop.f32.mrb[177].mxu0  ;;  %v11794_v46 = vld [vmem:[%s15103_s10 + $0x1c] ss:$12 sps:$4 sm:$0xff]   ;;  %v11799_v31 = vld [vmem:[%s15103_s10 + $0x38] ss:$12 sps:$4 sm:$0xff]   ;;  %p11992_p3 = pnand %p11991_p2, %p11985_p13 }
 0x703   : > { %v7953_v19 = vpop.f32.mrb[178].mxu0  ;;  %8551 = vmatprep.subr.bf16.mxu0 %v11794_v46  ;;  %11322 = vmatpush3.bf16.msra.mxu1 %v11795_v32  ;;  %v11800_v30 = vld [vmem:[%s15103_s10 + $0x48] ss:$12 sps:$4 sm:$0xff]   ;;  %v11833_v46 = vld [vmem:[%s15105_s12 + $0x60] sm:$0xff]  }
 0x704   : > { %v8308_v57 = vadd.f32 %v8307_v39, %v7953_v19  ;;  %v11276_v29 = vpop.f32.mrb[179].mxu0  ;;  %8552 = vmatpush1.bf16.msra.mxu0 %v11792_v37  ;;  %v11798_v39 = vld [vmem:[%s15103_s10 + $0x34] ss:$12 sps:$4 sm:$0xff]   ;;  %11323 = vmatprep.subr.bf16.mxu1 %v15154_v24  ;;  %v11803_v19 = vld [vmem:[%s15103_s10 + $0x50] ss:$12 sps:$4 sm:$0xff]  }
 0x705   : > { %v7997_v25 = vpop.f32.mrb[176].mxu1  ;;  %8553 = vmatprep.subr.bf16.mxu0 %v11798_v39  ;;  %v11804_v29 = vld [vmem:[%s15103_s10 + $0x60] ss:$12 sps:$4 sm:$0xff]  }
 0x706   : > { %v8294_v52 = vadd.f32 %v8293_v28, %v7997_v25  ;;  %v11281_v34 = vpop.f32.mrb[177].mxu1  ;;  %v11802_v28 = vld [vmem:[%s15103_s10 + $0x4c] ss:$12 sps:$4 sm:$0xff]   ;;  %v11807_v25 = vld [vmem:[%s15103_s10 + $0x68] ss:$12 sps:$4 sm:$0xff]   ;;  %v11832_v37 = vld [vmem:[%s15105_s12 + $0xa0] sm:$0xff]  }
 0x707   : > { %v8000_v8 = vpop.f32.mrb[178].mxu1  ;;  %11324 = vmatpush3.bf16.msra.mxu1 %v11799_v31  ;;  %v11808_v34 = vld [vmem:[%s15103_s10 + $0x78] ss:$12 sps:$4 sm:$0xff]   ;;  %v11836_v39 = vld [vmem:[%s15105_s12 + $0x68] sm:$0xff]  }
 0x708   : > { %v8309_v22 = vadd.f32 %v8308_v57, %v8000_v8  ;;  %v11282_v23 = vpop.f32.mrb[179].mxu1  ;;  %8554 = vmatpush1.bf16.msra.mxu0 %v11796_v12  ;;  %11325 = vmatprep.subr.bf16.mxu1 %v15154_v24  ;;  %v11806_v57 = vld [vmem:[%s15103_s10 + $0x64] ss:$12 sps:$4 sm:$0xff]   ;;  %v11811_v8 = vld [vmem:[%s15103_s10 + $0x80] ss:$12 sps:$4 sm:$0xff]  }
 0x709   : > { %v8044_v58 = vpop.f32.mrb[180].mxu0  ;;  %8555 = vmatprep.subr.bf16.mxu0 %v11802_v28  ;;  %v12049_v23 = vmov 0   ;;  %v11834_v32 = vld [vmem:[%s15105_s12 + $0x20] sm:$0xff]   ;;  %v11835_v12 = vld [vmem:[%s15105_s12 + $0xa8] sm:$0xff]   ;;  %v11838_v28 = vld [vmem:[%s15105_s12 + $0xb0] sm:$0xff]  }
 0x70a   : > { %v8295_v49 = vadd.f32 %v8294_v52, %v8044_v58  ;;  %v11287_v9 = vpop.f32.mrb[181].mxu0  ;;  %v11810_v52 = vld [vmem:[%s15103_s10 + $0x7c] ss:$12 sps:$4 sm:$0xff]   ;;  %8581 = vmatprep.mubr.bf16.mxu0 %v12049_v23 }
 0x70b   : > { %v8047_v11 = vpop.f32.mrb[182].mxu0  ;;  %11326 = vmatpush3.bf16.msra.mxu1 %v11803_v19  ;;  %v11812_v58 = vld [vmem:[%s15103_s10 + $0x90] ss:$12 sps:$4 sm:$0xff]   ;;  %v11818_v9 = vld [vmem:[%s15103_s10 + $0xac] ss:$12 sps:$4 sm:$0xff]  }
 0x70c   : > { %v8310_v38 = vadd.f32 %v8309_v22, %v8047_v11  ;;  %v11288_v17 = vpop.f32.mrb[183].mxu0  ;;  %8556 = vmatpush1.bf16.msra.mxu0 %v11800_v30  ;;  %11327 = vmatprep.subr.bf16.mxu1 %v15154_v24  ;;  %v11814_v22 = vld [vmem:[%s15103_s10 + $0x94] ss:$12 sps:$4 sm:$0xff]   ;;  %v11837_v31 = vld [vmem:[%s15105_s12 + $0x28] sm:$0xff]  }
 0x70d   : > { %v8091_v54 = vpop.f32.mrb[180].mxu1  ;;  %8557 = vmatprep.subr.bf16.mxu0 %v11806_v57  ;;  %v11816_v11 = vld [vmem:[%s15103_s10 + $0xa8] ss:$12 sps:$4 sm:$0xff]   ;;  %v11821_v17 = vld [vmem:[%s15105_s12 + $0x40] sm:$0xff]   ;;  %v11841_v57 = vld [vmem:[%s15105_s12 + $0xb8] sm:$0xff]  }
 0x70e   : > { %v8296_v53 = vadd.f32 %v8295_v49, %v8091_v54  ;;  %v11293_v3 = vpop.f32.mrb[181].mxu1  ;;  %v11815_v49 = vld [vmem:[%s15103_s10 + $0x98] ss:$12 sps:$4 sm:$0xff]   ;;  %v11839_v30 = vld [vmem:[%s15105_s12 + $0x70] sm:$0xff]  }
 0x70f   : > { %v8094_v35 = vpop.f32.mrb[182].mxu1  ;;  %11328 = vmatpush3.bf16.msra.mxu1 %v11807_v25  ;;  %v11840_v19 = vld [vmem:[%s15105_s12 + $0x30] sm:$0xff]   ;;  %v11843_v25 = vld [vmem:[%s15105_s12 + $0x38] sm:$0xff]  }
 0x710   : > { %v8311_v36 = vadd.f32 %v8310_v38, %v8094_v35  ;;  %v11294_v7 = vpop.f32.mrb[183].mxu1  ;;  %8558 = vmatpush1.bf16.msra.mxu0 %v11804_v29  ;;  %11329 = vmatprep.subr.bf16.mxu1 %v15154_v24  ;;  %v11819_v38 = vld [vmem:[%s15103_s10 + $0xb0] ss:$12 sps:$4 sm:$0xff]  }
 0x711   : > { %v8138_v56 = vpop.f32.mrb[184].mxu0  ;;  %8559 = vmatprep.subr.bf16.mxu0 %v11810_v52  ;;  %v11842_v29 = vld [vmem:[%s15105_s12 + $0x78] sm:$0xff]   ;;  %v15242_v52 = vld [vmem:[#allocation15_spill] sm:$0xff] }
 0x712   : > { %v8297_v44 = vadd.f32 %v8296_v53, %v8138_v56  ;;  %v11299_v33 = vpop.f32.mrb[185].mxu0 }
 0x713   : > { %v8141_v21 = vpop.f32.mrb[186].mxu0  ;;  %11330 = vmatpush3.bf16.msra.mxu1 %v11811_v8  ;;  %v8404_v8 = vld [vmem:[%s15104_s11] sm:$0x7] }
 0x714   : > { %v8312_v1 = vadd.f32 %v8311_v36, %v8141_v21  ;;  %v11300_v41 = vpop.f32.mrb[187].mxu0  ;;  %8560 = vmatpush1.bf16.msra.mxu0 %v11808_v34  ;;  %11331 = vmatprep.subr.bf16.mxu1 %v15154_v24  ;;  %v8408_v34 = vsub.s32 0, %v15242_v52 }
 0x715   : > { %v8185_v43 = vpop.f32.mrb[184].mxu1  ;;  %8561 = vmatprep.subr.bf16.mxu0 %v11814_v22  ;;  %v8412_v22 = vsub.s32 1, %v15242_v52 }
 0x716   : > { %v8298_v59 = vadd.f32 %v8297_v44, %v8185_v43  ;;  %v11305_v40 = vpop.f32.mrb[185].mxu1  ;;  %v8409_v23 = vrot.slane %v8404_v8, %v8408_v34 }
 0x717   : > { %v8188_v13 = vpop.f32.mrb[186].mxu1  ;;  %11332 = vmatpush3.bf16.msra.mxu1 %v11815_v49  ;;  %v8413_v49 = vrot.slane %v8404_v8, %v8412_v22 }
 0x718   : > { %v8313_v6 = vadd.f32 %v8312_v1, %v8188_v13  ;;  %v11306_v15 = vpop.f32.mrb[187].mxu1  ;;  %8562 = vmatpush1.bf16.msra.mxu0 %v11812_v58  ;;  %11333 = vmatprep.subr.bf16.mxu1 %v15154_v24 }
 0x719   : > { %v8232_v45 = vpop.f32.mrb[188].mxu0  ;;  %8563 = vmatprep.subr.bf16.mxu0 %v11818_v9 }
 0x71a   : > { %v8299_v42 = vadd.f32 %v8298_v59, %v8232_v45  ;;  %v11311_v48 = vpop.f32.mrb[189].mxu0 }
 0x71b   : > { %v8235_v10 = vpop.f32.mrb[190].mxu0  ;;  %11334 = vmatpush3.bf16.msra.mxu1 %v11819_v38 }
 0x71c   : > { %v8314_v26 = vadd.f32 %v8313_v6, %v8235_v10  ;;  %v11312_v60 = vpop.f32.mrb[191].mxu0  ;;  %8564 = vmatpush1.bf16.msra.mxu0 %v11816_v11  ;;  %11339 = vmatprep.subr.bf16.mxu1 %v15154_v24  ;;  %v9445_v6 = vld [vmem:[%s15101_s8] ss:$0 sm:$0xff] }
 0x71d   : > { %v8279_v50 = vpop.f32.mrb[188].mxu1  ;;  %10040 = vmatprep.subr.bf16.mxu0 %v11821_v17 }
 0x71e   : > { %v8300_v18 = vadd.f32 %v8299_v42, %v8279_v50  ;;  %v11317_v0 = vpop.f32.mrb[189].mxu1 }
 0x71f   : > { %v8282_v62 = vpop.f32.mrb[190].mxu1  ;;  %v11822_v0 = vld [vmem:[%s15105_s12] sm:$0xff]  }
 0x720   : > { %v8323_v20 = vadd.f32 %v9444_v27, %v8300_v18  ;;  %v8315_v2 = vadd.f32 %v8314_v26, %v8282_v62  ;;  %v11318_v47 = vpop.f32.mrb[191].mxu1  ;;  %v9446_v26 = vld [vmem:[%s15102_s9] ss:$0 sm:$0xff] }
 0x721   : > { %v11820_v18 = vld [vmem:[%s15105_s12 + $0x80] sm:$0xff]   ;;  %v11825_v47 = vld [vmem:[%s15105_s12 + $0x8] sm:$0xff]  }
 0x722   : > { %v14858_v4 = vadd.f32 %v11980_v63, %v8323_v20  ;;  %v8324_v5 = vadd.f32 %v9444_v27, %v8315_v2  ;;  %v11824_v20 = vld [vmem:[%s15105_s12 + $0x48] sm:$0xff]   ;;  %v11827_v63 = vld [vmem:[%s15105_s12 + $0x50] sm:$0xff]  }
 0x723   : > { %v11823_v2 = vld [vmem:[%s15105_s12 + $0x88] sm:$0xff]  }
 0x724   : > { %v14861_v51 = vadd.f32 %v11981_v55, %v8324_v5  ;;  %8329 = vadd.xlane.f32.xlu0 %v14858_v4  ;;  %v8335_v14 = vmul.f32 %v14858_v4, %v14858_v4  ;;  %v11826_v5 = vld [vmem:[%s15105_s12 + $0x90] sm:$0xff]  }
 0x725   : > { %v11828_v55 = vld [vmem:[%s15105_s12 + $0x10] sm:$0xff]  }
 0x726   : > { %8331 = vadd.xlane.f32.xlu1 %v14861_v51  ;;  %v8336_v16 = vmul.f32 %v14861_v51, %v14861_v51 }
 0x728   : > { %8337 = vadd.xlane.f32.xlu0 %v8335_v14  ;;  %v11830_v14 = vld [vmem:[%s15105_s12 + $0x58] sm:$0xff]  }
 0x72a   : > { %8339 = vadd.xlane.f32.xlu1 %v8336_v16  ;;  %v11829_v16 = vld [vmem:[%s15105_s12 + $0x98] sm:$0xff]  }
 0x7b1   : > { %v8330_v54 = vpop.xlane.xlu0 %8329 }
 0x7b2   : > { %v8333_v53 = vmul.f32 0.011904762, %v8330_v54 }
 0x7b3   : > { %v8332_v3 = vpop.xlane.xlu1 %8331 }
 0x7b4   : > { %v8334_v35 = vmul.f32 0.011904762, %v8332_v3  ;;  %v8343_v7 = vmul.f32 %v8333_v53, %v8333_v53  ;;  %v8347_v40 = vsub.f32 %v14858_v4, %v8333_v53 }
 0x7b5   : > { %v8338_v36 = vpop.xlane.xlu0 %8337 }
 0x7b6   : > { %v8341_v56 = vmul.f32 0.011904762, %v8338_v36  ;;  %v8344_v33 = vmul.f32 %v8334_v35, %v8334_v35  ;;  %v8348_v15 = vsub.f32 %v14861_v51, %v8334_v35 }
 0x7b7   : > { %v8340_v44 = vpop.xlane.xlu1 %8339 }
 0x7b8   : > { %v8345_v21 = vsub.f32 %v8341_v56, %v8343_v7  ;;  %v8342_v1 = vmul.f32 0.011904762, %v8340_v44 }
 0x7ba   : > { %v8349_v41 = vadd.f32 1e-05, %v8345_v21  ;;  %v8346_v43 = vsub.f32 %v8342_v1, %v8344_v33 }
 0x7bc   : > { %11976 = vrsqrt.f32 %v8349_v41  ;;  %v8350_v59 = vadd.f32 1e-05, %v8346_v43 }
 0x7be   : > { %11978 = vrsqrt.f32 %v8350_v59 }
 0x7c6   : > { %v11977_v13 = vpop.eup %11976 }
 0x7c7   : > { %v8353_v45 = vmul.f32 %v11977_v13, %v8347_v40 }
 0x7c8   : > { %v11979_v42 = vpop.eup %11978 }
 0x7c9   : > { %v8354_v48 = vmul.f32 %v11979_v42, %v8348_v15  ;;  %v8361_v10 = vmul.f32 %v9445_v6, %v8353_v45 }
 0x7cb   : > { %v8362_v60 = vmul.f32 %v9445_v6, %v8354_v48  ;;  %v8369_v50 = vadd.f32 %v9446_v26, %v8361_v10 }
 0x7cd   : > { %v8370_v27 = vadd.f32 %v9446_v26, %v8362_v60  ;;  %v9471_v60 = vld [vmem:[%s15106_s13] ss:$0 sm:$0xff] }
 0x7cf   : > { %v8371_v62 = vpack.c.bf16 %v8370_v27, %v8369_v50 }
 0x7d1   : > { %8582 = vmatmul.mubr.bf16.vlgmr.msra.gmra.mrb[192].mxu0 %v8371_v62  ;;  %11336 = vmatmul.mubr.bf16.vlgmr.msra.gmra.mrb[192].mxu1 %v8371_v62 }
 0x7d2   : > { %11340 = vmatpush3.bf16.msra.mxu1 %v11820_v18  ;;  %10041 = vmatpush3.bf16.msra.mxu0 %v11822_v0 }
 0x7d3   : > { %11341 = vmatprep.subr.bf16.mxu1 %v15154_v24  ;;  %10042 = vmatprep.subr.bf16.mxu0 %v11824_v20 }
 0x7d4   : > { %11355 = vmatprep.mubr.msk.bf16.mxu1 %vm12047_vm0, %v15154_v24 }
 0x7d6   : > { %11342 = vmatpush3.bf16.msra.mxu1 %v11823_v2  ;;  %10043 = vmatpush3.bf16.msra.mxu0 %v11825_v47 }
 0x7d7   : > { %11343 = vmatprep.subr.bf16.mxu1 %v15154_v24  ;;  %10044 = vmatprep.subr.bf16.mxu0 %v11827_v63 }
 0x7da   : > { %11344 = vmatpush3.bf16.msra.mxu1 %v11826_v5  ;;  %10045 = vmatpush3.bf16.msra.mxu0 %v11828_v55 }
 0x7db   : > { %11345 = vmatprep.subr.bf16.mxu1 %v15154_v24  ;;  %10046 = vmatprep.subr.bf16.mxu0 %v11830_v14 }
 0x7de   : > { %11346 = vmatpush3.bf16.msra.mxu1 %v11829_v16  ;;  %10047 = vmatpush3.bf16.msra.mxu0 %v11831_v61 }
 0x7df   : > { %11347 = vmatprep.subr.bf16.mxu1 %v15154_v24  ;;  %10048 = vmatprep.subr.bf16.mxu0 %v11833_v46 }
 0x7e2   : > { %11348 = vmatpush3.bf16.msra.mxu1 %v11832_v37  ;;  %10049 = vmatpush3.bf16.msra.mxu0 %v11834_v32 }
 0x7e3   : > { %11349 = vmatprep.subr.bf16.mxu1 %v15154_v24  ;;  %10050 = vmatprep.subr.bf16.mxu0 %v11836_v39 }
 0x7e6   : > { %11350 = vmatpush3.bf16.msra.mxu1 %v11835_v12  ;;  %10051 = vmatpush3.bf16.msra.mxu0 %v11837_v31 }
 0x7e7   : > { %11351 = vmatprep.subr.bf16.mxu1 %v15154_v24  ;;  %10052 = vmatprep.subr.bf16.mxu0 %v11839_v30 }
 0x7ea   : > { %11352 = vmatpush3.bf16.msra.mxu1 %v11838_v28  ;;  %10053 = vmatpush3.bf16.msra.mxu0 %v11840_v19 }
 0x7eb   : > { %11353 = vmatprep.subr.bf16.mxu1 %v15154_v24  ;;  %10054 = vmatprep.subr.bf16.mxu0 %v11842_v29  ;;  %v8416_v24 = vsub.s32 2, %v15242_v52 }
 0x7ed   : > { %v8417_v58 = vrot.slane %v8404_v8, %v8416_v24 }
 0x7ee   : > { %11354 = vmatpush3.bf16.msra.mxu1 %v11841_v57  ;;  %10055 = vmatpush3.bf16.msra.mxu0 %v11843_v25 }
 0x8a4   : > { %v8583_v9 = vpop.f32.mrb[192].mxu0  ;;  %v8626_v11 = vpop.f32.mrb[192].mxu1 }
 0x8a5   : > { %v8584_v38 = vadd.f32 %v8583_v9, %v8409_v23  ;;  %v8627_v17 = vadd.f32 %v8626_v11, %v8417_v58  ;;  %v8585_v54 = vpop.f32.mrb[193].mxu0  ;;  %v11337_v53 = vpop.f32.mrb[193].mxu1 }
 0x8a6   : > { %v8586_v3 = vadd.f32 %v8585_v54, %v8413_v49  ;;  %v8587_v35 = vpop.f32.mrb[194].mxu0  ;;  %v8629_v36 = vpop.f32.mrb[194].mxu1 }
 0x8a7   : > { %v8588_v7 = vadd.f32 %v8587_v35, %v8409_v23  ;;  %v8630_v56 = vadd.f32 %v8629_v36, %v8417_v58  ;;  %v8589_v44 = vpop.f32.mrb[195].mxu0  ;;  %v11338_v33 = vpop.f32.mrb[195].mxu1  ;;  %v8633_v1 = vmax.f32 %v8584_v38, 0.0  ;;  %v8635_v41 = vmax.f32 %v8627_v17, 0.0 }
 0x8a8   : > { %v8590_v21 = vadd.f32 %v8589_v44, %v8413_v49  ;;  %v8634_v40 = vmax.f32 %v8586_v3, 0.0 }
 0x8a9   : > { %v8636_v43 = vmax.f32 %v8588_v7, 0.0  ;;  %v8638_v59 = vmax.f32 %v8630_v56, 0.0 }
 0x8aa   : > { %v8637_v13 = vmax.f32 %v8590_v21, 0.0 }
 0x8ab   : > { %v8639_v6 = vpack.c.bf16 %v8636_v43, %v8633_v1  ;;  %v8641_v15 = vpack.c.bf16 %v8638_v59, %v8635_v41 }
 0x8ac   : > { %v8640_v45 = vpack.c.bf16 %v8637_v13, %v8634_v40 }
 0x8ad   : > { %11356 = vmatmul.mubr.bf16.vlgmr.msra.gmra.mrb[196].mxu1 %v8641_v15 }
 0x8ae   : > { %8873 = vmatprep.mubr.bf16.mxu0 %v8640_v45 }
 0x8af   : > { %8874 = vmatmul.mubr.bf16.vlgmr.msra.gmra.mrb[196].mxu0 %v8639_v6 }
 0x980   : > { %v8916_v42 = vpop.f32.mrb[196].mxu1 }
 0x981   : > { %v11357_v48 = vpop.f32.mrb[197].mxu1 }
 0x982   : > { %v10056_v10 = vpop.f32.mrb[196].mxu0  ;;  %v8919_v26 = vpop.f32.mrb[198].mxu1 }
 0x983   : > { %v10057_v50 = vpop.f32.mrb[197].mxu0  ;;  %v11358_v27 = vpop.f32.mrb[199].mxu1 }
 0x984   : > { %v10058_v18 = vadd.f32 %v10057_v50, %v10056_v10  ;;  %v10059_v0 = vpop.f32.mrb[198].mxu0 }
 0x985   : > { %v10060_v62 = vpop.f32.mrb[199].mxu0 }
 0x986   : > { %v8876_v20 = vadd.f32 %v10058_v18, %v9471_v60  ;;  %v10061_v2 = vadd.f32 %v10060_v62, %v10059_v0 }
 0x988   : > { %v8917_v47 = vadd.f32 %v8916_v42, %v8876_v20  ;;  %v8879_v63 = vadd.f32 %v10061_v2, %v9471_v60 }
 0x98a   : > { %v8923_v5 = vadd.f32 %v8917_v47, %v14858_v4  ;;  %v8920_v55 = vadd.f32 %v8919_v26, %v8879_v63 }
 0x98c   : > { %8925 = vst [vmem:[%s460_s25] sm:$0xff] %v8923_v5  ;;  %v8924_v14 = vadd.f32 %v8920_v55, %v14861_v51 }
 0x98e   : > { %8926 = vst [vmem:[%s460_s25 + $0x8] sm:$0xff] %v8924_v14 }
 0x98f   : > { %11995 = shalt.err (!%p11992_p3)
}
 0x990   : > { %s11996_s20 = scalar_lea.hbm %s15047_s18, 256  ;;  %s12000_s28 = scalar_lea.hbm %s15107_s14, 512 }
 0x991   : > { %p11997_p4 = scmp.ne.s32.totalorder %s15047_s18, %s11996_s20  ;;  %p12001_p9 = scmp.lt.u32.totalorder %s15047_s18, %s15107_s14 }
 0x992   : > { %p12002_p10 = scmp.lt.u32.totalorder %s12000_s28, %s11996_s20  ;;  %p12004_p12 = scmp.lt.u32.totalorder %s11996_s20, %s15047_s18 }
 0x993   : > { %p11998_p7 = pnand %p11997_p4, %p12166_p5 }
 0x994   : > { %p12003_p11 = por %p12002_p10, %p12001_p9 }
 0x995   : > { %p11999_p8 = pneg %p11998_p7 }
 0x996   : > { %p12005_p13 = por %p12004_p12, %p12003_p11 }
 0x998   : > { %p12006_p0 = pnand %p12005_p13, %p11999_p8 }
 0x99a   : > { %12009 = shalt.err (!%p12006_p0)
}
 0x99b   : > { %s12051_s21 = smov 128   ;;  %s12052_s0 = smov 8  }
 0x99c   : > { %11359 = dma.vmem_to_hbm [thread:$0]  (%p12166_p5), %s15049_s26, 256, %s15047_s18, %s15052_s17, %s12051_s21, %s12051_s21, %s12052_s0  }
 0x99d PF: > { %p11365_p1 = scmp.ge.s32.totalorder %s12044_s16, 2  ;;  %s8956_s25 = sand.u32 1, %s12032_s29  }
 0x99e   : > { %s8957_s20 = scalar_lea.sflag [#allocation3], %s8956_s25 }
 0x99f   : > { %p11362_p2 = pnand %p11365_p1, %p12170_p6 }
 0x9a1   : > { %12027 = dma.done.wait (!%p11362_p2), %s8957_s20, 256  }
 0x9a2   : > { %12029 = vsyncadd (!%p11362_p2), %s8957_s20, 4294967040  ;;  %s15243_s27 = sld [smem:[#allocation5_spill]]  ;;  %s15244_s15 = sld [smem:[#allocation6_spill]] }
 0x9a3   : > { %p24_p3 = scmp.ge.s32.totalorder %s12153_s19, 4   ;;  %s15245_s29 = smov %s12036_s30 }
 0x9a4   : > { %s15247_s16 = smov %s12153_s19 }
 0x9a5   :  { %26 = sbr.rel (!%p24_p3) target bundleno = 5 (0x5), region = 111 }
 0x9a8   : > { %s15246_s30 = smov %s15243_s27 }
 0x9ac   :  { %8962 = vsyncpa [#allocation3], 1 }
 0x9ad   :  { %8964 = vsyncpa [#allocation3 + $0x1], 1 }

</bundles_post_ra>
